<compile_context>
chip_gen: v5e
topology: v5e:2x2
jax: 0.10.0
libtpu: 0.0.40
codegen_flags: <defaults>
</compile_context>

<pallas_src>
import functools

import jax
import jax.numpy as jnp
from jax.experimental import pallas as pl
from jax.experimental.pallas import tpu as pltpu


def _mm(a, w_ref):
    """MXU matmul of an activation against a weight ref, f32 accumulation."""
    return jnp.dot(a.astype(w_ref.dtype), w_ref[...],
                   preferred_element_type=jnp.float32)


# ----------------------------------------------------------------------------
# Bulk input projection: gates_x = x @ [W_ih_fwd | W_ih_bwd] + [b_fwd | b_bwd]
# One big MXU-friendly matmul (M = T*N), tiled over rows.
# ----------------------------------------------------------------------------
def _proj_kernel(x_ref, w_ref, b_ref, o_ref):
    o_ref[...] = _mm(x_ref[...], w_ref) + b_ref[...]


def input_projection(x2d, w_cat, b_cat, *, block_rows=512):
    M, D = x2d.shape
    G = w_cat.shape[1]
    tm = M if M <= block_rows else block_rows
    return pl.pallas_call(
        _proj_kernel,
        out_shape=jax.ShapeDtypeStruct((M, G), jnp.float32),
        grid_spec=pltpu.PrefetchScalarGridSpec(
            num_scalar_prefetch=0,
            grid=(pl.cdiv(M, tm),),
            in_specs=[
                pl.BlockSpec((tm, D), lambda i: (i, 0)),
                pl.BlockSpec((D, G), lambda i: (0, 0)),
                pl.BlockSpec((1, G), lambda i: (0, 0)),
            ],
            out_specs=pl.BlockSpec((tm, G), lambda i: (i, 0)),
        ),
        compiler_params=pltpu.CompilerParams(
            dimension_semantics=("parallel",)),
    )(x2d, w_cat, b_cat)


# ----------------------------------------------------------------------------
# Fused bidirectional LSTM layer: whole sequence in VMEM, single grid step,
# in-kernel fori_loop processing fwd step t and bwd step T-1-t together.
# Only h @ W_hh remains in the serial dependency chain (x @ W_ih precomputed).
# ----------------------------------------------------------------------------
def _bilstm_kernel(gx_ref, whh_f_ref, whh_b_ref, out_ref, of_ref, ob_ref,
                   *, hidden, seq_len, unroll):
    H = hidden
    T = seq_len
    NB = gx_ref.shape[1]

    # Full-vreg activation: sigmoid everywhere, tanh only on the g (cell
    # candidate) lane block, selected by a lane mask (EUP ops on whole vregs
    # instead of four 32-lane sliced activations).
    lane = jax.lax.broadcasted_iota(jnp.int32, (NB, 4 * H), 1)
    is_g = (lane >= 2 * H) & (lane < 3 * H)

    def gates_to_hc(gates, c_prev):
        act = jnp.where(is_g, jnp.tanh(gates), jax.nn.sigmoid(gates))
        i = act[:, 0 * H:1 * H]
        f = act[:, 1 * H:2 * H]
        g = act[:, 2 * H:3 * H]
        o = act[:, 3 * H:4 * H]
        c = f * c_prev + i * g
        h = o * jnp.tanh(c)
        return h, c

    def step(t, carry):
        h_f, c_f, h_b, c_b = carry
        tb = T - 1 - t
        gx_f = gx_ref[t][:, :4 * H]           # precomputed x@W_ih + b (fwd)
        gx_b = gx_ref[tb][:, 4 * H:]          # precomputed x@W_ih + b (bwd)
        g_f = gx_f + _mm(h_f, whh_f_ref)
        g_b = gx_b + _mm(h_b, whh_b_ref)
        h_f, c_f = gates_to_hc(g_f, c_f)
        h_b, c_b = gates_to_hc(g_b, c_b)
        of_ref[t] = h_f
        ob_ref[tb] = h_b
        return h_f, c_f, h_b, c_b

    zero = jnp.zeros((NB, H), jnp.float32)
    jax.lax.fori_loop(0, T, step, (zero, zero, zero, zero), unroll=unroll)

    # One fused store of the (T, N, 2H) output (fwd in [:H], bwd in [H:]).
    out_ref[...] = jnp.concatenate([of_ref[...], ob_ref[...]], axis=-1)


def bilstm_layer(gx, whh_f, whh_b, *, hidden):
    T, NB, G2 = gx.shape                       # G2 == 8 * hidden
    kernel = functools.partial(_bilstm_kernel, hidden=hidden, seq_len=T,
                               unroll=(T <= 64))
    return pl.pallas_call(
        kernel,
        out_shape=jax.ShapeDtypeStruct((T, NB, 2 * hidden), jnp.float32),
        grid_spec=pltpu.PrefetchScalarGridSpec(
            num_scalar_prefetch=0,
            grid=(1,),
            in_specs=[
                pl.BlockSpec((T, NB, G2), lambda i: (0, 0, 0)),
                pl.BlockSpec(whh_f.shape, lambda i: (0, 0)),
                pl.BlockSpec(whh_b.shape, lambda i: (0, 0)),
            ],
            out_specs=pl.BlockSpec((T, NB, 2 * hidden), lambda i: (0, 0, 0)),
            scratch_shapes=[
                pltpu.VMEM((T, NB, hidden), jnp.float32),   # fwd outputs
                pltpu.VMEM((T, NB, hidden), jnp.float32),   # bwd outputs
            ],
        ),
        compiler_params=pltpu.CompilerParams(
            dimension_semantics=("arbitrary",)),
    )(gx, whh_f, whh_b)


# ----------------------------------------------------------------------------
# Head: all fc_* layers in one grid step over the full (T*N, .) slab.
# Per-batch means over T and the speaker-adapt broadcast use tiny selection
# matmuls (sel: (N, T*N), bcast: (T*N, N)) built in the wrapper.
# ----------------------------------------------------------------------------
def _head_kernel(lstm_ref, spk_ref, resm_ref, bcast_ref, sel_ref,
                 wl_ref, bl_ref, wa_ref, ba_ref, wm_ref, bm_ref,
                 wg_ref, bg_ref, we1_ref, be1_ref, we2_ref, be2_ref,
                 we3_ref, be3_ref, waff_ref,
                 mask_ref, res_ref, emb_ref):
    ol = lstm_ref[...]            # (TN, 2H) flattened time-major (row = t*N+n)
    spk = spk_ref[...]            # (N, E)
    bcast = bcast_ref[...]        # (TN, N)  one-hot of (row % N)
    sel = sel_ref[...]            # (N, TN)  per-batch mean-over-T weights

    # fc_lstm: Linear(2H, E) + Sigmoid
    u = jax.nn.sigmoid(_mm(ol, wl_ref) + bl_ref[...])                   # (TN,E)
    # fc_adpt: Linear(E, E) + Sigmoid on spk_info
    adpt = jax.nn.sigmoid(_mm(spk, wa_ref) + ba_ref[...])               # (N,E)
    # broadcast adpt over time and modulate
    si = u * jnp.dot(bcast, adpt, preferred_element_type=jnp.float32)   # (TN,E)

    # fc_mask: Linear(E, F) + Sigmoid
    spk_mask = jax.nn.sigmoid(_mm(si, wm_ref) + bm_ref[...])            # (TN,F)
    mask_ref[...] = spk_mask
    res_ref[...] = jnp.clip(resm_ref[...] - spk_mask, 0.0, 1.0)

    # fc_emb: Linear(E,50) -> Linear(50,50) -> Linear(50,E) -> Sigmoid
    e = _mm(si, we1_ref) + be1_ref[...]
    e = _mm(e, we2_ref) + be2_ref[...]
    e = jax.nn.sigmoid(_mm(e, we3_ref) + be3_ref[...])                  # (TN,E)
    spk_emb = jnp.dot(sel, e, preferred_element_type=jnp.float32)       # mean_T
    spk_emb = _mm(spk_emb, waff_ref)                                    # affine

    # fc_gate: Linear(E, E) + Sigmoid, then mean over T
    gate = jax.nn.sigmoid(_mm(si, wg_ref) + bg_ref[...])                # (TN,E)
    gate = jnp.dot(sel, gate, preferred_element_type=jnp.float32)       # (N,E)

    out_emb = gate * spk_emb + spk
    # matches torch: out_emb / ||out_emb||_2 (no eps in the reference module)
    norm = jnp.sqrt(jnp.sum(out_emb * out_emb, axis=1, keepdims=True))
    emb_ref[...] = out_emb / norm


def head_call(lstm2d, spk, resm2d, bcast, sel, head_weights):
    TN = lstm2d.shape[0]
    NB, E = spk.shape
    F = resm2d.shape[1]

    def full(a):
        nd = a.ndim
        return pl.BlockSpec(a.shape, lambda i, _nd=nd: (0,) * _nd)

    arrays = [lstm2d, spk, resm2d, bcast, sel] + list(head_weights)
    return pl.pallas_call(
        _head_kernel,
        out_shape=(jax.ShapeDtypeStruct((TN, F), jnp.float32),
                   jax.ShapeDtypeStruct((TN, F), jnp.float32),
                   jax.ShapeDtypeStruct((NB, E), jnp.float32)),
        grid_spec=pltpu.PrefetchScalarGridSpec(
            num_scalar_prefetch=0,
            grid=(1,),
            in_specs=[full(a) for a in arrays],
            out_specs=(pl.BlockSpec((TN, F), lambda i: (0, 0)),
                       pl.BlockSpec((TN, F), lambda i: (0, 0)),
                       pl.BlockSpec((NB, E), lambda i: (0, 0))),
        ),
        compiler_params=pltpu.CompilerParams(
            dimension_semantics=("arbitrary",)),
    )(*arrays)


# ----------------------------------------------------------------------------
# Full forward (wrapper glue: layout permutes, free reshapes, layer stacking)
# ----------------------------------------------------------------------------
def rsan_forward(spec, spat, res_mask, spk_info, params, *, hidden, n_layers,
                 use_bf16_matmul=False):
    N, F, T = spec.shape
    TN = T * N

    # Optional: bf16 weights for the MXU (v6e/v7x). Biases, accumulation and
    # the recurrent state stay f32.  Off by default (exact f32 semantics).
    if use_bf16_matmul:
        params = jax.tree_util.tree_map(
            lambda w: w.astype(jnp.bfloat16) if w.shape[0] > 1 else w, params)

    # Layout glue: single concat along features, then one transpose to
    # time-major (T, N, D0).  res_mask also kept time-major for the head.
    x_nft = jnp.concatenate([spec, spat, res_mask], axis=1)      # (N, D0, T)
    x_tnd = jnp.transpose(x_nft, (2, 0, 1))                      # (T, N, D0)
    resm_tnf = jnp.transpose(res_mask, (2, 0, 1))                # (T, N, F)

    x2d = x_tnd.reshape(TN, x_tnd.shape[-1])                     # free reshape
    for layer in range(n_layers):
        w_cat, b_cat, whh_f, whh_b = params[f"lstm_l{layer}"]
        gx2d = input_projection(x2d, w_cat, b_cat)               # (TN, 8H)
        gx = gx2d.reshape(T, N, 8 * hidden)                      # free reshape
        h = bilstm_layer(gx, whh_f, whh_b, hidden=hidden)        # (T, N, 2H)
        x2d = h.reshape(TN, 2 * hidden)                          # free reshape

    # Tiny selection matrices for per-batch broadcast / mean inside the head.
    n_of_row = jnp.arange(TN, dtype=jnp.int32) % N
    bcast = jax.nn.one_hot(n_of_row, N, dtype=jnp.float32)       # (TN, N)
    sel = jnp.transpose(bcast) / float(T)                        # (N, TN)
    resm2d = resm_tnf.reshape(TN, F)

    mask2d, res2d, emb = head_call(x2d, spk_info, resm2d, bcast, sel,
                                   params["head"])

    est_mask = jnp.transpose(mask2d.reshape(T, N, F), (1, 2, 0))  # (N, F, T)
    res_out = jnp.transpose(res2d.reshape(T, N, F), (1, 2, 0))    # (N, F, T)
    return {"est_mask": est_mask, "res_mask": res_out, "spk_info": emb}


# ----------------------------------------------------------------------------
# Deterministic parameter init (synthetic, PyTorch-style uniform bounds)
# ----------------------------------------------------------------------------
def init_params(key, *, n_bin, in_spat, hidden, n_layers, spk_emb_dim):
    params = {}
    d0 = 2 * n_bin + in_spat

    def uni(k, shape, bound):
        return jax.random.uniform(k, shape, jnp.float32, -bound, bound)

    k_lstm = hidden ** -0.5
    for layer in range(n_layers):
        d_in = d0 if layer == 0 else 2 * hidden
        wih, bias, whh = [], [], []
        for _ in range(2):                                  # fwd, bwd
            key, k1, k2, k3, k4 = jax.random.split(key, 5)
            wih.append(uni(k1, (d_in, 4 * hidden), k_lstm))     # W_ih^T
            whh.append(uni(k2, (hidden, 4 * hidden), k_lstm))   # W_hh^T
            bias.append(uni(k3, (1, 4 * hidden), k_lstm)
                        + uni(k4, (1, 4 * hidden), k_lstm))     # b_ih + b_hh
        params[f"lstm_l{layer}"] = (jnp.concatenate(wih, axis=1),   # (D, 8H)
                                    jnp.concatenate(bias, axis=1),  # (1, 8H)
                                    whh[0], whh[1])

    E = spk_emb_dim

    def linear(k, fan_in, fan_out, bias=True):
        k1, k2 = jax.random.split(k)
        bnd = fan_in ** -0.5
        w = uni(k1, (fan_in, fan_out), bnd)                 # stored transposed
        if bias:
            return w, uni(k2, (1, fan_out), bnd)
        return (w,)

    key, *ks = jax.random.split(key, 8)
    wl, bl = linear(ks[0], 2 * hidden, E)        # fc_lstm
    wa, ba = linear(ks[1], E, E)                 # fc_adpt
    wm, bm = linear(ks[2], E, n_bin)             # fc_mask
    wg, bg = linear(ks[3], E, E)                 # fc_gate
    we1, be1 = linear(ks[4], E, 50)              # fc_emb[0]
    we2, be2 = linear(ks[5], 50, 50)             # fc_emb[1]
    we3, be3 = linear(ks[6], 50, E)              # fc_emb[2]
    key, kaff = jax.random.split(key)
    (waff,) = linear(kaff, E, E, bias=False)     # fc_affine

    params["head"] = [wl, bl, wa, ba, wm, bm, wg, bg,
                      we1, be1, we2, be2, we3, be3, waff]
    return params


if __name__ == "__main__":
    # Small shapes consistent with the module's forward.
    N, n_bin, in_spat, T = 2, 16, 16, 8
    hidden, n_layers, spk_emb_dim = 32, 2, 32

    key = jax.random.PRNGKey(0)
    key, k1, k2, k3, k4, kp = jax.random.split(key, 6)
    spec = jax.random.normal(k1, (N, n_bin, T), jnp.float32)
    spat = jax.random.normal(k2, (N, in_spat, T), jnp.float32)
    res_mask = jax.random.uniform(k3, (N, n_bin, T), jnp.float32)
    spk_info = jax.random.normal(k4, (N, spk_emb_dim), jnp.float32)

    params = init_params(kp, n_bin=n_bin, in_spat=in_spat, hidden=hidden,
                         n_layers=n_layers, spk_emb_dim=spk_emb_dim)

    forward = jax.jit(functools.partial(rsan_forward, hidden=hidden,
                                        n_layers=n_layers))
    out = forward(spec, spat, res_mask, spk_info, params)
    out = jax.tree_util.tree_map(jax.block_until_ready, out)

    assert out["est_mask"].shape == (N, n_bin, T)
    assert out["res_mask"].shape == (N, n_bin, T)
    assert out["spk_info"].shape == (N, spk_emb_dim)
    assert all(bool(jnp.all(jnp.isfinite(v))) for v in out.values())
    print("KERNEL_OK")
</pallas_src>

<mosaic_0001>
module attributes {stable_mosaic.version = 11 : i64} {
  func.func @_proj_kernel(%arg0: i32, %arg1: memref<16x64xf32, #tpu.memory_space<vmem>>, %arg2: memref<64x256xf32, #tpu.memory_space<vmem>>, %arg3: memref<1x256xf32, #tpu.memory_space<vmem>>, %arg4: memref<16x256xf32, #tpu.memory_space<vmem>>) attributes {dimension_semantics = [#tpu.dimension_semantics<parallel>], iteration_bounds = array<i64: 1>, scalar_prefetch = 0 : i64, scratch_operands = 0 : i64, tpu.core_type = #tpu.core_type<tc>, window_params = [{transform_indices = @transform_0, window_bounds = array<i64: 16, 64>}, {pipeline_mode = #tpu.pipeline_mode<synchronous>, transform_indices = @transform_1, window_bounds = array<i64: 64, 256>}, {pipeline_mode = #tpu.pipeline_mode<synchronous>, transform_indices = @transform_2, window_bounds = array<i64: 1, 256>}, {transform_indices = @transform_3, window_bounds = array<i64: 16, 256>}]} {
    %c0 = arith.constant 0 : index
    %c0_0 = arith.constant 0 : index
    %0 = vector.load %arg1[%c0, %c0_0] : memref<16x64xf32, #tpu.memory_space<vmem>>, vector<16x64xf32>
    %c0_1 = arith.constant 0 : index
    %c0_2 = arith.constant 0 : index
    %1 = vector.load %arg2[%c0_1, %c0_2] : memref<64x256xf32, #tpu.memory_space<vmem>>, vector<64x256xf32>
    %cst = arith.constant dense<0.000000e+00> : vector<16x256xf32>
    %2 = tpu.matmul %0, %1, %cst {dimension_numbers = #tpu.dot_dimension_numbers<[1], [0], [0], [1], [0, 0, 1, 1], [], []>} : vector<16x64xf32>, vector<64x256xf32>, vector<16x256xf32> -> vector<16x256xf32>
    %c0_3 = arith.constant 0 : index
    %c0_4 = arith.constant 0 : index
    %3 = vector.load %arg3[%c0_3, %c0_4] : memref<1x256xf32, #tpu.memory_space<vmem>>, vector<1x256xf32>
    %4 = vector.broadcast %3 : vector<1x256xf32> to vector<16x256xf32>
    %5 = arith.addf %2, %4 : vector<16x256xf32>
    %c0_5 = arith.constant 0 : index
    %c0_6 = arith.constant 0 : index
    %6 = vector.load %arg4[%c0_5, %c0_6] : memref<16x256xf32, #tpu.memory_space<vmem>>, vector<16x256xf32>
    tpu.vector_store %arg4[%c0_5, %c0_6], %5 {strides = array<i32>} : memref<16x256xf32, #tpu.memory_space<vmem>>, vector<16x256xf32>,
    return
  }
  func.func @transform_0(%arg0: i32) -> (i32, i32) {
    %c0_i32 = arith.constant 0 : i32
    %c0_i32_0 = arith.constant 0 : i32
    return %arg0, %c0_i32 : i32, i32
  }
  func.func @transform_1(%arg0: i32) -> (i32, i32) {
    %c0_i32 = arith.constant 0 : i32
    %c0_i32_0 = arith.constant 0 : i32
    %c0_i32_1 = arith.constant 0 : i32
    return %c0_i32, %c0_i32_0 : i32, i32
  }
  func.func @transform_2(%arg0: i32) -> (i32, i32) {
    %c0_i32 = arith.constant 0 : i32
    %c0_i32_0 = arith.constant 0 : i32
    %c0_i32_1 = arith.constant 0 : i32
    return %c0_i32, %c0_i32_0 : i32, i32
  }
  func.func @transform_3(%arg0: i32) -> (i32, i32) {
    %c0_i32 = arith.constant 0 : i32
    %c0_i32_0 = arith.constant 0 : i32
    return %arg0, %c0_i32 : i32, i32
  }
}

module attributes {stable_mosaic.version = 11 : i64} {
  func.func @_bilstm_kernel(%arg0: i32, %arg1: memref<8x2x256xf32, #tpu.memory_space<vmem>>, %arg2: memref<32x128xf32, #tpu.memory_space<vmem>>, %arg3: memref<32x128xf32, #tpu.memory_space<vmem>>, %arg4: memref<8x2x64xf32, #tpu.memory_space<vmem>>, %arg5: memref<8x2x32xf32, #tpu.memory_space<vmem>>, %arg6: memref<8x2x32xf32, #tpu.memory_space<vmem>>) attributes {dimension_semantics = [#tpu.dimension_semantics<arbitrary>], iteration_bounds = array<i64: 1>, scalar_prefetch = 0 : i64, scratch_operands = 2 : i64, tpu.core_type = #tpu.core_type<tc>, window_params = [{pipeline_mode = #tpu.pipeline_mode<synchronous>, transform_indices = @transform_0, window_bounds = array<i64: 8, 2, 256>}, {pipeline_mode = #tpu.pipeline_mode<synchronous>, transform_indices = @transform_1, window_bounds = array<i64: 32, 128>}, {pipeline_mode = #tpu.pipeline_mode<synchronous>, transform_indices = @transform_2, window_bounds = array<i64: 32, 128>}, {pipeline_mode = #tpu.pipeline_mode<synchronous>, transform_indices = @transform_3, window_bounds = array<i64: 8, 2, 64>}]} {
    %0 = tpu.iota {dimensions = array<i32: 1>} : vector<2x128xi32>
    %c64_i32 = arith.constant 64 : i32
    %1 = vector.broadcast %c64_i32 : i32 to vector<2x128xi32>
    %2 = arith.cmpi sge, %0, %1 : vector<2x128xi32>
    %c96_i32 = arith.constant 96 : i32
    %3 = vector.broadcast %c96_i32 : i32 to vector<2x128xi32>
    %4 = arith.cmpi slt, %0, %3 : vector<2x128xi32>
    %5 = arith.andi %2, %4 : vector<2x128xi1>
    %cst = arith.constant 0.000000e+00 : f32
    %6 = vector.broadcast %cst : f32 to vector<2x32xf32>
    %c0_i32 = arith.constant 0 : i32
    %c7_i32 = arith.constant 7 : i32
    %7 = arith.subi %c7_i32, %c0_i32 : i32
    %8 = arith.index_cast %c0_i32 : i32 to index
    %c0 = arith.constant 0 : index
    %c0_0 = arith.constant 0 : index
    %9 = vector.load %arg1[%8, %c0, %c0_0] : memref<8x2x256xf32, #tpu.memory_space<vmem>>, vector<1x2x256xf32>
    %10 = vector.shape_cast %9 : vector<1x2x256xf32> to vector<2x256xf32>
    %11 = vector.extract_strided_slice %10 {offsets = [0, 0], sizes = [2, 128], strides = [1, 1]} : vector<2x256xf32> to vector<2x128xf32>
    %12 = arith.index_cast %7 : i32 to index
    %c0_1 = arith.constant 0 : index
    %c0_2 = arith.constant 0 : index
    %13 = vector.load %arg1[%12, %c0_1, %c0_2] : memref<8x2x256xf32, #tpu.memory_space<vmem>>, vector<1x2x256xf32>
    %14 = vector.shape_cast %13 : vector<1x2x256xf32> to vector<2x256xf32>
    %15 = vector.extract_strided_slice %14 {offsets = [0, 128], sizes = [2, 128], strides = [1, 1]} : vector<2x256xf32> to vector<2x128xf32>
    %c0_3 = arith.constant 0 : index
    %c0_4 = arith.constant 0 : index
    %16 = vector.load %arg2[%c0_3, %c0_4] : memref<32x128xf32, #tpu.memory_space<vmem>>, vector<32x128xf32>
    %cst_5 = arith.constant dense<0.000000e+00> : vector<2x128xf32>
    %17 = tpu.matmul %6, %16, %cst_5 {dimension_numbers = #tpu.dot_dimension_numbers<[1], [0], [0], [1], [0, 0, 1, 1], [], []>} : vector<2x32xf32>, vector<32x128xf32>, vector<2x128xf32> -> vector<2x128xf32>
    %18 = arith.addf %11, %17 : vector<2x128xf32>
    %c0_6 = arith.constant 0 : index
    %c0_7 = arith.constant 0 : index
    %19 = vector.load %arg3[%c0_6, %c0_7] : memref<32x128xf32, #tpu.memory_space<vmem>>, vector<32x128xf32>
    %cst_8 = arith.constant dense<0.000000e+00> : vector<2x128xf32>
    %20 = tpu.matmul %6, %19, %cst_8 {dimension_numbers = #tpu.dot_dimension_numbers<[1], [0], [0], [1], [0, 0, 1, 1], [], []>} : vector<2x32xf32>, vector<32x128xf32>, vector<2x128xf32> -> vector<2x128xf32>
    %21 = arith.addf %15, %20 : vector<2x128xf32>
    %22 = math.tanh %18 : vector<2x128xf32>
    %23 = arith.negf %18 : vector<2x128xf32>
    %24 = math.exp %23 : vector<2x128xf32>
    %cst_9 = arith.constant 1.000000e+00 : f32
    %25 = vector.broadcast %cst_9 : f32 to vector<2x128xf32>
    %26 = arith.addf %25, %24 : vector<2x128xf32>
    %27 = arith.divf %25, %26 : vector<2x128xf32>
    %28 = arith.select %5, %22, %27 : vector<2x128xi1>, vector<2x128xf32>
    %29 = vector.extract_strided_slice %28 {offsets = [0, 0], sizes = [2, 32], strides = [1, 1]} : vector<2x128xf32> to vector<2x32xf32>
    %30 = vector.extract_strided_slice %28 {offsets = [0, 32], sizes = [2, 32], strides = [1, 1]} : vector<2x128xf32> to vector<2x32xf32>
    %31 = vector.extract_strided_slice %28 {offsets = [0, 64], sizes = [2, 32], strides = [1, 1]} : vector<2x128xf32> to vector<2x32xf32>
    %32 = vector.extract_strided_slice %28 {offsets = [0, 96], sizes = [2, 32], strides = [1, 1]} : vector<2x128xf32> to vector<2x32xf32>
    %33 = arith.mulf %30, %6 : vector<2x32xf32>
    %34 = arith.mulf %29, %31 : vector<2x32xf32>
    %35 = arith.addf %33, %34 : vector<2x32xf32>
    %36 = math.tanh %35 : vector<2x32xf32>
    %37 = arith.mulf %32, %36 : vector<2x32xf32>
    %38 = math.tanh %21 : vector<2x128xf32>
    %39 = arith.negf %21 : vector<2x128xf32>
    %40 = math.exp %39 : vector<2x128xf32>
    %cst_10 = arith.constant 1.000000e+00 : f32
    %41 = vector.broadcast %cst_10 : f32 to vector<2x128xf32>
    %42 = arith.addf %41, %40 : vector<2x128xf32>
    %43 = arith.divf %41, %42 : vector<2x128xf32>
    %44 = arith.select %5, %38, %43 : vector<2x128xi1>, vector<2x128xf32>
    %45 = vector.extract_strided_slice %44 {offsets = [0, 0], sizes = [2, 32], strides = [1, 1]} : vector<2x128xf32> to vector<2x32xf32>
    %46 = vector.extract_strided_slice %44 {offsets = [0, 32], sizes = [2, 32], strides = [1, 1]} : vector<2x128xf32> to vector<2x32xf32>
    %47 = vector.extract_strided_slice %44 {offsets = [0, 64], sizes = [2, 32], strides = [1, 1]} : vector<2x128xf32> to vector<2x32xf32>
    %48 = vector.extract_strided_slice %44 {offsets = [0, 96], sizes = [2, 32], strides = [1, 1]} : vector<2x128xf32> to vector<2x32xf32>
    %49 = arith.mulf %46, %6 : vector<2x32xf32>
    %50 = arith.mulf %45, %47 : vector<2x32xf32>
    %51 = arith.addf %49, %50 : vector<2x32xf32>
    %52 = math.tanh %51 : vector<2x32xf32>
    %53 = arith.mulf %48, %52 : vector<2x32xf32>
    %54 = arith.index_cast %c0_i32 : i32 to index
    %c0_11 = arith.constant 0 : index
    %c0_12 = arith.constant 0 : index
    %55 = vector.load %arg5[%54, %c0_11, %c0_12] : memref<8x2x32xf32, #tpu.memory_space<vmem>>, vector<1x2x32xf32>
    %56 = vector.shape_cast %55 : vector<1x2x32xf32> to vector<2x32xf32>
    %57 = vector.shape_cast %37 : vector<2x32xf32> to vector<1x2x32xf32>
    tpu.vector_store %arg5[%54, %c0_11, %c0_12], %57 {strides = array<i32>} : memref<8x2x32xf32, #tpu.memory_space<vmem>>, vector<1x2x32xf32>,
    %58 = arith.index_cast %7 : i32 to index
    %c0_13 = arith.constant 0 : index
    %c0_14 = arith.constant 0 : index
    %59 = vector.load %arg6[%58, %c0_13, %c0_14] : memref<8x2x32xf32, #tpu.memory_space<vmem>>, vector<1x2x32xf32>
    %60 = vector.shape_cast %59 : vector<1x2x32xf32> to vector<2x32xf32>
    %61 = vector.shape_cast %53 : vector<2x32xf32> to vector<1x2x32xf32>
    tpu.vector_store %arg6[%58, %c0_13, %c0_14], %61 {strides = array<i32>} : memref<8x2x32xf32, #tpu.memory_space<vmem>>, vector<1x2x32xf32>,
    %c1_i32 = arith.constant 1 : i32
    %c7_i32_15 = arith.constant 7 : i32
    %62 = arith.subi %c7_i32_15, %c1_i32 : i32
    %63 = arith.index_cast %c1_i32 : i32 to index
    %c0_16 = arith.constant 0 : index
    %c0_17 = arith.constant 0 : index
    %64 = vector.load %arg1[%63, %c0_16, %c0_17] : memref<8x2x256xf32, #tpu.memory_space<vmem>>, vector<1x2x256xf32>
    %65 = vector.shape_cast %64 : vector<1x2x256xf32> to vector<2x256xf32>
    %66 = vector.extract_strided_slice %65 {offsets = [0, 0], sizes = [2, 128], strides = [1, 1]} : vector<2x256xf32> to vector<2x128xf32>
    %67 = arith.index_cast %62 : i32 to index
    %c0_18 = arith.constant 0 : index
    %c0_19 = arith.constant 0 : index
    %68 = vector.load %arg1[%67, %c0_18, %c0_19] : memref<8x2x256xf32, #tpu.memory_space<vmem>>, vector<1x2x256xf32>
    %69 = vector.shape_cast %68 : vector<1x2x256xf32> to vector<2x256xf32>
    %70 = vector.extract_strided_slice %69 {offsets = [0, 128], sizes = [2, 128], strides = [1, 1]} : vector<2x256xf32> to vector<2x128xf32>
    %c0_20 = arith.constant 0 : index
    %c0_21 = arith.constant 0 : index
    %71 = vector.load %arg2[%c0_20, %c0_21] : memref<32x128xf32, #tpu.memory_space<vmem>>, vector<32x128xf32>
    %cst_22 = arith.constant dense<0.000000e+00> : vector<2x128xf32>
    %72 = tpu.matmul %37, %71, %cst_22 {dimension_numbers = #tpu.dot_dimension_numbers<[1], [0], [0], [1], [0, 0, 1, 1], [], []>} : vector<2x32xf32>, vector<32x128xf32>, vector<2x128xf32> -> vector<2x128xf32>
    %73 = arith.addf %66, %72 : vector<2x128xf32>
    %c0_23 = arith.constant 0 : index
    %c0_24 = arith.constant 0 : index
    %74 = vector.load %arg3[%c0_23, %c0_24] : memref<32x128xf32, #tpu.memory_space<vmem>>, vector<32x128xf32>
    %cst_25 = arith.constant dense<0.000000e+00> : vector<2x128xf32>
    %75 = tpu.matmul %53, %74, %cst_25 {dimension_numbers = #tpu.dot_dimension_numbers<[1], [0], [0], [1], [0, 0, 1, 1], [], []>} : vector<2x32xf32>, vector<32x128xf32>, vector<2x128xf32> -> vector<2x128xf32>
    %76 = arith.addf %70, %75 : vector<2x128xf32>
    %77 = math.tanh %73 : vector<2x128xf32>
    %78 = arith.negf %73 : vector<2x128xf32>
    %79 = math.exp %78 : vector<2x128xf32>
    %cst_26 = arith.constant 1.000000e+00 : f32
    %80 = vector.broadcast %cst_26 : f32 to vector<2x128xf32>
    %81 = arith.addf %80, %79 : vector<2x128xf32>
    %82 = arith.divf %80, %81 : vector<2x128xf32>
    %83 = arith.select %5, %77, %82 : vector<2x128xi1>, vector<2x128xf32>
    %84 = vector.extract_strided_slice %83 {offsets = [0, 0], sizes = [2, 32], strides = [1, 1]} : vector<2x128xf32> to vector<2x32xf32>
    %85 = vector.extract_strided_slice %83 {offsets = [0, 32], sizes = [2, 32], strides = [1, 1]} : vector<2x128xf32> to vector<2x32xf32>
    %86 = vector.extract_strided_slice %83 {offsets = [0, 64], sizes = [2, 32], strides = [1, 1]} : vector<2x128xf32> to vector<2x32xf32>
    %87 = vector.extract_strided_slice %83 {offsets = [0, 96], sizes = [2, 32], strides = [1, 1]} : vector<2x128xf32> to vector<2x32xf32>
    %88 = arith.mulf %85, %35 : vector<2x32xf32>
    %89 = arith.mulf %84, %86 : vector<2x32xf32>
    %90 = arith.addf %88, %89 : vector<2x32xf32>
    %91 = math.tanh %90 : vector<2x32xf32>
    %92 = arith.mulf %87, %91 : vector<2x32xf32>
    %93 = math.tanh %76 : vector<2x128xf32>
    %94 = arith.negf %76 : vector<2x128xf32>
    %95 = math.exp %94 : vector<2x128xf32>
    %cst_27 = arith.constant 1.000000e+00 : f32
    %96 = vector.broadcast %cst_27 : f32 to vector<2x128xf32>
    %97 = arith.addf %96, %95 : vector<2x128xf32>
    %98 = arith.divf %96, %97 : vector<2x128xf32>
    %99 = arith.select %5, %93, %98 : vector<2x128xi1>, vector<2x128xf32>
    %100 = vector.extract_strided_slice %99 {offsets = [0, 0], sizes = [2, 32], strides = [1, 1]} : vector<2x128xf32> to vector<2x32xf32>
    %101 = vector.extract_strided_slice %99 {offsets = [0, 32], sizes = [2, 32], strides = [1, 1]} : vector<2x128xf32> to vector<2x32xf32>
    %102 = vector.extract_strided_slice %99 {offsets = [0, 64], sizes = [2, 32], strides = [1, 1]} : vector<2x128xf32> to vector<2x32xf32>
    %103 = vector.extract_strided_slice %99 {offsets = [0, 96], sizes = [2, 32], strides = [1, 1]} : vector<2x128xf32> to vector<2x32xf32>
    %104 = arith.mulf %101, %51 : vector<2x32xf32>
    %105 = arith.mulf %100, %102 : vector<2x32xf32>
    %106 = arith.addf %104, %105 : vector<2x32xf32>
    %107 = math.tanh %106 : vector<2x32xf32>
    %108 = arith.mulf %103, %107 : vector<2x32xf32>
    %109 = arith.index_cast %c1_i32 : i32 to index
    %c0_28 = arith.constant 0 : index
    %c0_29 = arith.constant 0 : index
    %110 = vector.load %arg5[%109, %c0_28, %c0_29] : memref<8x2x32xf32, #tpu.memory_space<vmem>>, vector<1x2x32xf32>
    %111 = vector.shape_cast %110 : vector<1x2x32xf32> to vector<2x32xf32>
    %112 = vector.shape_cast %92 : vector<2x32xf32> to vector<1x2x32xf32>
    tpu.vector_store %arg5[%109, %c0_28, %c0_29], %112 {strides = array<i32>} : memref<8x2x32xf32, #tpu.memory_space<vmem>>, vector<1x2x32xf32>,
    %113 = arith.index_cast %62 : i32 to index
    %c0_30 = arith.constant 0 : index
    %c0_31 = arith.constant 0 : index
    %114 = vector.load %arg6[%113, %c0_30, %c0_31] : memref<8x2x32xf32, #tpu.memory_space<vmem>>, vector<1x2x32xf32>
    %115 = vector.shape_cast %114 : vector<1x2x32xf32> to vector<2x32xf32>
    %116 = vector.shape_cast %108 : vector<2x32xf32> to vector<1x2x32xf32>
    tpu.vector_store %arg6[%113, %c0_30, %c0_31], %116 {strides = array<i32>} : memref<8x2x32xf32, #tpu.memory_space<vmem>>, vector<1x2x32xf32>,
    %c2_i32 = arith.constant 2 : i32
    %c7_i32_32 = arith.constant 7 : i32
    %117 = arith.subi %c7_i32_32, %c2_i32 : i32
    %118 = arith.index_cast %c2_i32 : i32 to index
    %c0_33 = arith.constant 0 : index
    %c0_34 = arith.constant 0 : index
    %119 = vector.load %arg1[%118, %c0_33, %c0_34] : memref<8x2x256xf32, #tpu.memory_space<vmem>>, vector<1x2x256xf32>
    %120 = vector.shape_cast %119 : vector<1x2x256xf32> to vector<2x256xf32>
    %121 = vector.extract_strided_slice %120 {offsets = [0, 0], sizes = [2, 128], strides = [1, 1]} : vector<2x256xf32> to vector<2x128xf32>
    %122 = arith.index_cast %117 : i32 to index
    %c0_35 = arith.constant 0 : index
    %c0_36 = arith.constant 0 : index
    %123 = vector.load %arg1[%122, %c0_35, %c0_36] : memref<8x2x256xf32, #tpu.memory_space<vmem>>, vector<1x2x256xf32>
    %124 = vector.shape_cast %123 : vector<1x2x256xf32> to vector<2x256xf32>
    %125 = vector.extract_strided_slice %124 {offsets = [0, 128], sizes = [2, 128], strides = [1, 1]} : vector<2x256xf32> to vector<2x128xf32>
    %c0_37 = arith.constant 0 : index
    %c0_38 = arith.constant 0 : index
    %126 = vector.load %arg2[%c0_37, %c0_38] : memref<32x128xf32, #tpu.memory_space<vmem>>, vector<32x128xf32>
    %cst_39 = arith.constant dense<0.000000e+00> : vector<2x128xf32>
    %127 = tpu.matmul %92, %126, %cst_39 {dimension_numbers = #tpu.dot_dimension_numbers<[1], [0], [0], [1], [0, 0, 1, 1], [], []>} : vector<2x32xf32>, vector<32x128xf32>, vector<2x128xf32> -> vector<2x128xf32>
    %128 = arith.addf %121, %127 : vector<2x128xf32>
    %c0_40 = arith.constant 0 : index
    %c0_41 = arith.constant 0 : index
    %129 = vector.load %arg3[%c0_40, %c0_41] : memref<32x128xf32, #tpu.memory_space<vmem>>, vector<32x128xf32>
    %cst_42 = arith.constant dense<0.000000e+00> : vector<2x128xf32>
    %130 = tpu.matmul %108, %129, %cst_42 {dimension_numbers = #tpu.dot_dimension_numbers<[1], [0], [0], [1], [0, 0, 1, 1], [], []>} : vector<2x32xf32>, vector<32x128xf32>, vector<2x128xf32> -> vector<2x128xf32>
    %131 = arith.addf %125, %130 : vector<2x128xf32>
    %132 = math.tanh %128 : vector<2x128xf32>
    %133 = arith.negf %128 : vector<2x128xf32>
    %134 = math.exp %133 : vector<2x128xf32>
    %cst_43 = arith.constant 1.000000e+00 : f32
    %135 = vector.broadcast %cst_43 : f32 to vector<2x128xf32>
    %136 = arith.addf %135, %134 : vector<2x128xf32>
    %137 = arith.divf %135, %136 : vector<2x128xf32>
    %138 = arith.select %5, %132, %137 : vector<2x128xi1>, vector<2x128xf32>
    %139 = vector.extract_strided_slice %138 {offsets = [0, 0], sizes = [2, 32], strides = [1, 1]} : vector<2x128xf32> to vector<2x32xf32>
    %140 = vector.extract_strided_slice %138 {offsets = [0, 32], sizes = [2, 32], strides = [1, 1]} : vector<2x128xf32> to vector<2x32xf32>
    %141 = vector.extract_strided_slice %138 {offsets = [0, 64], sizes = [2, 32], strides = [1, 1]} : vector<2x128xf32> to vector<2x32xf32>
    %142 = vector.extract_strided_slice %138 {offsets = [0, 96], sizes = [2, 32], strides = [1, 1]} : vector<2x128xf32> to vector<2x32xf32>
    %143 = arith.mulf %140, %90 : vector<2x32xf32>
    %144 = arith.mulf %139, %141 : vector<2x32xf32>
    %145 = arith.addf %143, %144 : vector<2x32xf32>
    %146 = math.tanh %145 : vector<2x32xf32>
    %147 = arith.mulf %142, %146 : vector<2x32xf32>
    %148 = math.tanh %131 : vector<2x128xf32>
    %149 = arith.negf %131 : vector<2x128xf32>
    %150 = math.exp %149 : vector<2x128xf32>
    %cst_44 = arith.constant 1.000000e+00 : f32
    %151 = vector.broadcast %cst_44 : f32 to vector<2x128xf32>
    %152 = arith.addf %151, %150 : vector<2x128xf32>
    %153 = arith.divf %151, %152 : vector<2x128xf32>
    %154 = arith.select %5, %148, %153 : vector<2x128xi1>, vector<2x128xf32>
    %155 = vector.extract_strided_slice %154 {offsets = [0, 0], sizes = [2, 32], strides = [1, 1]} : vector<2x128xf32> to vector<2x32xf32>
    %156 = vector.extract_strided_slice %154 {offsets = [0, 32], sizes = [2, 32], strides = [1, 1]} : vector<2x128xf32> to vector<2x32xf32>
    %157 = vector.extract_strided_slice %154 {offsets = [0, 64], sizes = [2, 32], strides = [1, 1]} : vector<2x128xf32> to vector<2x32xf32>
    %158 = vector.extract_strided_slice %154 {offsets = [0, 96], sizes = [2, 32], strides = [1, 1]} : vector<2x128xf32> to vector<2x32xf32>
    %159 = arith.mulf %156, %106 : vector<2x32xf32>
    %160 = arith.mulf %155, %157 : vector<2x32xf32>
    %161 = arith.addf %159, %160 : vector<2x32xf32>
    %162 = math.tanh %161 : vector<2x32xf32>
    %163 = arith.mulf %158, %162 : vector<2x32xf32>
    %164 = arith.index_cast %c2_i32 : i32 to index
    %c0_45 = arith.constant 0 : index
    %c0_46 = arith.constant 0 : index
    %165 = vector.load %arg5[%164, %c0_45, %c0_46] : memref<8x2x32xf32, #tpu.memory_space<vmem>>, vector<1x2x32xf32>
    %166 = vector.shape_cast %165 : vector<1x2x32xf32> to vector<2x32xf32>
    %167 = vector.shape_cast %147 : vector<2x32xf32> to vector<1x2x32xf32>
    tpu.vector_store %arg5[%164, %c0_45, %c0_46], %167 {strides = array<i32>} : memref<8x2x32xf32, #tpu.memory_space<vmem>>, vector<1x2x32xf32>,
    %168 = arith.index_cast %117 : i32 to index
    %c0_47 = arith.constant 0 : index
    %c0_48 = arith.constant 0 : index
    %169 = vector.load %arg6[%168, %c0_47, %c0_48] : memref<8x2x32xf32, #tpu.memory_space<vmem>>, vector<1x2x32xf32>
    %170 = vector.shape_cast %169 : vector<1x2x32xf32> to vector<2x32xf32>
    %171 = vector.shape_cast %163 : vector<2x32xf32> to vector<1x2x32xf32>
    tpu.vector_store %arg6[%168, %c0_47, %c0_48], %171 {strides = array<i32>} : memref<8x2x32xf32, #tpu.memory_space<vmem>>, vector<1x2x32xf32>,
    %c3_i32 = arith.constant 3 : i32
    %c7_i32_49 = arith.constant 7 : i32
    %172 = arith.subi %c7_i32_49, %c3_i32 : i32
    %173 = arith.index_cast %c3_i32 : i32 to index
    %c0_50 = arith.constant 0 : index
    %c0_51 = arith.constant 0 : index
    %174 = vector.load %arg1[%173, %c0_50, %c0_51] : memref<8x2x256xf32, #tpu.memory_space<vmem>>, vector<1x2x256xf32>
    %175 = vector.shape_cast %174 : vector<1x2x256xf32> to vector<2x256xf32>
    %176 = vector.extract_strided_slice %175 {offsets = [0, 0], sizes = [2, 128], strides = [1, 1]} : vector<2x256xf32> to vector<2x128xf32>
    %177 = arith.index_cast %172 : i32 to index
    %c0_52 = arith.constant 0 : index
    %c0_53 = arith.constant 0 : index
    %178 = vector.load %arg1[%177, %c0_52, %c0_53] : memref<8x2x256xf32, #tpu.memory_space<vmem>>, vector<1x2x256xf32>
    %179 = vector.shape_cast %178 : vector<1x2x256xf32> to vector<2x256xf32>
    %180 = vector.extract_strided_slice %179 {offsets = [0, 128], sizes = [2, 128], strides = [1, 1]} : vector<2x256xf32> to vector<2x128xf32>
    %c0_54 = arith.constant 0 : index
    %c0_55 = arith.constant 0 : index
    %181 = vector.load %arg2[%c0_54, %c0_55] : memref<32x128xf32, #tpu.memory_space<vmem>>, vector<32x128xf32>
    %cst_56 = arith.constant dense<0.000000e+00> : vector<2x128xf32>
    %182 = tpu.matmul %147, %181, %cst_56 {dimension_numbers = #tpu.dot_dimension_numbers<[1], [0], [0], [1], [0, 0, 1, 1], [], []>} : vector<2x32xf32>, vector<32x128xf32>, vector<2x128xf32> -> vector<2x128xf32>
    %183 = arith.addf %176, %182 : vector<2x128xf32>
    %c0_57 = arith.constant 0 : index
    %c0_58 = arith.constant 0 : index
    %184 = vector.load %arg3[%c0_57, %c0_58] : memref<32x128xf32, #tpu.memory_space<vmem>>, vector<32x128xf32>
    %cst_59 = arith.constant dense<0.000000e+00> : vector<2x128xf32>
    %185 = tpu.matmul %163, %184, %cst_59 {dimension_numbers = #tpu.dot_dimension_numbers<[1], [0], [0], [1], [0, 0, 1, 1], [], []>} : vector<2x32xf32>, vector<32x128xf32>, vector<2x128xf32> -> vector<2x128xf32>
    %186 = arith.addf %180, %185 : vector<2x128xf32>
    %187 = math.tanh %183 : vector<2x128xf32>
    %188 = arith.negf %183 : vector<2x128xf32>
    %189 = math.exp %188 : vector<2x128xf32>
    %cst_60 = arith.constant 1.000000e+00 : f32
    %190 = vector.broadcast %cst_60 : f32 to vector<2x128xf32>
    %191 = arith.addf %190, %189 : vector<2x128xf32>
    %192 = arith.divf %190, %191 : vector<2x128xf32>
    %193 = arith.select %5, %187, %192 : vector<2x128xi1>, vector<2x128xf32>
    %194 = vector.extract_strided_slice %193 {offsets = [0, 0], sizes = [2, 32], strides = [1, 1]} : vector<2x128xf32> to vector<2x32xf32>
    %195 = vector.extract_strided_slice %193 {offsets = [0, 32], sizes = [2, 32], strides = [1, 1]} : vector<2x128xf32> to vector<2x32xf32>
    %196 = vector.extract_strided_slice %193 {offsets = [0, 64], sizes = [2, 32], strides = [1, 1]} : vector<2x128xf32> to vector<2x32xf32>
    %197 = vector.extract_strided_slice %193 {offsets = [0, 96], sizes = [2, 32], strides = [1, 1]} : vector<2x128xf32> to vector<2x32xf32>
    %198 = arith.mulf %195, %145 : vector<2x32xf32>
    %199 = arith.mulf %194, %196 : vector<2x32xf32>
    %200 = arith.addf %198, %199 : vector<2x32xf32>
    %201 = math.tanh %200 : vector<2x32xf32>
    %202 = arith.mulf %197, %201 : vector<2x32xf32>
    %203 = math.tanh %186 : vector<2x128xf32>
    %204 = arith.negf %186 : vector<2x128xf32>
    %205 = math.exp %204 : vector<2x128xf32>
    %cst_61 = arith.constant 1.000000e+00 : f32
    %206 = vector.broadcast %cst_61 : f32 to vector<2x128xf32>
    %207 = arith.addf %206, %205 : vector<2x128xf32>
    %208 = arith.divf %206, %207 : vector<2x128xf32>
    %209 = arith.select %5, %203, %208 : vector<2x128xi1>, vector<2x128xf32>
    %210 = vector.extract_strided_slice %209 {offsets = [0, 0], sizes = [2, 32], strides = [1, 1]} : vector<2x128xf32> to vector<2x32xf32>
    %211 = vector.extract_strided_slice %209 {offsets = [0, 32], sizes = [2, 32], strides = [1, 1]} : vector<2x128xf32> to vector<2x32xf32>
    %212 = vector.extract_strided_slice %209 {offsets = [0, 64], sizes = [2, 32], strides = [1, 1]} : vector<2x128xf32> to vector<2x32xf32>
    %213 = vector.extract_strided_slice %209 {offsets = [0, 96], sizes = [2, 32], strides = [1, 1]} : vector<2x128xf32> to vector<2x32xf32>
    %214 = arith.mulf %211, %161 : vector<2x32xf32>
    %215 = arith.mulf %210, %212 : vector<2x32xf32>
    %216 = arith.addf %214, %215 : vector<2x32xf32>
    %217 = math.tanh %216 : vector<2x32xf32>
    %218 = arith.mulf %213, %217 : vector<2x32xf32>
    %219 = arith.index_cast %c3_i32 : i32 to index
    %c0_62 = arith.constant 0 : index
    %c0_63 = arith.constant 0 : index
    %220 = vector.load %arg5[%219, %c0_62, %c0_63] : memref<8x2x32xf32, #tpu.memory_space<vmem>>, vector<1x2x32xf32>
    %221 = vector.shape_cast %220 : vector<1x2x32xf32> to vector<2x32xf32>
    %222 = vector.shape_cast %202 : vector<2x32xf32> to vector<1x2x32xf32>
    tpu.vector_store %arg5[%219, %c0_62, %c0_63], %222 {strides = array<i32>} : memref<8x2x32xf32, #tpu.memory_space<vmem>>, vector<1x2x32xf32>,
    %223 = arith.index_cast %172 : i32 to index
    %c0_64 = arith.constant 0 : index
    %c0_65 = arith.constant 0 : index
    %224 = vector.load %arg6[%223, %c0_64, %c0_65] : memref<8x2x32xf32, #tpu.memory_space<vmem>>, vector<1x2x32xf32>
    %225 = vector.shape_cast %224 : vector<1x2x32xf32> to vector<2x32xf32>
    %226 = vector.shape_cast %218 : vector<2x32xf32> to vector<1x2x32xf32>
    tpu.vector_store %arg6[%223, %c0_64, %c0_65], %226 {strides = array<i32>} : memref<8x2x32xf32, #tpu.memory_space<vmem>>, vector<1x2x32xf32>,
    %c4_i32 = arith.constant 4 : i32
    %c7_i32_66 = arith.constant 7 : i32
    %227 = arith.subi %c7_i32_66, %c4_i32 : i32
    %228 = arith.index_cast %c4_i32 : i32 to index
    %c0_67 = arith.constant 0 : index
    %c0_68 = arith.constant 0 : index
    %229 = vector.load %arg1[%228, %c0_67, %c0_68] : memref<8x2x256xf32, #tpu.memory_space<vmem>>, vector<1x2x256xf32>
    %230 = vector.shape_cast %229 : vector<1x2x256xf32> to vector<2x256xf32>
    %231 = vector.extract_strided_slice %230 {offsets = [0, 0], sizes = [2, 128], strides = [1, 1]} : vector<2x256xf32> to vector<2x128xf32>
    %232 = arith.index_cast %227 : i32 to index
    %c0_69 = arith.constant 0 : index
    %c0_70 = arith.constant 0 : index
    %233 = vector.load %arg1[%232, %c0_69, %c0_70] : memref<8x2x256xf32, #tpu.memory_space<vmem>>, vector<1x2x256xf32>
    %234 = vector.shape_cast %233 : vector<1x2x256xf32> to vector<2x256xf32>
    %235 = vector.extract_strided_slice %234 {offsets = [0, 128], sizes = [2, 128], strides = [1, 1]} : vector<2x256xf32> to vector<2x128xf32>
    %c0_71 = arith.constant 0 : index
    %c0_72 = arith.constant 0 : index
    %236 = vector.load %arg2[%c0_71, %c0_72] : memref<32x128xf32, #tpu.memory_space<vmem>>, vector<32x128xf32>
    %cst_73 = arith.constant dense<0.000000e+00> : vector<2x128xf32>
    %237 = tpu.matmul %202, %236, %cst_73 {dimension_numbers = #tpu.dot_dimension_numbers<[1], [0], [0], [1], [0, 0, 1, 1], [], []>} : vector<2x32xf32>, vector<32x128xf32>, vector<2x128xf32> -> vector<2x128xf32>
    %238 = arith.addf %231, %237 : vector<2x128xf32>
    %c0_74 = arith.constant 0 : index
    %c0_75 = arith.constant 0 : index
    %239 = vector.load %arg3[%c0_74, %c0_75] : memref<32x128xf32, #tpu.memory_space<vmem>>, vector<32x128xf32>
    %cst_76 = arith.constant dense<0.000000e+00> : vector<2x128xf32>
    %240 = tpu.matmul %218, %239, %cst_76 {dimension_numbers = #tpu.dot_dimension_numbers<[1], [0], [0], [1], [0, 0, 1, 1], [], []>} : vector<2x32xf32>, vector<32x128xf32>, vector<2x128xf32> -> vector<2x128xf32>
    %241 = arith.addf %235, %240 : vector<2x128xf32>
    %242 = math.tanh %238 : vector<2x128xf32>
    %243 = arith.negf %238 : vector<2x128xf32>
    %244 = math.exp %243 : vector<2x128xf32>
    %cst_77 = arith.constant 1.000000e+00 : f32
    %245 = vector.broadcast %cst_77 : f32 to vector<2x128xf32>
    %246 = arith.addf %245, %244 : vector<2x128xf32>
    %247 = arith.divf %245, %246 : vector<2x128xf32>
    %248 = arith.select %5, %242, %247 : vector<2x128xi1>, vector<2x128xf32>
    %249 = vector.extract_strided_slice %248 {offsets = [0, 0], sizes = [2, 32], strides = [1, 1]} : vector<2x128xf32> to vector<2x32xf32>
    %250 = vector.extract_strided_slice %248 {offsets = [0, 32], sizes = [2, 32], strides = [1, 1]} : vector<2x128xf32> to vector<2x32xf32>
    %251 = vector.extract_strided_slice %248 {offsets = [0, 64], sizes = [2, 32], strides = [1, 1]} : vector<2x128xf32> to vector<2x32xf32>
    %252 = vector.extract_strided_slice %248 {offsets = [0, 96], sizes = [2, 32], strides = [1, 1]} : vector<2x128xf32> to vector<2x32xf32>
    %253 = arith.mulf %250, %200 : vector<2x32xf32>
    %254 = arith.mulf %249, %251 : vector<2x32xf32>
    %255 = arith.addf %253, %254 : vector<2x32xf32>
    %256 = math.tanh %255 : vector<2x32xf32>
    %257 = arith.mulf %252, %256 : vector<2x32xf32>
    %258 = math.tanh %241 : vector<2x128xf32>
    %259 = arith.negf %241 : vector<2x128xf32>
    %260 = math.exp %259 : vector<2x128xf32>
    %cst_78 = arith.constant 1.000000e+00 : f32
    %261 = vector.broadcast %cst_78 : f32 to vector<2x128xf32>
    %262 = arith.addf %261, %260 : vector<2x128xf32>
    %263 = arith.divf %261, %262 : vector<2x128xf32>
    %264 = arith.select %5, %258, %263 : vector<2x128xi1>, vector<2x128xf32>
    %265 = vector.extract_strided_slice %264 {offsets = [0, 0], sizes = [2, 32], strides = [1, 1]} : vector<2x128xf32> to vector<2x32xf32>
    %266 = vector.extract_strided_slice %264 {offsets = [0, 32], sizes = [2, 32], strides = [1, 1]} : vector<2x128xf32> to vector<2x32xf32>
    %267 = vector.extract_strided_slice %264 {offsets = [0, 64], sizes = [2, 32], strides = [1, 1]} : vector<2x128xf32> to vector<2x32xf32>
    %268 = vector.extract_strided_slice %264 {offsets = [0, 96], sizes = [2, 32], strides = [1, 1]} : vector<2x128xf32> to vector<2x32xf32>
    %269 = arith.mulf %266, %216 : vector<2x32xf32>
    %270 = arith.mulf %265, %267 : vector<2x32xf32>
    %271 = arith.addf %269, %270 : vector<2x32xf32>
    %272 = math.tanh %271 : vector<2x32xf32>
    %273 = arith.mulf %268, %272 : vector<2x32xf32>
    %274 = arith.index_cast %c4_i32 : i32 to index
    %c0_79 = arith.constant 0 : index
    %c0_80 = arith.constant 0 : index
    %275 = vector.load %arg5[%274, %c0_79, %c0_80] : memref<8x2x32xf32, #tpu.memory_space<vmem>>, vector<1x2x32xf32>
    %276 = vector.shape_cast %275 : vector<1x2x32xf32> to vector<2x32xf32>
    %277 = vector.shape_cast %257 : vector<2x32xf32> to vector<1x2x32xf32>
    tpu.vector_store %arg5[%274, %c0_79, %c0_80], %277 {strides = array<i32>} : memref<8x2x32xf32, #tpu.memory_space<vmem>>, vector<1x2x32xf32>,
    %278 = arith.index_cast %227 : i32 to index
    %c0_81 = arith.constant 0 : index
    %c0_82 = arith.constant 0 : index
    %279 = vector.load %arg6[%278, %c0_81, %c0_82] : memref<8x2x32xf32, #tpu.memory_space<vmem>>, vector<1x2x32xf32>
    %280 = vector.shape_cast %279 : vector<1x2x32xf32> to vector<2x32xf32>
    %281 = vector.shape_cast %273 : vector<2x32xf32> to vector<1x2x32xf32>
    tpu.vector_store %arg6[%278, %c0_81, %c0_82], %281 {strides = array<i32>} : memref<8x2x32xf32, #tpu.memory_space<vmem>>, vector<1x2x32xf32>,
    %c5_i32 = arith.constant 5 : i32
    %c7_i32_83 = arith.constant 7 : i32
    %282 = arith.subi %c7_i32_83, %c5_i32 : i32
    %283 = arith.index_cast %c5_i32 : i32 to index
    %c0_84 = arith.constant 0 : index
    %c0_85 = arith.constant 0 : index
    %284 = vector.load %arg1[%283, %c0_84, %c0_85] : memref<8x2x256xf32, #tpu.memory_space<vmem>>, vector<1x2x256xf32>
    %285 = vector.shape_cast %284 : vector<1x2x256xf32> to vector<2x256xf32>
    %286 = vector.extract_strided_slice %285 {offsets = [0, 0], sizes = [2, 128], strides = [1, 1]} : vector<2x256xf32> to vector<2x128xf32>
    %287 = arith.index_cast %282 : i32 to index
    %c0_86 = arith.constant 0 : index
    %c0_87 = arith.constant 0 : index
    %288 = vector.load %arg1[%287, %c0_86, %c0_87] : memref<8x2x256xf32, #tpu.memory_space<vmem>>, vector<1x2x256xf32>
    %289 = vector.shape_cast %288 : vector<1x2x256xf32> to vector<2x256xf32>
    %290 = vector.extract_strided_slice %289 {offsets = [0, 128], sizes = [2, 128], strides = [1, 1]} : vector<2x256xf32> to vector<2x128xf32>
    %c0_88 = arith.constant 0 : index
    %c0_89 = arith.constant 0 : index
    %291 = vector.load %arg2[%c0_88, %c0_89] : memref<32x128xf32, #tpu.memory_space<vmem>>, vector<32x128xf32>
    %cst_90 = arith.constant dense<0.000000e+00> : vector<2x128xf32>
    %292 = tpu.matmul %257, %291, %cst_90 {dimension_numbers = #tpu.dot_dimension_numbers<[1], [0], [0], [1], [0, 0, 1, 1], [], []>} : vector<2x32xf32>, vector<32x128xf32>, vector<2x128xf32> -> vector<2x128xf32>
    %293 = arith.addf %286, %292 : vector<2x128xf32>
    %c0_91 = arith.constant 0 : index
    %c0_92 = arith.constant 0 : index
    %294 = vector.load %arg3[%c0_91, %c0_92] : memref<32x128xf32, #tpu.memory_space<vmem>>, vector<32x128xf32>
    %cst_93 = arith.constant dense<0.000000e+00> : vector<2x128xf32>
    %295 = tpu.matmul %273, %294, %cst_93 {dimension_numbers = #tpu.dot_dimension_numbers<[1], [0], [0], [1], [0, 0, 1, 1], [], []>} : vector<2x32xf32>, vector<32x128xf32>, vector<2x128xf32> -> vector<2x128xf32>
    %296 = arith.addf %290, %295 : vector<2x128xf32>
    %297 = math.tanh %293 : vector<2x128xf32>
    %298 = arith.negf %293 : vector<2x128xf32>
    %299 = math.exp %298 : vector<2x128xf32>
    %cst_94 = arith.constant 1.000000e+00 : f32
    %300 = vector.broadcast %cst_94 : f32 to vector<2x128xf32>
    %301 = arith.addf %300, %299 : vector<2x128xf32>
    %302 = arith.divf %300, %301 : vector<2x128xf32>
    %303 = arith.select %5, %297, %302 : vector<2x128xi1>, vector<2x128xf32>
    %304 = vector.extract_strided_slice %303 {offsets = [0, 0], sizes = [2, 32], strides = [1, 1]} : vector<2x128xf32> to vector<2x32xf32>
    %305 = vector.extract_strided_slice %303 {offsets = [0, 32], sizes = [2, 32], strides = [1, 1]} : vector<2x128xf32> to vector<2x32xf32>
    %306 = vector.extract_strided_slice %303 {offsets = [0, 64], sizes = [2, 32], strides = [1, 1]} : vector<2x128xf32> to vector<2x32xf32>
    %307 = vector.extract_strided_slice %303 {offsets = [0, 96], sizes = [2, 32], strides = [1, 1]} : vector<2x128xf32> to vector<2x32xf32>
    %308 = arith.mulf %305, %255 : vector<2x32xf32>
    %309 = arith.mulf %304, %306 : vector<2x32xf32>
    %310 = arith.addf %308, %309 : vector<2x32xf32>
    %311 = math.tanh %310 : vector<2x32xf32>
    %312 = arith.mulf %307, %311 : vector<2x32xf32>
    %313 = math.tanh %296 : vector<2x128xf32>
    %314 = arith.negf %296 : vector<2x128xf32>
    %315 = math.exp %314 : vector<2x128xf32>
    %cst_95 = arith.constant 1.000000e+00 : f32
    %316 = vector.broadcast %cst_95 : f32 to vector<2x128xf32>
    %317 = arith.addf %316, %315 : vector<2x128xf32>
    %318 = arith.divf %316, %317 : vector<2x128xf32>
    %319 = arith.select %5, %313, %318 : vector<2x128xi1>, vector<2x128xf32>
    %320 = vector.extract_strided_slice %319 {offsets = [0, 0], sizes = [2, 32], strides = [1, 1]} : vector<2x128xf32> to vector<2x32xf32>
    %321 = vector.extract_strided_slice %319 {offsets = [0, 32], sizes = [2, 32], strides = [1, 1]} : vector<2x128xf32> to vector<2x32xf32>
    %322 = vector.extract_strided_slice %319 {offsets = [0, 64], sizes = [2, 32], strides = [1, 1]} : vector<2x128xf32> to vector<2x32xf32>
    %323 = vector.extract_strided_slice %319 {offsets = [0, 96], sizes = [2, 32], strides = [1, 1]} : vector<2x128xf32> to vector<2x32xf32>
    %324 = arith.mulf %321, %271 : vector<2x32xf32>
    %325 = arith.mulf %320, %322 : vector<2x32xf32>
    %326 = arith.addf %324, %325 : vector<2x32xf32>
    %327 = math.tanh %326 : vector<2x32xf32>
    %328 = arith.mulf %323, %327 : vector<2x32xf32>
    %329 = arith.index_cast %c5_i32 : i32 to index
    %c0_96 = arith.constant 0 : index
    %c0_97 = arith.constant 0 : index
    %330 = vector.load %arg5[%329, %c0_96, %c0_97] : memref<8x2x32xf32, #tpu.memory_space<vmem>>, vector<1x2x32xf32>
    %331 = vector.shape_cast %330 : vector<1x2x32xf32> to vector<2x32xf32>
    %332 = vector.shape_cast %312 : vector<2x32xf32> to vector<1x2x32xf32>
    tpu.vector_store %arg5[%329, %c0_96, %c0_97], %332 {strides = array<i32>} : memref<8x2x32xf32, #tpu.memory_space<vmem>>, vector<1x2x32xf32>,
    %333 = arith.index_cast %282 : i32 to index
    %c0_98 = arith.constant 0 : index
    %c0_99 = arith.constant 0 : index
    %334 = vector.load %arg6[%333, %c0_98, %c0_99] : memref<8x2x32xf32, #tpu.memory_space<vmem>>, vector<1x2x32xf32>
    %335 = vector.shape_cast %334 : vector<1x2x32xf32> to vector<2x32xf32>
    %336 = vector.shape_cast %328 : vector<2x32xf32> to vector<1x2x32xf32>
    tpu.vector_store %arg6[%333, %c0_98, %c0_99], %336 {strides = array<i32>} : memref<8x2x32xf32, #tpu.memory_space<vmem>>, vector<1x2x32xf32>,
    %c6_i32 = arith.constant 6 : i32
    %c7_i32_100 = arith.constant 7 : i32
    %337 = arith.subi %c7_i32_100, %c6_i32 : i32
    %338 = arith.index_cast %c6_i32 : i32 to index
    %c0_101 = arith.constant 0 : index
    %c0_102 = arith.constant 0 : index
    %339 = vector.load %arg1[%338, %c0_101, %c0_102] : memref<8x2x256xf32, #tpu.memory_space<vmem>>, vector<1x2x256xf32>
    %340 = vector.shape_cast %339 : vector<1x2x256xf32> to vector<2x256xf32>
    %341 = vector.extract_strided_slice %340 {offsets = [0, 0], sizes = [2, 128], strides = [1, 1]} : vector<2x256xf32> to vector<2x128xf32>
    %342 = arith.index_cast %337 : i32 to index
    %c0_103 = arith.constant 0 : index
    %c0_104 = arith.constant 0 : index
    %343 = vector.load %arg1[%342, %c0_103, %c0_104] : memref<8x2x256xf32, #tpu.memory_space<vmem>>, vector<1x2x256xf32>
    %344 = vector.shape_cast %343 : vector<1x2x256xf32> to vector<2x256xf32>
    %345 = vector.extract_strided_slice %344 {offsets = [0, 128], sizes = [2, 128], strides = [1, 1]} : vector<2x256xf32> to vector<2x128xf32>
    %c0_105 = arith.constant 0 : index
    %c0_106 = arith.constant 0 : index
    %346 = vector.load %arg2[%c0_105, %c0_106] : memref<32x128xf32, #tpu.memory_space<vmem>>, vector<32x128xf32>
    %cst_107 = arith.constant dense<0.000000e+00> : vector<2x128xf32>
    %347 = tpu.matmul %312, %346, %cst_107 {dimension_numbers = #tpu.dot_dimension_numbers<[1], [0], [0], [1], [0, 0, 1, 1], [], []>} : vector<2x32xf32>, vector<32x128xf32>, vector<2x128xf32> -> vector<2x128xf32>
    %348 = arith.addf %341, %347 : vector<2x128xf32>
    %c0_108 = arith.constant 0 : index
    %c0_109 = arith.constant 0 : index
    %349 = vector.load %arg3[%c0_108, %c0_109] : memref<32x128xf32, #tpu.memory_space<vmem>>, vector<32x128xf32>
    %cst_110 = arith.constant dense<0.000000e+00> : vector<2x128xf32>
    %350 = tpu.matmul %328, %349, %cst_110 {dimension_numbers = #tpu.dot_dimension_numbers<[1], [0], [0], [1], [0, 0, 1, 1], [], []>} : vector<2x32xf32>, vector<32x128xf32>, vector<2x128xf32> -> vector<2x128xf32>
    %351 = arith.addf %345, %350 : vector<2x128xf32>
    %352 = math.tanh %348 : vector<2x128xf32>
    %353 = arith.negf %348 : vector<2x128xf32>
    %354 = math.exp %353 : vector<2x128xf32>
    %cst_111 = arith.constant 1.000000e+00 : f32
    %355 = vector.broadcast %cst_111 : f32 to vector<2x128xf32>
    %356 = arith.addf %355, %354 : vector<2x128xf32>
    %357 = arith.divf %355, %356 : vector<2x128xf32>
    %358 = arith.select %5, %352, %357 : vector<2x128xi1>, vector<2x128xf32>
    %359 = vector.extract_strided_slice %358 {offsets = [0, 0], sizes = [2, 32], strides = [1, 1]} : vector<2x128xf32> to vector<2x32xf32>
    %360 = vector.extract_strided_slice %358 {offsets = [0, 32], sizes = [2, 32], strides = [1, 1]} : vector<2x128xf32> to vector<2x32xf32>
    %361 = vector.extract_strided_slice %358 {offsets = [0, 64], sizes = [2, 32], strides = [1, 1]} : vector<2x128xf32> to vector<2x32xf32>
    %362 = vector.extract_strided_slice %358 {offsets = [0, 96], sizes = [2, 32], strides = [1, 1]} : vector<2x128xf32> to vector<2x32xf32>
    %363 = arith.mulf %360, %310 : vector<2x32xf32>
    %364 = arith.mulf %359, %361 : vector<2x32xf32>
    %365 = arith.addf %363, %364 : vector<2x32xf32>
    %366 = math.tanh %365 : vector<2x32xf32>
    %367 = arith.mulf %362, %366 : vector<2x32xf32>
    %368 = math.tanh %351 : vector<2x128xf32>
    %369 = arith.negf %351 : vector<2x128xf32>
    %370 = math.exp %369 : vector<2x128xf32>
    %cst_112 = arith.constant 1.000000e+00 : f32
    %371 = vector.broadcast %cst_112 : f32 to vector<2x128xf32>
    %372 = arith.addf %371, %370 : vector<2x128xf32>
    %373 = arith.divf %371, %372 : vector<2x128xf32>
    %374 = arith.select %5, %368, %373 : vector<2x128xi1>, vector<2x128xf32>
    %375 = vector.extract_strided_slice %374 {offsets = [0, 0], sizes = [2, 32], strides = [1, 1]} : vector<2x128xf32> to vector<2x32xf32>
    %376 = vector.extract_strided_slice %374 {offsets = [0, 32], sizes = [2, 32], strides = [1, 1]} : vector<2x128xf32> to vector<2x32xf32>
    %377 = vector.extract_strided_slice %374 {offsets = [0, 64], sizes = [2, 32], strides = [1, 1]} : vector<2x128xf32> to vector<2x32xf32>
    %378 = vector.extract_strided_slice %374 {offsets = [0, 96], sizes = [2, 32], strides = [1, 1]} : vector<2x128xf32> to vector<2x32xf32>
    %379 = arith.mulf %376, %326 : vector<2x32xf32>
    %380 = arith.mulf %375, %377 : vector<2x32xf32>
    %381 = arith.addf %379, %380 : vector<2x32xf32>
    %382 = math.tanh %381 : vector<2x32xf32>
    %383 = arith.mulf %378, %382 : vector<2x32xf32>
    %384 = arith.index_cast %c6_i32 : i32 to index
    %c0_113 = arith.constant 0 : index
    %c0_114 = arith.constant 0 : index
    %385 = vector.load %arg5[%384, %c0_113, %c0_114] : memref<8x2x32xf32, #tpu.memory_space<vmem>>, vector<1x2x32xf32>
    %386 = vector.shape_cast %385 : vector<1x2x32xf32> to vector<2x32xf32>
    %387 = vector.shape_cast %367 : vector<2x32xf32> to vector<1x2x32xf32>
    tpu.vector_store %arg5[%384, %c0_113, %c0_114], %387 {strides = array<i32>} : memref<8x2x32xf32, #tpu.memory_space<vmem>>, vector<1x2x32xf32>,
    %388 = arith.index_cast %337 : i32 to index
    %c0_115 = arith.constant 0 : index
    %c0_116 = arith.constant 0 : index
    %389 = vector.load %arg6[%388, %c0_115, %c0_116] : memref<8x2x32xf32, #tpu.memory_space<vmem>>, vector<1x2x32xf32>
    %390 = vector.shape_cast %389 : vector<1x2x32xf32> to vector<2x32xf32>
    %391 = vector.shape_cast %383 : vector<2x32xf32> to vector<1x2x32xf32>
    tpu.vector_store %arg6[%388, %c0_115, %c0_116], %391 {strides = array<i32>} : memref<8x2x32xf32, #tpu.memory_space<vmem>>, vector<1x2x32xf32>,
    %c7_i32_117 = arith.constant 7 : i32
    %c7_i32_118 = arith.constant 7 : i32
    %392 = arith.subi %c7_i32_118, %c7_i32_117 : i32
    %393 = arith.index_cast %c7_i32_117 : i32 to index
    %c0_119 = arith.constant 0 : index
    %c0_120 = arith.constant 0 : index
    %394 = vector.load %arg1[%393, %c0_119, %c0_120] : memref<8x2x256xf32, #tpu.memory_space<vmem>>, vector<1x2x256xf32>
    %395 = vector.shape_cast %394 : vector<1x2x256xf32> to vector<2x256xf32>
    %396 = vector.extract_strided_slice %395 {offsets = [0, 0], sizes = [2, 128], strides = [1, 1]} : vector<2x256xf32> to vector<2x128xf32>
    %397 = arith.index_cast %392 : i32 to index
    %c0_121 = arith.constant 0 : index
    %c0_122 = arith.constant 0 : index
    %398 = vector.load %arg1[%397, %c0_121, %c0_122] : memref<8x2x256xf32, #tpu.memory_space<vmem>>, vector<1x2x256xf32>
    %399 = vector.shape_cast %398 : vector<1x2x256xf32> to vector<2x256xf32>
    %400 = vector.extract_strided_slice %399 {offsets = [0, 128], sizes = [2, 128], strides = [1, 1]} : vector<2x256xf32> to vector<2x128xf32>
    %c0_123 = arith.constant 0 : index
    %c0_124 = arith.constant 0 : index
    %401 = vector.load %arg2[%c0_123, %c0_124] : memref<32x128xf32, #tpu.memory_space<vmem>>, vector<32x128xf32>
    %cst_125 = arith.constant dense<0.000000e+00> : vector<2x128xf32>
    %402 = tpu.matmul %367, %401, %cst_125 {dimension_numbers = #tpu.dot_dimension_numbers<[1], [0], [0], [1], [0, 0, 1, 1], [], []>} : vector<2x32xf32>, vector<32x128xf32>, vector<2x128xf32> -> vector<2x128xf32>
    %403 = arith.addf %396, %402 : vector<2x128xf32>
    %c0_126 = arith.constant 0 : index
    %c0_127 = arith.constant 0 : index
    %404 = vector.load %arg3[%c0_126, %c0_127] : memref<32x128xf32, #tpu.memory_space<vmem>>, vector<32x128xf32>
    %cst_128 = arith.constant dense<0.000000e+00> : vector<2x128xf32>
    %405 = tpu.matmul %383, %404, %cst_128 {dimension_numbers = #tpu.dot_dimension_numbers<[1], [0], [0], [1], [0, 0, 1, 1], [], []>} : vector<2x32xf32>, vector<32x128xf32>, vector<2x128xf32> -> vector<2x128xf32>
    %406 = arith.addf %400, %405 : vector<2x128xf32>
    %407 = math.tanh %403 : vector<2x128xf32>
    %408 = arith.negf %403 : vector<2x128xf32>
    %409 = math.exp %408 : vector<2x128xf32>
    %cst_129 = arith.constant 1.000000e+00 : f32
    %410 = vector.broadcast %cst_129 : f32 to vector<2x128xf32>
    %411 = arith.addf %410, %409 : vector<2x128xf32>
    %412 = arith.divf %410, %411 : vector<2x128xf32>
    %413 = arith.select %5, %407, %412 : vector<2x128xi1>, vector<2x128xf32>
    %414 = vector.extract_strided_slice %413 {offsets = [0, 0], sizes = [2, 32], strides = [1, 1]} : vector<2x128xf32> to vector<2x32xf32>
    %415 = vector.extract_strided_slice %413 {offsets = [0, 32], sizes = [2, 32], strides = [1, 1]} : vector<2x128xf32> to vector<2x32xf32>
    %416 = vector.extract_strided_slice %413 {offsets = [0, 64], sizes = [2, 32], strides = [1, 1]} : vector<2x128xf32> to vector<2x32xf32>
    %417 = vector.extract_strided_slice %413 {offsets = [0, 96], sizes = [2, 32], strides = [1, 1]} : vector<2x128xf32> to vector<2x32xf32>
    %418 = arith.mulf %415, %365 : vector<2x32xf32>
    %419 = arith.mulf %414, %416 : vector<2x32xf32>
    %420 = arith.addf %418, %419 : vector<2x32xf32>
    %421 = math.tanh %420 : vector<2x32xf32>
    %422 = arith.mulf %417, %421 : vector<2x32xf32>
    %423 = math.tanh %406 : vector<2x128xf32>
    %424 = arith.negf %406 : vector<2x128xf32>
    %425 = math.exp %424 : vector<2x128xf32>
    %cst_130 = arith.constant 1.000000e+00 : f32
    %426 = vector.broadcast %cst_130 : f32 to vector<2x128xf32>
    %427 = arith.addf %426, %425 : vector<2x128xf32>
    %428 = arith.divf %426, %427 : vector<2x128xf32>
    %429 = arith.select %5, %423, %428 : vector<2x128xi1>, vector<2x128xf32>
    %430 = vector.extract_strided_slice %429 {offsets = [0, 0], sizes = [2, 32], strides = [1, 1]} : vector<2x128xf32> to vector<2x32xf32>
    %431 = vector.extract_strided_slice %429 {offsets = [0, 32], sizes = [2, 32], strides = [1, 1]} : vector<2x128xf32> to vector<2x32xf32>
    %432 = vector.extract_strided_slice %429 {offsets = [0, 64], sizes = [2, 32], strides = [1, 1]} : vector<2x128xf32> to vector<2x32xf32>
    %433 = vector.extract_strided_slice %429 {offsets = [0, 96], sizes = [2, 32], strides = [1, 1]} : vector<2x128xf32> to vector<2x32xf32>
    %434 = arith.mulf %431, %381 : vector<2x32xf32>
    %435 = arith.mulf %430, %432 : vector<2x32xf32>
    %436 = arith.addf %434, %435 : vector<2x32xf32>
    %437 = math.tanh %436 : vector<2x32xf32>
    %438 = arith.mulf %433, %437 : vector<2x32xf32>
    %439 = arith.index_cast %c7_i32_117 : i32 to index
    %c0_131 = arith.constant 0 : index
    %c0_132 = arith.constant 0 : index
    %440 = vector.load %arg5[%439, %c0_131, %c0_132] : memref<8x2x32xf32, #tpu.memory_space<vmem>>, vector<1x2x32xf32>
    %441 = vector.shape_cast %440 : vector<1x2x32xf32> to vector<2x32xf32>
    %442 = vector.shape_cast %422 : vector<2x32xf32> to vector<1x2x32xf32>
    tpu.vector_store %arg5[%439, %c0_131, %c0_132], %442 {strides = array<i32>} : memref<8x2x32xf32, #tpu.memory_space<vmem>>, vector<1x2x32xf32>,
    %443 = arith.index_cast %392 : i32 to index
    %c0_133 = arith.constant 0 : index
    %c0_134 = arith.constant 0 : index
    %444 = vector.load %arg6[%443, %c0_133, %c0_134] : memref<8x2x32xf32, #tpu.memory_space<vmem>>, vector<1x2x32xf32>
    %445 = vector.shape_cast %444 : vector<1x2x32xf32> to vector<2x32xf32>
    %446 = vector.shape_cast %438 : vector<2x32xf32> to vector<1x2x32xf32>
    tpu.vector_store %arg6[%443, %c0_133, %c0_134], %446 {strides = array<i32>} : memref<8x2x32xf32, #tpu.memory_space<vmem>>, vector<1x2x32xf32>,
    %c8_i32 = arith.constant 8 : i32
    %c0_135 = arith.constant 0 : index
    %c0_136 = arith.constant 0 : index
    %c0_137 = arith.constant 0 : index
    %447 = vector.load %arg5[%c0_135, %c0_136, %c0_137] : memref<8x2x32xf32, #tpu.memory_space<vmem>>, vector<8x2x32xf32>
    %c0_138 = arith.constant 0 : index
    %c0_139 = arith.constant 0 : index
    %c0_140 = arith.constant 0 : index
    %448 = vector.load %arg6[%c0_138, %c0_139, %c0_140] : memref<8x2x32xf32, #tpu.memory_space<vmem>>, vector<8x2x32xf32>
    %449 = tpu.concatenate %447, %448 in 2 : vector<8x2x32xf32>, vector<8x2x32xf32> -> vector<8x2x64xf32>
    %c0_141 = arith.constant 0 : index
    %c0_142 = arith.constant 0 : index
    %c0_143 = arith.constant 0 : index
    %450 = vector.load %arg4[%c0_141, %c0_142, %c0_143] : memref<8x2x64xf32, #tpu.memory_space<vmem>>, vector<8x2x64xf32>
    tpu.vector_store %arg4[%c0_141, %c0_142, %c0_143], %449 {strides = array<i32>} : memref<8x2x64xf32, #tpu.memory_space<vmem>>, vector<8x2x64xf32>,
    return
  }
  func.func @transform_0(%arg0: i32) -> (i32, i32, i32) {
    %c0_i32 = arith.constant 0 : i32
    %c0_i32_0 = arith.constant 0 : i32
    %c0_i32_1 = arith.constant 0 : i32
    %c0_i32_2 = arith.constant 0 : i32
    return %c0_i32, %c0_i32_0, %c0_i32_1 : i32, i32, i32
  }
  func.func @transform_1(%arg0: i32) -> (i32, i32) {
    %c0_i32 = arith.constant 0 : i32
    %c0_i32_0 = arith.constant 0 : i32
    %c0_i32_1 = arith.constant 0 : i32
    return %c0_i32, %c0_i32_0 : i32, i32
  }
  func.func @transform_2(%arg0: i32) -> (i32, i32) {
    %c0_i32 = arith.constant 0 : i32
    %c0_i32_0 = arith.constant 0 : i32
    %c0_i32_1 = arith.constant 0 : i32
    return %c0_i32, %c0_i32_0 : i32, i32
  }
  func.func @transform_3(%arg0: i32) -> (i32, i32, i32) {
    %c0_i32 = arith.constant 0 : i32
    %c0_i32_0 = arith.constant 0 : i32
    %c0_i32_1 = arith.constant 0 : i32
    %c0_i32_2 = arith.constant 0 : i32
    return %c0_i32, %c0_i32_0, %c0_i32_1 : i32, i32, i32
  }
}

module attributes {stable_mosaic.version = 11 : i64} {
  func.func @_bilstm_kernel(%arg0: i32, %arg1: memref<8x2x256xf32, #tpu.memory_space<vmem>>, %arg2: memref<32x128xf32, #tpu.memory_space<vmem>>, %arg3: memref<32x128xf32, #tpu.memory_space<vmem>>, %arg4: memref<8x2x64xf32, #tpu.memory_space<vmem>>, %arg5: memref<8x2x32xf32, #tpu.memory_space<vmem>>, %arg6: memref<8x2x32xf32, #tpu.memory_space<vmem>>) attributes {dimension_semantics = [#tpu.dimension_semantics<arbitrary>], iteration_bounds = array<i64: 1>, scalar_prefetch = 0 : i64, scratch_operands = 2 : i64, tpu.core_type = #tpu.core_type<tc>, window_params = [{pipeline_mode = #tpu.pipeline_mode<synchronous>, transform_indices = @transform_0, window_bounds = array<i64: 8, 2, 256>}, {pipeline_mode = #tpu.pipeline_mode<synchronous>, transform_indices = @transform_1, window_bounds = array<i64: 32, 128>}, {pipeline_mode = #tpu.pipeline_mode<synchronous>, transform_indices = @transform_2, window_bounds = array<i64: 32, 128>}, {pipeline_mode = #tpu.pipeline_mode<synchronous>, transform_indices = @transform_3, window_bounds = array<i64: 8, 2, 64>}]} {
    %0 = tpu.iota {dimensions = array<i32: 1>} : vector<2x128xi32>
    %c64_i32 = arith.constant 64 : i32
    %1 = vector.broadcast %c64_i32 : i32 to vector<2x128xi32>
    %2 = arith.cmpi sge, %0, %1 : vector<2x128xi32>
    %c96_i32 = arith.constant 96 : i32
    %3 = vector.broadcast %c96_i32 : i32 to vector<2x128xi32>
    %4 = arith.cmpi slt, %0, %3 : vector<2x128xi32>
    %5 = arith.andi %2, %4 : vector<2x128xi1>
    %cst = arith.constant 0.000000e+00 : f32
    %6 = vector.broadcast %cst : f32 to vector<2x32xf32>
    %c0_i32 = arith.constant 0 : i32
    %c7_i32 = arith.constant 7 : i32
    %7 = arith.subi %c7_i32, %c0_i32 : i32
    %8 = arith.index_cast %c0_i32 : i32 to index
    %c0 = arith.constant 0 : index
    %c0_0 = arith.constant 0 : index
    %9 = vector.load %arg1[%8, %c0, %c0_0] : memref<8x2x256xf32, #tpu.memory_space<vmem>>, vector<1x2x256xf32>
    %10 = vector.shape_cast %9 : vector<1x2x256xf32> to vector<2x256xf32>
    %11 = vector.extract_strided_slice %10 {offsets = [0, 0], sizes = [2, 128], strides = [1, 1]} : vector<2x256xf32> to vector<2x128xf32>
    %12 = arith.index_cast %7 : i32 to index
    %c0_1 = arith.constant 0 : index
    %c0_2 = arith.constant 0 : index
    %13 = vector.load %arg1[%12, %c0_1, %c0_2] : memref<8x2x256xf32, #tpu.memory_space<vmem>>, vector<1x2x256xf32>
    %14 = vector.shape_cast %13 : vector<1x2x256xf32> to vector<2x256xf32>
    %15 = vector.extract_strided_slice %14 {offsets = [0, 128], sizes = [2, 128], strides = [1, 1]} : vector<2x256xf32> to vector<2x128xf32>
    %c0_3 = arith.constant 0 : index
    %c0_4 = arith.constant 0 : index
    %16 = vector.load %arg2[%c0_3, %c0_4] : memref<32x128xf32, #tpu.memory_space<vmem>>, vector<32x128xf32>
    %cst_5 = arith.constant dense<0.000000e+00> : vector<2x128xf32>
    %17 = tpu.matmul %6, %16, %cst_5 {dimension_numbers = #tpu.dot_dimension_numbers<[1], [0], [0], [1], [0, 0, 1, 1], [], []>} : vector<2x32xf32>, vector<32x128xf32>, vector<2x128xf32> -> vector<2x128xf32>
    %18 = arith.addf %11, %17 : vector<2x128xf32>
    %c0_6 = arith.constant 0 : index
    %c0_7 = arith.constant 0 : index
    %19 = vector.load %arg3[%c0_6, %c0_7] : memref<32x128xf32, #tpu.memory_space<vmem>>, vector<32x128xf32>
    %cst_8 = arith.constant dense<0.000000e+00> : vector<2x128xf32>
    %20 = tpu.matmul %6, %19, %cst_8 {dimension_numbers = #tpu.dot_dimension_numbers<[1], [0], [0], [1], [0, 0, 1, 1], [], []>} : vector<2x32xf32>, vector<32x128xf32>, vector<2x128xf32> -> vector<2x128xf32>
    %21 = arith.addf %15, %20 : vector<2x128xf32>
    %22 = math.tanh %18 : vector<2x128xf32>
    %23 = arith.negf %18 : vector<2x128xf32>
    %24 = math.exp %23 : vector<2x128xf32>
    %cst_9 = arith.constant 1.000000e+00 : f32
    %25 = vector.broadcast %cst_9 : f32 to vector<2x128xf32>
    %26 = arith.addf %25, %24 : vector<2x128xf32>
    %27 = arith.divf %25, %26 : vector<2x128xf32>
    %28 = arith.select %5, %22, %27 : vector<2x128xi1>, vector<2x128xf32>
    %29 = vector.extract_strided_slice %28 {offsets = [0, 0], sizes = [2, 32], strides = [1, 1]} : vector<2x128xf32> to vector<2x32xf32>
    %30 = vector.extract_strided_slice %28 {offsets = [0, 32], sizes = [2, 32], strides = [1, 1]} : vector<2x128xf32> to vector<2x32xf32>
    %31 = vector.extract_strided_slice %28 {offsets = [0, 64], sizes = [2, 32], strides = [1, 1]} : vector<2x128xf32> to vector<2x32xf32>
    %32 = vector.extract_strided_slice %28 {offsets = [0, 96], sizes = [2, 32], strides = [1, 1]} : vector<2x128xf32> to vector<2x32xf32>
    %33 = arith.mulf %30, %6 : vector<2x32xf32>
    %34 = arith.mulf %29, %31 : vector<2x32xf32>
    %35 = arith.addf %33, %34 : vector<2x32xf32>
    %36 = math.tanh %35 : vector<2x32xf32>
    %37 = arith.mulf %32, %36 : vector<2x32xf32>
    %38 = math.tanh %21 : vector<2x128xf32>
    %39 = arith.negf %21 : vector<2x128xf32>
    %40 = math.exp %39 : vector<2x128xf32>
    %cst_10 = arith.constant 1.000000e+00 : f32
    %41 = vector.broadcast %cst_10 : f32 to vector<2x128xf32>
    %42 = arith.addf %41, %40 : vector<2x128xf32>
    %43 = arith.divf %41, %42 : vector<2x128xf32>
    %44 = arith.select %5, %38, %43 : vector<2x128xi1>, vector<2x128xf32>
    %45 = vector.extract_strided_slice %44 {offsets = [0, 0], sizes = [2, 32], strides = [1, 1]} : vector<2x128xf32> to vector<2x32xf32>
    %46 = vector.extract_strided_slice %44 {offsets = [0, 32], sizes = [2, 32], strides = [1, 1]} : vector<2x128xf32> to vector<2x32xf32>
    %47 = vector.extract_strided_slice %44 {offsets = [0, 64], sizes = [2, 32], strides = [1, 1]} : vector<2x128xf32> to vector<2x32xf32>
    %48 = vector.extract_strided_slice %44 {offsets = [0, 96], sizes = [2, 32], strides = [1, 1]} : vector<2x128xf32> to vector<2x32xf32>
    %49 = arith.mulf %46, %6 : vector<2x32xf32>
    %50 = arith.mulf %45, %47 : vector<2x32xf32>
    %51 = arith.addf %49, %50 : vector<2x32xf32>
    %52 = math.tanh %51 : vector<2x32xf32>
    %53 = arith.mulf %48, %52 : vector<2x32xf32>
    %54 = arith.index_cast %c0_i32 : i32 to index
    %c0_11 = arith.constant 0 : index
    %c0_12 = arith.constant 0 : index
    %55 = vector.load %arg5[%54, %c0_11, %c0_12] : memref<8x2x32xf32, #tpu.memory_space<vmem>>, vector<1x2x32xf32>
    %56 = vector.shape_cast %55 : vector<1x2x32xf32> to vector<2x32xf32>
    %57 = vector.shape_cast %37 : vector<2x32xf32> to vector<1x2x32xf32>
    tpu.vector_store %arg5[%54, %c0_11, %c0_12], %57 {strides = array<i32>} : memref<8x2x32xf32, #tpu.memory_space<vmem>>, vector<1x2x32xf32>,
    %58 = arith.index_cast %7 : i32 to index
    %c0_13 = arith.constant 0 : index
    %c0_14 = arith.constant 0 : index
    %59 = vector.load %arg6[%58, %c0_13, %c0_14] : memref<8x2x32xf32, #tpu.memory_space<vmem>>, vector<1x2x32xf32>
    %60 = vector.shape_cast %59 : vector<1x2x32xf32> to vector<2x32xf32>
    %61 = vector.shape_cast %53 : vector<2x32xf32> to vector<1x2x32xf32>
    tpu.vector_store %arg6[%58, %c0_13, %c0_14], %61 {strides = array<i32>} : memref<8x2x32xf32, #tpu.memory_space<vmem>>, vector<1x2x32xf32>,
    %c1_i32 = arith.constant 1 : i32
    %c7_i32_15 = arith.constant 7 : i32
    %62 = arith.subi %c7_i32_15, %c1_i32 : i32
    %63 = arith.index_cast %c1_i32 : i32 to index
    %c0_16 = arith.constant 0 : index
    %c0_17 = arith.constant 0 : index
    %64 = vector.load %arg1[%63, %c0_16, %c0_17] : memref<8x2x256xf32, #tpu.memory_space<vmem>>, vector<1x2x256xf32>
    %65 = vector.shape_cast %64 : vector<1x2x256xf32> to vector<2x256xf32>
    %66 = vector.extract_strided_slice %65 {offsets = [0, 0], sizes = [2, 128], strides = [1, 1]} : vector<2x256xf32> to vector<2x128xf32>
    %67 = arith.index_cast %62 : i32 to index
    %c0_18 = arith.constant 0 : index
    %c0_19 = arith.constant 0 : index
    %68 = vector.load %arg1[%67, %c0_18, %c0_19] : memref<8x2x256xf32, #tpu.memory_space<vmem>>, vector<1x2x256xf32>
    %69 = vector.shape_cast %68 : vector<1x2x256xf32> to vector<2x256xf32>
    %70 = vector.extract_strided_slice %69 {offsets = [0, 128], sizes = [2, 128], strides = [1, 1]} : vector<2x256xf32> to vector<2x128xf32>
    %c0_20 = arith.constant 0 : index
    %c0_21 = arith.constant 0 : index
    %71 = vector.load %arg2[%c0_20, %c0_21] : memref<32x128xf32, #tpu.memory_space<vmem>>, vector<32x128xf32>
    %cst_22 = arith.constant dense<0.000000e+00> : vector<2x128xf32>
    %72 = tpu.matmul %37, %71, %cst_22 {dimension_numbers = #tpu.dot_dimension_numbers<[1], [0], [0], [1], [0, 0, 1, 1], [], []>} : vector<2x32xf32>, vector<32x128xf32>, vector<2x128xf32> -> vector<2x128xf32>
    %73 = arith.addf %66, %72 : vector<2x128xf32>
    %c0_23 = arith.constant 0 : index
    %c0_24 = arith.constant 0 : index
    %74 = vector.load %arg3[%c0_23, %c0_24] : memref<32x128xf32, #tpu.memory_space<vmem>>, vector<32x128xf32>
    %cst_25 = arith.constant dense<0.000000e+00> : vector<2x128xf32>
    %75 = tpu.matmul %53, %74, %cst_25 {dimension_numbers = #tpu.dot_dimension_numbers<[1], [0], [0], [1], [0, 0, 1, 1], [], []>} : vector<2x32xf32>, vector<32x128xf32>, vector<2x128xf32> -> vector<2x128xf32>
    %76 = arith.addf %70, %75 : vector<2x128xf32>
    %77 = math.tanh %73 : vector<2x128xf32>
    %78 = arith.negf %73 : vector<2x128xf32>
    %79 = math.exp %78 : vector<2x128xf32>
    %cst_26 = arith.constant 1.000000e+00 : f32
    %80 = vector.broadcast %cst_26 : f32 to vector<2x128xf32>
    %81 = arith.addf %80, %79 : vector<2x128xf32>
    %82 = arith.divf %80, %81 : vector<2x128xf32>
    %83 = arith.select %5, %77, %82 : vector<2x128xi1>, vector<2x128xf32>
    %84 = vector.extract_strided_slice %83 {offsets = [0, 0], sizes = [2, 32], strides = [1, 1]} : vector<2x128xf32> to vector<2x32xf32>
    %85 = vector.extract_strided_slice %83 {offsets = [0, 32], sizes = [2, 32], strides = [1, 1]} : vector<2x128xf32> to vector<2x32xf32>
    %86 = vector.extract_strided_slice %83 {offsets = [0, 64], sizes = [2, 32], strides = [1, 1]} : vector<2x128xf32> to vector<2x32xf32>
    %87 = vector.extract_strided_slice %83 {offsets = [0, 96], sizes = [2, 32], strides = [1, 1]} : vector<2x128xf32> to vector<2x32xf32>
    %88 = arith.mulf %85, %35 : vector<2x32xf32>
    %89 = arith.mulf %84, %86 : vector<2x32xf32>
    %90 = arith.addf %88, %89 : vector<2x32xf32>
    %91 = math.tanh %90 : vector<2x32xf32>
    %92 = arith.mulf %87, %91 : vector<2x32xf32>
    %93 = math.tanh %76 : vector<2x128xf32>
    %94 = arith.negf %76 : vector<2x128xf32>
    %95 = math.exp %94 : vector<2x128xf32>
    %cst_27 = arith.constant 1.000000e+00 : f32
    %96 = vector.broadcast %cst_27 : f32 to vector<2x128xf32>
    %97 = arith.addf %96, %95 : vector<2x128xf32>
    %98 = arith.divf %96, %97 : vector<2x128xf32>
    %99 = arith.select %5, %93, %98 : vector<2x128xi1>, vector<2x128xf32>
    %100 = vector.extract_strided_slice %99 {offsets = [0, 0], sizes = [2, 32], strides = [1, 1]} : vector<2x128xf32> to vector<2x32xf32>
    %101 = vector.extract_strided_slice %99 {offsets = [0, 32], sizes = [2, 32], strides = [1, 1]} : vector<2x128xf32> to vector<2x32xf32>
    %102 = vector.extract_strided_slice %99 {offsets = [0, 64], sizes = [2, 32], strides = [1, 1]} : vector<2x128xf32> to vector<2x32xf32>
    %103 = vector.extract_strided_slice %99 {offsets = [0, 96], sizes = [2, 32], strides = [1, 1]} : vector<2x128xf32> to vector<2x32xf32>
    %104 = arith.mulf %101, %51 : vector<2x32xf32>
    %105 = arith.mulf %100, %102 : vector<2x32xf32>
    %106 = arith.addf %104, %105 : vector<2x32xf32>
    %107 = math.tanh %106 : vector<2x32xf32>
    %108 = arith.mulf %103, %107 : vector<2x32xf32>
    %109 = arith.index_cast %c1_i32 : i32 to index
    %c0_28 = arith.constant 0 : index
    %c0_29 = arith.constant 0 : index
    %110 = vector.load %arg5[%109, %c0_28, %c0_29] : memref<8x2x32xf32, #tpu.memory_space<vmem>>, vector<1x2x32xf32>
    %111 = vector.shape_cast %110 : vector<1x2x32xf32> to vector<2x32xf32>
    %112 = vector.shape_cast %92 : vector<2x32xf32> to vector<1x2x32xf32>
    tpu.vector_store %arg5[%109, %c0_28, %c0_29], %112 {strides = array<i32>} : memref<8x2x32xf32, #tpu.memory_space<vmem>>, vector<1x2x32xf32>,
    %113 = arith.index_cast %62 : i32 to index
    %c0_30 = arith.constant 0 : index
    %c0_31 = arith.constant 0 : index
    %114 = vector.load %arg6[%113, %c0_30, %c0_31] : memref<8x2x32xf32, #tpu.memory_space<vmem>>, vector<1x2x32xf32>
    %115 = vector.shape_cast %114 : vector<1x2x32xf32> to vector<2x32xf32>
    %116 = vector.shape_cast %108 : vector<2x32xf32> to vector<1x2x32xf32>
    tpu.vector_store %arg6[%113, %c0_30, %c0_31], %116 {strides = array<i32>} : memref<8x2x32xf32, #tpu.memory_space<vmem>>, vector<1x2x32xf32>,
    %c2_i32 = arith.constant 2 : i32
    %c7_i32_32 = arith.constant 7 : i32
    %117 = arith.subi %c7_i32_32, %c2_i32 : i32
    %118 = arith.index_cast %c2_i32 : i32 to index
    %c0_33 = arith.constant 0 : index
    %c0_34 = arith.constant 0 : index
    %119 = vector.load %arg1[%118, %c0_33, %c0_34] : memref<8x2x256xf32, #tpu.memory_space<vmem>>, vector<1x2x256xf32>
    %120 = vector.shape_cast %119 : vector<1x2x256xf32> to vector<2x256xf32>
    %121 = vector.extract_strided_slice %120 {offsets = [0, 0], sizes = [2, 128], strides = [1, 1]} : vector<2x256xf32> to vector<2x128xf32>
    %122 = arith.index_cast %117 : i32 to index
    %c0_35 = arith.constant 0 : index
    %c0_36 = arith.constant 0 : index
    %123 = vector.load %arg1[%122, %c0_35, %c0_36] : memref<8x2x256xf32, #tpu.memory_space<vmem>>, vector<1x2x256xf32>
    %124 = vector.shape_cast %123 : vector<1x2x256xf32> to vector<2x256xf32>
    %125 = vector.extract_strided_slice %124 {offsets = [0, 128], sizes = [2, 128], strides = [1, 1]} : vector<2x256xf32> to vector<2x128xf32>
    %c0_37 = arith.constant 0 : index
    %c0_38 = arith.constant 0 : index
    %126 = vector.load %arg2[%c0_37, %c0_38] : memref<32x128xf32, #tpu.memory_space<vmem>>, vector<32x128xf32>
    %cst_39 = arith.constant dense<0.000000e+00> : vector<2x128xf32>
    %127 = tpu.matmul %92, %126, %cst_39 {dimension_numbers = #tpu.dot_dimension_numbers<[1], [0], [0], [1], [0, 0, 1, 1], [], []>} : vector<2x32xf32>, vector<32x128xf32>, vector<2x128xf32> -> vector<2x128xf32>
    %128 = arith.addf %121, %127 : vector<2x128xf32>
    %c0_40 = arith.constant 0 : index
    %c0_41 = arith.constant 0 : index
    %129 = vector.load %arg3[%c0_40, %c0_41] : memref<32x128xf32, #tpu.memory_space<vmem>>, vector<32x128xf32>
    %cst_42 = arith.constant dense<0.000000e+00> : vector<2x128xf32>
    %130 = tpu.matmul %108, %129, %cst_42 {dimension_numbers = #tpu.dot_dimension_numbers<[1], [0], [0], [1], [0, 0, 1, 1], [], []>} : vector<2x32xf32>, vector<32x128xf32>, vector<2x128xf32> -> vector<2x128xf32>
    %131 = arith.addf %125, %130 : vector<2x128xf32>
    %132 = math.tanh %128 : vector<2x128xf32>
    %133 = arith.negf %128 : vector<2x128xf32>
    %134 = math.exp %133 : vector<2x128xf32>
    %cst_43 = arith.constant 1.000000e+00 : f32
    %135 = vector.broadcast %cst_43 : f32 to vector<2x128xf32>
    %136 = arith.addf %135, %134 : vector<2x128xf32>
    %137 = arith.divf %135, %136 : vector<2x128xf32>
    %138 = arith.select %5, %132, %137 : vector<2x128xi1>, vector<2x128xf32>
    %139 = vector.extract_strided_slice %138 {offsets = [0, 0], sizes = [2, 32], strides = [1, 1]} : vector<2x128xf32> to vector<2x32xf32>
    %140 = vector.extract_strided_slice %138 {offsets = [0, 32], sizes = [2, 32], strides = [1, 1]} : vector<2x128xf32> to vector<2x32xf32>
    %141 = vector.extract_strided_slice %138 {offsets = [0, 64], sizes = [2, 32], strides = [1, 1]} : vector<2x128xf32> to vector<2x32xf32>
    %142 = vector.extract_strided_slice %138 {offsets = [0, 96], sizes = [2, 32], strides = [1, 1]} : vector<2x128xf32> to vector<2x32xf32>
    %143 = arith.mulf %140, %90 : vector<2x32xf32>
    %144 = arith.mulf %139, %141 : vector<2x32xf32>
    %145 = arith.addf %143, %144 : vector<2x32xf32>
    %146 = math.tanh %145 : vector<2x32xf32>
    %147 = arith.mulf %142, %146 : vector<2x32xf32>
    %148 = math.tanh %131 : vector<2x128xf32>
    %149 = arith.negf %131 : vector<2x128xf32>
    %150 = math.exp %149 : vector<2x128xf32>
    %cst_44 = arith.constant 1.000000e+00 : f32
    %151 = vector.broadcast %cst_44 : f32 to vector<2x128xf32>
    %152 = arith.addf %151, %150 : vector<2x128xf32>
    %153 = arith.divf %151, %152 : vector<2x128xf32>
    %154 = arith.select %5, %148, %153 : vector<2x128xi1>, vector<2x128xf32>
    %155 = vector.extract_strided_slice %154 {offsets = [0, 0], sizes = [2, 32], strides = [1, 1]} : vector<2x128xf32> to vector<2x32xf32>
    %156 = vector.extract_strided_slice %154 {offsets = [0, 32], sizes = [2, 32], strides = [1, 1]} : vector<2x128xf32> to vector<2x32xf32>
    %157 = vector.extract_strided_slice %154 {offsets = [0, 64], sizes = [2, 32], strides = [1, 1]} : vector<2x128xf32> to vector<2x32xf32>
    %158 = vector.extract_strided_slice %154 {offsets = [0, 96], sizes = [2, 32], strides = [1, 1]} : vector<2x128xf32> to vector<2x32xf32>
    %159 = arith.mulf %156, %106 : vector<2x32xf32>
    %160 = arith.mulf %155, %157 : vector<2x32xf32>
    %161 = arith.addf %159, %160 : vector<2x32xf32>
    %162 = math.tanh %161 : vector<2x32xf32>
    %163 = arith.mulf %158, %162 : vector<2x32xf32>
    %164 = arith.index_cast %c2_i32 : i32 to index
    %c0_45 = arith.constant 0 : index
    %c0_46 = arith.constant 0 : index
    %165 = vector.load %arg5[%164, %c0_45, %c0_46] : memref<8x2x32xf32, #tpu.memory_space<vmem>>, vector<1x2x32xf32>
    %166 = vector.shape_cast %165 : vector<1x2x32xf32> to vector<2x32xf32>
    %167 = vector.shape_cast %147 : vector<2x32xf32> to vector<1x2x32xf32>
    tpu.vector_store %arg5[%164, %c0_45, %c0_46], %167 {strides = array<i32>} : memref<8x2x32xf32, #tpu.memory_space<vmem>>, vector<1x2x32xf32>,
    %168 = arith.index_cast %117 : i32 to index
    %c0_47 = arith.constant 0 : index
    %c0_48 = arith.constant 0 : index
    %169 = vector.load %arg6[%168, %c0_47, %c0_48] : memref<8x2x32xf32, #tpu.memory_space<vmem>>, vector<1x2x32xf32>
    %170 = vector.shape_cast %169 : vector<1x2x32xf32> to vector<2x32xf32>
    %171 = vector.shape_cast %163 : vector<2x32xf32> to vector<1x2x32xf32>
    tpu.vector_store %arg6[%168, %c0_47, %c0_48], %171 {strides = array<i32>} : memref<8x2x32xf32, #tpu.memory_space<vmem>>, vector<1x2x32xf32>,
    %c3_i32 = arith.constant 3 : i32
    %c7_i32_49 = arith.constant 7 : i32
    %172 = arith.subi %c7_i32_49, %c3_i32 : i32
    %173 = arith.index_cast %c3_i32 : i32 to index
    %c0_50 = arith.constant 0 : index
    %c0_51 = arith.constant 0 : index
    %174 = vector.load %arg1[%173, %c0_50, %c0_51] : memref<8x2x256xf32, #tpu.memory_space<vmem>>, vector<1x2x256xf32>
    %175 = vector.shape_cast %174 : vector<1x2x256xf32> to vector<2x256xf32>
    %176 = vector.extract_strided_slice %175 {offsets = [0, 0], sizes = [2, 128], strides = [1, 1]} : vector<2x256xf32> to vector<2x128xf32>
    %177 = arith.index_cast %172 : i32 to index
    %c0_52 = arith.constant 0 : index
    %c0_53 = arith.constant 0 : index
    %178 = vector.load %arg1[%177, %c0_52, %c0_53] : memref<8x2x256xf32, #tpu.memory_space<vmem>>, vector<1x2x256xf32>
    %179 = vector.shape_cast %178 : vector<1x2x256xf32> to vector<2x256xf32>
    %180 = vector.extract_strided_slice %179 {offsets = [0, 128], sizes = [2, 128], strides = [1, 1]} : vector<2x256xf32> to vector<2x128xf32>
    %c0_54 = arith.constant 0 : index
    %c0_55 = arith.constant 0 : index
    %181 = vector.load %arg2[%c0_54, %c0_55] : memref<32x128xf32, #tpu.memory_space<vmem>>, vector<32x128xf32>
    %cst_56 = arith.constant dense<0.000000e+00> : vector<2x128xf32>
    %182 = tpu.matmul %147, %181, %cst_56 {dimension_numbers = #tpu.dot_dimension_numbers<[1], [0], [0], [1], [0, 0, 1, 1], [], []>} : vector<2x32xf32>, vector<32x128xf32>, vector<2x128xf32> -> vector<2x128xf32>
    %183 = arith.addf %176, %182 : vector<2x128xf32>
    %c0_57 = arith.constant 0 : index
    %c0_58 = arith.constant 0 : index
    %184 = vector.load %arg3[%c0_57, %c0_58] : memref<32x128xf32, #tpu.memory_space<vmem>>, vector<32x128xf32>
    %cst_59 = arith.constant dense<0.000000e+00> : vector<2x128xf32>
    %185 = tpu.matmul %163, %184, %cst_59 {dimension_numbers = #tpu.dot_dimension_numbers<[1], [0], [0], [1], [0, 0, 1, 1], [], []>} : vector<2x32xf32>, vector<32x128xf32>, vector<2x128xf32> -> vector<2x128xf32>
    %186 = arith.addf %180, %185 : vector<2x128xf32>
    %187 = math.tanh %183 : vector<2x128xf32>
    %188 = arith.negf %183 : vector<2x128xf32>
    %189 = math.exp %188 : vector<2x128xf32>
    %cst_60 = arith.constant 1.000000e+00 : f32
    %190 = vector.broadcast %cst_60 : f32 to vector<2x128xf32>
    %191 = arith.addf %190, %189 : vector<2x128xf32>
    %192 = arith.divf %190, %191 : vector<2x128xf32>
    %193 = arith.select %5, %187, %192 : vector<2x128xi1>, vector<2x128xf32>
    %194 = vector.extract_strided_slice %193 {offsets = [0, 0], sizes = [2, 32], strides = [1, 1]} : vector<2x128xf32> to vector<2x32xf32>
    %195 = vector.extract_strided_slice %193 {offsets = [0, 32], sizes = [2, 32], strides = [1, 1]} : vector<2x128xf32> to vector<2x32xf32>
    %196 = vector.extract_strided_slice %193 {offsets = [0, 64], sizes = [2, 32], strides = [1, 1]} : vector<2x128xf32> to vector<2x32xf32>
    %197 = vector.extract_strided_slice %193 {offsets = [0, 96], sizes = [2, 32], strides = [1, 1]} : vector<2x128xf32> to vector<2x32xf32>
    %198 = arith.mulf %195, %145 : vector<2x32xf32>
    %199 = arith.mulf %194, %196 : vector<2x32xf32>
    %200 = arith.addf %198, %199 : vector<2x32xf32>
    %201 = math.tanh %200 : vector<2x32xf32>
    %202 = arith.mulf %197, %201 : vector<2x32xf32>
    %203 = math.tanh %186 : vector<2x128xf32>
    %204 = arith.negf %186 : vector<2x128xf32>
    %205 = math.exp %204 : vector<2x128xf32>
    %cst_61 = arith.constant 1.000000e+00 : f32
    %206 = vector.broadcast %cst_61 : f32 to vector<2x128xf32>
    %207 = arith.addf %206, %205 : vector<2x128xf32>
    %208 = arith.divf %206, %207 : vector<2x128xf32>
    %209 = arith.select %5, %203, %208 : vector<2x128xi1>, vector<2x128xf32>
    %210 = vector.extract_strided_slice %209 {offsets = [0, 0], sizes = [2, 32], strides = [1, 1]} : vector<2x128xf32> to vector<2x32xf32>
    %211 = vector.extract_strided_slice %209 {offsets = [0, 32], sizes = [2, 32], strides = [1, 1]} : vector<2x128xf32> to vector<2x32xf32>
    %212 = vector.extract_strided_slice %209 {offsets = [0, 64], sizes = [2, 32], strides = [1, 1]} : vector<2x128xf32> to vector<2x32xf32>
    %213 = vector.extract_strided_slice %209 {offsets = [0, 96], sizes = [2, 32], strides = [1, 1]} : vector<2x128xf32> to vector<2x32xf32>
    %214 = arith.mulf %211, %161 : vector<2x32xf32>
    %215 = arith.mulf %210, %212 : vector<2x32xf32>
    %216 = arith.addf %214, %215 : vector<2x32xf32>
    %217 = math.tanh %216 : vector<2x32xf32>
    %218 = arith.mulf %213, %217 : vector<2x32xf32>
    %219 = arith.index_cast %c3_i32 : i32 to index
    %c0_62 = arith.constant 0 : index
    %c0_63 = arith.constant 0 : index
    %220 = vector.load %arg5[%219, %c0_62, %c0_63] : memref<8x2x32xf32, #tpu.memory_space<vmem>>, vector<1x2x32xf32>
    %221 = vector.shape_cast %220 : vector<1x2x32xf32> to vector<2x32xf32>
    %222 = vector.shape_cast %202 : vector<2x32xf32> to vector<1x2x32xf32>
    tpu.vector_store %arg5[%219, %c0_62, %c0_63], %222 {strides = array<i32>} : memref<8x2x32xf32, #tpu.memory_space<vmem>>, vector<1x2x32xf32>,
    %223 = arith.index_cast %172 : i32 to index
    %c0_64 = arith.constant 0 : index
    %c0_65 = arith.constant 0 : index
    %224 = vector.load %arg6[%223, %c0_64, %c0_65] : memref<8x2x32xf32, #tpu.memory_space<vmem>>, vector<1x2x32xf32>
    %225 = vector.shape_cast %224 : vector<1x2x32xf32> to vector<2x32xf32>
    %226 = vector.shape_cast %218 : vector<2x32xf32> to vector<1x2x32xf32>
    tpu.vector_store %arg6[%223, %c0_64, %c0_65], %226 {strides = array<i32>} : memref<8x2x32xf32, #tpu.memory_space<vmem>>, vector<1x2x32xf32>,
    %c4_i32 = arith.constant 4 : i32
    %c7_i32_66 = arith.constant 7 : i32
    %227 = arith.subi %c7_i32_66, %c4_i32 : i32
    %228 = arith.index_cast %c4_i32 : i32 to index
    %c0_67 = arith.constant 0 : index
    %c0_68 = arith.constant 0 : index
    %229 = vector.load %arg1[%228, %c0_67, %c0_68] : memref<8x2x256xf32, #tpu.memory_space<vmem>>, vector<1x2x256xf32>
    %230 = vector.shape_cast %229 : vector<1x2x256xf32> to vector<2x256xf32>
    %231 = vector.extract_strided_slice %230 {offsets = [0, 0], sizes = [2, 128], strides = [1, 1]} : vector<2x256xf32> to vector<2x128xf32>
    %232 = arith.index_cast %227 : i32 to index
    %c0_69 = arith.constant 0 : index
    %c0_70 = arith.constant 0 : index
    %233 = vector.load %arg1[%232, %c0_69, %c0_70] : memref<8x2x256xf32, #tpu.memory_space<vmem>>, vector<1x2x256xf32>
    %234 = vector.shape_cast %233 : vector<1x2x256xf32> to vector<2x256xf32>
    %235 = vector.extract_strided_slice %234 {offsets = [0, 128], sizes = [2, 128], strides = [1, 1]} : vector<2x256xf32> to vector<2x128xf32>
    %c0_71 = arith.constant 0 : index
    %c0_72 = arith.constant 0 : index
    %236 = vector.load %arg2[%c0_71, %c0_72] : memref<32x128xf32, #tpu.memory_space<vmem>>, vector<32x128xf32>
    %cst_73 = arith.constant dense<0.000000e+00> : vector<2x128xf32>
    %237 = tpu.matmul %202, %236, %cst_73 {dimension_numbers = #tpu.dot_dimension_numbers<[1], [0], [0], [1], [0, 0, 1, 1], [], []>} : vector<2x32xf32>, vector<32x128xf32>, vector<2x128xf32> -> vector<2x128xf32>
    %238 = arith.addf %231, %237 : vector<2x128xf32>
    %c0_74 = arith.constant 0 : index
    %c0_75 = arith.constant 0 : index
    %239 = vector.load %arg3[%c0_74, %c0_75] : memref<32x128xf32, #tpu.memory_space<vmem>>, vector<32x128xf32>
    %cst_76 = arith.constant dense<0.000000e+00> : vector<2x128xf32>
    %240 = tpu.matmul %218, %239, %cst_76 {dimension_numbers = #tpu.dot_dimension_numbers<[1], [0], [0], [1], [0, 0, 1, 1], [], []>} : vector<2x32xf32>, vector<32x128xf32>, vector<2x128xf32> -> vector<2x128xf32>
    %241 = arith.addf %235, %240 : vector<2x128xf32>
    %242 = math.tanh %238 : vector<2x128xf32>
    %243 = arith.negf %238 : vector<2x128xf32>
    %244 = math.exp %243 : vector<2x128xf32>
    %cst_77 = arith.constant 1.000000e+00 : f32
    %245 = vector.broadcast %cst_77 : f32 to vector<2x128xf32>
    %246 = arith.addf %245, %244 : vector<2x128xf32>
    %247 = arith.divf %245, %246 : vector<2x128xf32>
    %248 = arith.select %5, %242, %247 : vector<2x128xi1>, vector<2x128xf32>
    %249 = vector.extract_strided_slice %248 {offsets = [0, 0], sizes = [2, 32], strides = [1, 1]} : vector<2x128xf32> to vector<2x32xf32>
    %250 = vector.extract_strided_slice %248 {offsets = [0, 32], sizes = [2, 32], strides = [1, 1]} : vector<2x128xf32> to vector<2x32xf32>
    %251 = vector.extract_strided_slice %248 {offsets = [0, 64], sizes = [2, 32], strides = [1, 1]} : vector<2x128xf32> to vector<2x32xf32>
    %252 = vector.extract_strided_slice %248 {offsets = [0, 96], sizes = [2, 32], strides = [1, 1]} : vector<2x128xf32> to vector<2x32xf32>
    %253 = arith.mulf %250, %200 : vector<2x32xf32>
    %254 = arith.mulf %249, %251 : vector<2x32xf32>
    %255 = arith.addf %253, %254 : vector<2x32xf32>
    %256 = math.tanh %255 : vector<2x32xf32>
    %257 = arith.mulf %252, %256 : vector<2x32xf32>
    %258 = math.tanh %241 : vector<2x128xf32>
    %259 = arith.negf %241 : vector<2x128xf32>
    %260 = math.exp %259 : vector<2x128xf32>
    %cst_78 = arith.constant 1.000000e+00 : f32
    %261 = vector.broadcast %cst_78 : f32 to vector<2x128xf32>
    %262 = arith.addf %261, %260 : vector<2x128xf32>
    %263 = arith.divf %261, %262 : vector<2x128xf32>
    %264 = arith.select %5, %258, %263 : vector<2x128xi1>, vector<2x128xf32>
    %265 = vector.extract_strided_slice %264 {offsets = [0, 0], sizes = [2, 32], strides = [1, 1]} : vector<2x128xf32> to vector<2x32xf32>
    %266 = vector.extract_strided_slice %264 {offsets = [0, 32], sizes = [2, 32], strides = [1, 1]} : vector<2x128xf32> to vector<2x32xf32>
    %267 = vector.extract_strided_slice %264 {offsets = [0, 64], sizes = [2, 32], strides = [1, 1]} : vector<2x128xf32> to vector<2x32xf32>
    %268 = vector.extract_strided_slice %264 {offsets = [0, 96], sizes = [2, 32], strides = [1, 1]} : vector<2x128xf32> to vector<2x32xf32>
    %269 = arith.mulf %266, %216 : vector<2x32xf32>
    %270 = arith.mulf %265, %267 : vector<2x32xf32>
    %271 = arith.addf %269, %270 : vector<2x32xf32>
    %272 = math.tanh %271 : vector<2x32xf32>
    %273 = arith.mulf %268, %272 : vector<2x32xf32>
    %274 = arith.index_cast %c4_i32 : i32 to index
    %c0_79 = arith.constant 0 : index
    %c0_80 = arith.constant 0 : index
    %275 = vector.load %arg5[%274, %c0_79, %c0_80] : memref<8x2x32xf32, #tpu.memory_space<vmem>>, vector<1x2x32xf32>
    %276 = vector.shape_cast %275 : vector<1x2x32xf32> to vector<2x32xf32>
    %277 = vector.shape_cast %257 : vector<2x32xf32> to vector<1x2x32xf32>
    tpu.vector_store %arg5[%274, %c0_79, %c0_80], %277 {strides = array<i32>} : memref<8x2x32xf32, #tpu.memory_space<vmem>>, vector<1x2x32xf32>,
    %278 = arith.index_cast %227 : i32 to index
    %c0_81 = arith.constant 0 : index
    %c0_82 = arith.constant 0 : index
    %279 = vector.load %arg6[%278, %c0_81, %c0_82] : memref<8x2x32xf32, #tpu.memory_space<vmem>>, vector<1x2x32xf32>
    %280 = vector.shape_cast %279 : vector<1x2x32xf32> to vector<2x32xf32>
    %281 = vector.shape_cast %273 : vector<2x32xf32> to vector<1x2x32xf32>
    tpu.vector_store %arg6[%278, %c0_81, %c0_82], %281 {strides = array<i32>} : memref<8x2x32xf32, #tpu.memory_space<vmem>>, vector<1x2x32xf32>,
    %c5_i32 = arith.constant 5 : i32
    %c7_i32_83 = arith.constant 7 : i32
    %282 = arith.subi %c7_i32_83, %c5_i32 : i32
    %283 = arith.index_cast %c5_i32 : i32 to index
    %c0_84 = arith.constant 0 : index
    %c0_85 = arith.constant 0 : index
    %284 = vector.load %arg1[%283, %c0_84, %c0_85] : memref<8x2x256xf32, #tpu.memory_space<vmem>>, vector<1x2x256xf32>
    %285 = vector.shape_cast %284 : vector<1x2x256xf32> to vector<2x256xf32>
    %286 = vector.extract_strided_slice %285 {offsets = [0, 0], sizes = [2, 128], strides = [1, 1]} : vector<2x256xf32> to vector<2x128xf32>
    %287 = arith.index_cast %282 : i32 to index
    %c0_86 = arith.constant 0 : index
    %c0_87 = arith.constant 0 : index
    %288 = vector.load %arg1[%287, %c0_86, %c0_87] : memref<8x2x256xf32, #tpu.memory_space<vmem>>, vector<1x2x256xf32>
    %289 = vector.shape_cast %288 : vector<1x2x256xf32> to vector<2x256xf32>
    %290 = vector.extract_strided_slice %289 {offsets = [0, 128], sizes = [2, 128], strides = [1, 1]} : vector<2x256xf32> to vector<2x128xf32>
    %c0_88 = arith.constant 0 : index
    %c0_89 = arith.constant 0 : index
    %291 = vector.load %arg2[%c0_88, %c0_89] : memref<32x128xf32, #tpu.memory_space<vmem>>, vector<32x128xf32>
    %cst_90 = arith.constant dense<0.000000e+00> : vector<2x128xf32>
    %292 = tpu.matmul %257, %291, %cst_90 {dimension_numbers = #tpu.dot_dimension_numbers<[1], [0], [0], [1], [0, 0, 1, 1], [], []>} : vector<2x32xf32>, vector<32x128xf32>, vector<2x128xf32> -> vector<2x128xf32>
    %293 = arith.addf %286, %292 : vector<2x128xf32>
    %c0_91 = arith.constant 0 : index
    %c0_92 = arith.constant 0 : index
    %294 = vector.load %arg3[%c0_91, %c0_92] : memref<32x128xf32, #tpu.memory_space<vmem>>, vector<32x128xf32>
    %cst_93 = arith.constant dense<0.000000e+00> : vector<2x128xf32>
    %295 = tpu.matmul %273, %294, %cst_93 {dimension_numbers = #tpu.dot_dimension_numbers<[1], [0], [0], [1], [0, 0, 1, 1], [], []>} : vector<2x32xf32>, vector<32x128xf32>, vector<2x128xf32> -> vector<2x128xf32>
    %296 = arith.addf %290, %295 : vector<2x128xf32>
    %297 = math.tanh %293 : vector<2x128xf32>
    %298 = arith.negf %293 : vector<2x128xf32>
    %299 = math.exp %298 : vector<2x128xf32>
    %cst_94 = arith.constant 1.000000e+00 : f32
    %300 = vector.broadcast %cst_94 : f32 to vector<2x128xf32>
    %301 = arith.addf %300, %299 : vector<2x128xf32>
    %302 = arith.divf %300, %301 : vector<2x128xf32>
    %303 = arith.select %5, %297, %302 : vector<2x128xi1>, vector<2x128xf32>
    %304 = vector.extract_strided_slice %303 {offsets = [0, 0], sizes = [2, 32], strides = [1, 1]} : vector<2x128xf32> to vector<2x32xf32>
    %305 = vector.extract_strided_slice %303 {offsets = [0, 32], sizes = [2, 32], strides = [1, 1]} : vector<2x128xf32> to vector<2x32xf32>
    %306 = vector.extract_strided_slice %303 {offsets = [0, 64], sizes = [2, 32], strides = [1, 1]} : vector<2x128xf32> to vector<2x32xf32>
    %307 = vector.extract_strided_slice %303 {offsets = [0, 96], sizes = [2, 32], strides = [1, 1]} : vector<2x128xf32> to vector<2x32xf32>
    %308 = arith.mulf %305, %255 : vector<2x32xf32>
    %309 = arith.mulf %304, %306 : vector<2x32xf32>
    %310 = arith.addf %308, %309 : vector<2x32xf32>
    %311 = math.tanh %310 : vector<2x32xf32>
    %312 = arith.mulf %307, %311 : vector<2x32xf32>
    %313 = math.tanh %296 : vector<2x128xf32>
    %314 = arith.negf %296 : vector<2x128xf32>
    %315 = math.exp %314 : vector<2x128xf32>
    %cst_95 = arith.constant 1.000000e+00 : f32
    %316 = vector.broadcast %cst_95 : f32 to vector<2x128xf32>
    %317 = arith.addf %316, %315 : vector<2x128xf32>
    %318 = arith.divf %316, %317 : vector<2x128xf32>
    %319 = arith.select %5, %313, %318 : vector<2x128xi1>, vector<2x128xf32>
    %320 = vector.extract_strided_slice %319 {offsets = [0, 0], sizes = [2, 32], strides = [1, 1]} : vector<2x128xf32> to vector<2x32xf32>
    %321 = vector.extract_strided_slice %319 {offsets = [0, 32], sizes = [2, 32], strides = [1, 1]} : vector<2x128xf32> to vector<2x32xf32>
    %322 = vector.extract_strided_slice %319 {offsets = [0, 64], sizes = [2, 32], strides = [1, 1]} : vector<2x128xf32> to vector<2x32xf32>
    %323 = vector.extract_strided_slice %319 {offsets = [0, 96], sizes = [2, 32], strides = [1, 1]} : vector<2x128xf32> to vector<2x32xf32>
    %324 = arith.mulf %321, %271 : vector<2x32xf32>
    %325 = arith.mulf %320, %322 : vector<2x32xf32>
    %326 = arith.addf %324, %325 : vector<2x32xf32>
    %327 = math.tanh %326 : vector<2x32xf32>
    %328 = arith.mulf %323, %327 : vector<2x32xf32>
    %329 = arith.index_cast %c5_i32 : i32 to index
    %c0_96 = arith.constant 0 : index
    %c0_97 = arith.constant 0 : index
    %330 = vector.load %arg5[%329, %c0_96, %c0_97] : memref<8x2x32xf32, #tpu.memory_space<vmem>>, vector<1x2x32xf32>
    %331 = vector.shape_cast %330 : vector<1x2x32xf32> to vector<2x32xf32>
    %332 = vector.shape_cast %312 : vector<2x32xf32> to vector<1x2x32xf32>
    tpu.vector_store %arg5[%329, %c0_96, %c0_97], %332 {strides = array<i32>} : memref<8x2x32xf32, #tpu.memory_space<vmem>>, vector<1x2x32xf32>,
    %333 = arith.index_cast %282 : i32 to index
    %c0_98 = arith.constant 0 : index
    %c0_99 = arith.constant 0 : index
    %334 = vector.load %arg6[%333, %c0_98, %c0_99] : memref<8x2x32xf32, #tpu.memory_space<vmem>>, vector<1x2x32xf32>
    %335 = vector.shape_cast %334 : vector<1x2x32xf32> to vector<2x32xf32>
    %336 = vector.shape_cast %328 : vector<2x32xf32> to vector<1x2x32xf32>
    tpu.vector_store %arg6[%333, %c0_98, %c0_99], %336 {strides = array<i32>} : memref<8x2x32xf32, #tpu.memory_space<vmem>>, vector<1x2x32xf32>,
    %c6_i32 = arith.constant 6 : i32
    %c7_i32_100 = arith.constant 7 : i32
    %337 = arith.subi %c7_i32_100, %c6_i32 : i32
    %338 = arith.index_cast %c6_i32 : i32 to index
    %c0_101 = arith.constant 0 : index
    %c0_102 = arith.constant 0 : index
    %339 = vector.load %arg1[%338, %c0_101, %c0_102] : memref<8x2x256xf32, #tpu.memory_space<vmem>>, vector<1x2x256xf32>
    %340 = vector.shape_cast %339 : vector<1x2x256xf32> to vector<2x256xf32>
    %341 = vector.extract_strided_slice %340 {offsets = [0, 0], sizes = [2, 128], strides = [1, 1]} : vector<2x256xf32> to vector<2x128xf32>
    %342 = arith.index_cast %337 : i32 to index
    %c0_103 = arith.constant 0 : index
    %c0_104 = arith.constant 0 : index
    %343 = vector.load %arg1[%342, %c0_103, %c0_104] : memref<8x2x256xf32, #tpu.memory_space<vmem>>, vector<1x2x256xf32>
    %344 = vector.shape_cast %343 : vector<1x2x256xf32> to vector<2x256xf32>
    %345 = vector.extract_strided_slice %344 {offsets = [0, 128], sizes = [2, 128], strides = [1, 1]} : vector<2x256xf32> to vector<2x128xf32>
    %c0_105 = arith.constant 0 : index
    %c0_106 = arith.constant 0 : index
    %346 = vector.load %arg2[%c0_105, %c0_106] : memref<32x128xf32, #tpu.memory_space<vmem>>, vector<32x128xf32>
    %cst_107 = arith.constant dense<0.000000e+00> : vector<2x128xf32>
    %347 = tpu.matmul %312, %346, %cst_107 {dimension_numbers = #tpu.dot_dimension_numbers<[1], [0], [0], [1], [0, 0, 1, 1], [], []>} : vector<2x32xf32>, vector<32x128xf32>, vector<2x128xf32> -> vector<2x128xf32>
    %348 = arith.addf %341, %347 : vector<2x128xf32>
    %c0_108 = arith.constant 0 : index
    %c0_109 = arith.constant 0 : index
    %349 = vector.load %arg3[%c0_108, %c0_109] : memref<32x128xf32, #tpu.memory_space<vmem>>, vector<32x128xf32>
    %cst_110 = arith.constant dense<0.000000e+00> : vector<2x128xf32>
    %350 = tpu.matmul %328, %349, %cst_110 {dimension_numbers = #tpu.dot_dimension_numbers<[1], [0], [0], [1], [0, 0, 1, 1], [], []>} : vector<2x32xf32>, vector<32x128xf32>, vector<2x128xf32> -> vector<2x128xf32>
    %351 = arith.addf %345, %350 : vector<2x128xf32>
    %352 = math.tanh %348 : vector<2x128xf32>
    %353 = arith.negf %348 : vector<2x128xf32>
    %354 = math.exp %353 : vector<2x128xf32>
    %cst_111 = arith.constant 1.000000e+00 : f32
    %355 = vector.broadcast %cst_111 : f32 to vector<2x128xf32>
    %356 = arith.addf %355, %354 : vector<2x128xf32>
    %357 = arith.divf %355, %356 : vector<2x128xf32>
    %358 = arith.select %5, %352, %357 : vector<2x128xi1>, vector<2x128xf32>
    %359 = vector.extract_strided_slice %358 {offsets = [0, 0], sizes = [2, 32], strides = [1, 1]} : vector<2x128xf32> to vector<2x32xf32>
    %360 = vector.extract_strided_slice %358 {offsets = [0, 32], sizes = [2, 32], strides = [1, 1]} : vector<2x128xf32> to vector<2x32xf32>
    %361 = vector.extract_strided_slice %358 {offsets = [0, 64], sizes = [2, 32], strides = [1, 1]} : vector<2x128xf32> to vector<2x32xf32>
    %362 = vector.extract_strided_slice %358 {offsets = [0, 96], sizes = [2, 32], strides = [1, 1]} : vector<2x128xf32> to vector<2x32xf32>
    %363 = arith.mulf %360, %310 : vector<2x32xf32>
    %364 = arith.mulf %359, %361 : vector<2x32xf32>
    %365 = arith.addf %363, %364 : vector<2x32xf32>
    %366 = math.tanh %365 : vector<2x32xf32>
    %367 = arith.mulf %362, %366 : vector<2x32xf32>
    %368 = math.tanh %351 : vector<2x128xf32>
    %369 = arith.negf %351 : vector<2x128xf32>
    %370 = math.exp %369 : vector<2x128xf32>
    %cst_112 = arith.constant 1.000000e+00 : f32
    %371 = vector.broadcast %cst_112 : f32 to vector<2x128xf32>
    %372 = arith.addf %371, %370 : vector<2x128xf32>
    %373 = arith.divf %371, %372 : vector<2x128xf32>
    %374 = arith.select %5, %368, %373 : vector<2x128xi1>, vector<2x128xf32>
    %375 = vector.extract_strided_slice %374 {offsets = [0, 0], sizes = [2, 32], strides = [1, 1]} : vector<2x128xf32> to vector<2x32xf32>
    %376 = vector.extract_strided_slice %374 {offsets = [0, 32], sizes = [2, 32], strides = [1, 1]} : vector<2x128xf32> to vector<2x32xf32>
    %377 = vector.extract_strided_slice %374 {offsets = [0, 64], sizes = [2, 32], strides = [1, 1]} : vector<2x128xf32> to vector<2x32xf32>
    %378 = vector.extract_strided_slice %374 {offsets = [0, 96], sizes = [2, 32], strides = [1, 1]} : vector<2x128xf32> to vector<2x32xf32>
    %379 = arith.mulf %376, %326 : vector<2x32xf32>
    %380 = arith.mulf %375, %377 : vector<2x32xf32>
    %381 = arith.addf %379, %380 : vector<2x32xf32>
    %382 = math.tanh %381 : vector<2x32xf32>
    %383 = arith.mulf %378, %382 : vector<2x32xf32>
    %384 = arith.index_cast %c6_i32 : i32 to index
    %c0_113 = arith.constant 0 : index
    %c0_114 = arith.constant 0 : index
    %385 = vector.load %arg5[%384, %c0_113, %c0_114] : memref<8x2x32xf32, #tpu.memory_space<vmem>>, vector<1x2x32xf32>
    %386 = vector.shape_cast %385 : vector<1x2x32xf32> to vector<2x32xf32>
    %387 = vector.shape_cast %367 : vector<2x32xf32> to vector<1x2x32xf32>
    tpu.vector_store %arg5[%384, %c0_113, %c0_114], %387 {strides = array<i32>} : memref<8x2x32xf32, #tpu.memory_space<vmem>>, vector<1x2x32xf32>,
    %388 = arith.index_cast %337 : i32 to index
    %c0_115 = arith.constant 0 : index
    %c0_116 = arith.constant 0 : index
    %389 = vector.load %arg6[%388, %c0_115, %c0_116] : memref<8x2x32xf32, #tpu.memory_space<vmem>>, vector<1x2x32xf32>
    %390 = vector.shape_cast %389 : vector<1x2x32xf32> to vector<2x32xf32>
    %391 = vector.shape_cast %383 : vector<2x32xf32> to vector<1x2x32xf32>
    tpu.vector_store %arg6[%388, %c0_115, %c0_116], %391 {strides = array<i32>} : memref<8x2x32xf32, #tpu.memory_space<vmem>>, vector<1x2x32xf32>,
    %c7_i32_117 = arith.constant 7 : i32
    %c7_i32_118 = arith.constant 7 : i32
    %392 = arith.subi %c7_i32_118, %c7_i32_117 : i32
    %393 = arith.index_cast %c7_i32_117 : i32 to index
    %c0_119 = arith.constant 0 : index
    %c0_120 = arith.constant 0 : index
    %394 = vector.load %arg1[%393, %c0_119, %c0_120] : memref<8x2x256xf32, #tpu.memory_space<vmem>>, vector<1x2x256xf32>
    %395 = vector.shape_cast %394 : vector<1x2x256xf32> to vector<2x256xf32>
    %396 = vector.extract_strided_slice %395 {offsets = [0, 0], sizes = [2, 128], strides = [1, 1]} : vector<2x256xf32> to vector<2x128xf32>
    %397 = arith.index_cast %392 : i32 to index
    %c0_121 = arith.constant 0 : index
    %c0_122 = arith.constant 0 : index
    %398 = vector.load %arg1[%397, %c0_121, %c0_122] : memref<8x2x256xf32, #tpu.memory_space<vmem>>, vector<1x2x256xf32>
    %399 = vector.shape_cast %398 : vector<1x2x256xf32> to vector<2x256xf32>
    %400 = vector.extract_strided_slice %399 {offsets = [0, 128], sizes = [2, 128], strides = [1, 1]} : vector<2x256xf32> to vector<2x128xf32>
    %c0_123 = arith.constant 0 : index
    %c0_124 = arith.constant 0 : index
    %401 = vector.load %arg2[%c0_123, %c0_124] : memref<32x128xf32, #tpu.memory_space<vmem>>, vector<32x128xf32>
    %cst_125 = arith.constant dense<0.000000e+00> : vector<2x128xf32>
    %402 = tpu.matmul %367, %401, %cst_125 {dimension_numbers = #tpu.dot_dimension_numbers<[1], [0], [0], [1], [0, 0, 1, 1], [], []>} : vector<2x32xf32>, vector<32x128xf32>, vector<2x128xf32> -> vector<2x128xf32>
    %403 = arith.addf %396, %402 : vector<2x128xf32>
    %c0_126 = arith.constant 0 : index
    %c0_127 = arith.constant 0 : index
    %404 = vector.load %arg3[%c0_126, %c0_127] : memref<32x128xf32, #tpu.memory_space<vmem>>, vector<32x128xf32>
    %cst_128 = arith.constant dense<0.000000e+00> : vector<2x128xf32>
    %405 = tpu.matmul %383, %404, %cst_128 {dimension_numbers = #tpu.dot_dimension_numbers<[1], [0], [0], [1], [0, 0, 1, 1], [], []>} : vector<2x32xf32>, vector<32x128xf32>, vector<2x128xf32> -> vector<2x128xf32>
    %406 = arith.addf %400, %405 : vector<2x128xf32>
    %407 = math.tanh %403 : vector<2x128xf32>
    %408 = arith.negf %403 : vector<2x128xf32>
    %409 = math.exp %408 : vector<2x128xf32>
    %cst_129 = arith.constant 1.000000e+00 : f32
    %410 = vector.broadcast %cst_129 : f32 to vector<2x128xf32>
    %411 = arith.addf %410, %409 : vector<2x128xf32>
    %412 = arith.divf %410, %411 : vector<2x128xf32>
    %413 = arith.select %5, %407, %412 : vector<2x128xi1>, vector<2x128xf32>
    %414 = vector.extract_strided_slice %413 {offsets = [0, 0], sizes = [2, 32], strides = [1, 1]} : vector<2x128xf32> to vector<2x32xf32>
    %415 = vector.extract_strided_slice %413 {offsets = [0, 32], sizes = [2, 32], strides = [1, 1]} : vector<2x128xf32> to vector<2x32xf32>
    %416 = vector.extract_strided_slice %413 {offsets = [0, 64], sizes = [2, 32], strides = [1, 1]} : vector<2x128xf32> to vector<2x32xf32>
    %417 = vector.extract_strided_slice %413 {offsets = [0, 96], sizes = [2, 32], strides = [1, 1]} : vector<2x128xf32> to vector<2x32xf32>
    %418 = arith.mulf %415, %365 : vector<2x32xf32>
    %419 = arith.mulf %414, %416 : vector<2x32xf32>
    %420 = arith.addf %418, %419 : vector<2x32xf32>
    %421 = math.tanh %420 : vector<2x32xf32>
    %422 = arith.mulf %417, %421 : vector<2x32xf32>
    %423 = math.tanh %406 : vector<2x128xf32>
    %424 = arith.negf %406 : vector<2x128xf32>
    %425 = math.exp %424 : vector<2x128xf32>
    %cst_130 = arith.constant 1.000000e+00 : f32
    %426 = vector.broadcast %cst_130 : f32 to vector<2x128xf32>
    %427 = arith.addf %426, %425 : vector<2x128xf32>
    %428 = arith.divf %426, %427 : vector<2x128xf32>
    %429 = arith.select %5, %423, %428 : vector<2x128xi1>, vector<2x128xf32>
    %430 = vector.extract_strided_slice %429 {offsets = [0, 0], sizes = [2, 32], strides = [1, 1]} : vector<2x128xf32> to vector<2x32xf32>
    %431 = vector.extract_strided_slice %429 {offsets = [0, 32], sizes = [2, 32], strides = [1, 1]} : vector<2x128xf32> to vector<2x32xf32>
    %432 = vector.extract_strided_slice %429 {offsets = [0, 64], sizes = [2, 32], strides = [1, 1]} : vector<2x128xf32> to vector<2x32xf32>
    %433 = vector.extract_strided_slice %429 {offsets = [0, 96], sizes = [2, 32], strides = [1, 1]} : vector<2x128xf32> to vector<2x32xf32>
    %434 = arith.mulf %431, %381 : vector<2x32xf32>
    %435 = arith.mulf %430, %432 : vector<2x32xf32>
    %436 = arith.addf %434, %435 : vector<2x32xf32>
    %437 = math.tanh %436 : vector<2x32xf32>
    %438 = arith.mulf %433, %437 : vector<2x32xf32>
    %439 = arith.index_cast %c7_i32_117 : i32 to index
    %c0_131 = arith.constant 0 : index
    %c0_132 = arith.constant 0 : index
    %440 = vector.load %arg5[%439, %c0_131, %c0_132] : memref<8x2x32xf32, #tpu.memory_space<vmem>>, vector<1x2x32xf32>
    %441 = vector.shape_cast %440 : vector<1x2x32xf32> to vector<2x32xf32>
    %442 = vector.shape_cast %422 : vector<2x32xf32> to vector<1x2x32xf32>
    tpu.vector_store %arg5[%439, %c0_131, %c0_132], %442 {strides = array<i32>} : memref<8x2x32xf32, #tpu.memory_space<vmem>>, vector<1x2x32xf32>,
    %443 = arith.index_cast %392 : i32 to index
    %c0_133 = arith.constant 0 : index
    %c0_134 = arith.constant 0 : index
    %444 = vector.load %arg6[%443, %c0_133, %c0_134] : memref<8x2x32xf32, #tpu.memory_space<vmem>>, vector<1x2x32xf32>
    %445 = vector.shape_cast %444 : vector<1x2x32xf32> to vector<2x32xf32>
    %446 = vector.shape_cast %438 : vector<2x32xf32> to vector<1x2x32xf32>
    tpu.vector_store %arg6[%443, %c0_133, %c0_134], %446 {strides = array<i32>} : memref<8x2x32xf32, #tpu.memory_space<vmem>>, vector<1x2x32xf32>,
    %c8_i32 = arith.constant 8 : i32
    %c0_135 = arith.constant 0 : index
    %c0_136 = arith.constant 0 : index
    %c0_137 = arith.constant 0 : index
    %447 = vector.load %arg5[%c0_135, %c0_136, %c0_137] : memref<8x2x32xf32, #tpu.memory_space<vmem>>, vector<8x2x32xf32>
    %c0_138 = arith.constant 0 : index
    %c0_139 = arith.constant 0 : index
    %c0_140 = arith.constant 0 : index
    %448 = vector.load %arg6[%c0_138, %c0_139, %c0_140] : memref<8x2x32xf32, #tpu.memory_space<vmem>>, vector<8x2x32xf32>
    %449 = tpu.concatenate %447, %448 in 2 : vector<8x2x32xf32>, vector<8x2x32xf32> -> vector<8x2x64xf32>
    %c0_141 = arith.constant 0 : index
    %c0_142 = arith.constant 0 : index
    %c0_143 = arith.constant 0 : index
    %450 = vector.load %arg4[%c0_141, %c0_142, %c0_143] : memref<8x2x64xf32, #tpu.memory_space<vmem>>, vector<8x2x64xf32>
    tpu.vector_store %arg4[%c0_141, %c0_142, %c0_143], %449 {strides = array<i32>} : memref<8x2x64xf32, #tpu.memory_space<vmem>>, vector<8x2x64xf32>,
    return
  }
  func.func @transform_0(%arg0: i32) -> (i32, i32, i32) {
    %c0_i32 = arith.constant 0 : i32
    %c0_i32_0 = arith.constant 0 : i32
    %c0_i32_1 = arith.constant 0 : i32
    %c0_i32_2 = arith.constant 0 : i32
    return %c0_i32, %c0_i32_0, %c0_i32_1 : i32, i32, i32
  }
  func.func @transform_1(%arg0: i32) -> (i32, i32) {
    %c0_i32 = arith.constant 0 : i32
    %c0_i32_0 = arith.constant 0 : i32
    %c0_i32_1 = arith.constant 0 : i32
    return %c0_i32, %c0_i32_0 : i32, i32
  }
  func.func @transform_2(%arg0: i32) -> (i32, i32) {
    %c0_i32 = arith.constant 0 : i32
    %c0_i32_0 = arith.constant 0 : i32
    %c0_i32_1 = arith.constant 0 : i32
    return %c0_i32, %c0_i32_0 : i32, i32
  }
  func.func @transform_3(%arg0: i32) -> (i32, i32, i32) {
    %c0_i32 = arith.constant 0 : i32
    %c0_i32_0 = arith.constant 0 : i32
    %c0_i32_1 = arith.constant 0 : i32
    %c0_i32_2 = arith.constant 0 : i32
    return %c0_i32, %c0_i32_0, %c0_i32_1 : i32, i32, i32
  }
}

module attributes {stable_mosaic.version = 11 : i64} {
  func.func @_proj_kernel(%arg0: i32, %arg1: memref<16x48xf32, #tpu.memory_space<vmem>>, %arg2: memref<48x256xf32, #tpu.memory_space<vmem>>, %arg3: memref<1x256xf32, #tpu.memory_space<vmem>>, %arg4: memref<16x256xf32, #tpu.memory_space<vmem>>) attributes {dimension_semantics = [#tpu.dimension_semantics<parallel>], iteration_bounds = array<i64: 1>, scalar_prefetch = 0 : i64, scratch_operands = 0 : i64, tpu.core_type = #tpu.core_type<tc>, window_params = [{transform_indices = @transform_0, window_bounds = array<i64: 16, 48>}, {pipeline_mode = #tpu.pipeline_mode<synchronous>, transform_indices = @transform_1, window_bounds = array<i64: 48, 256>}, {pipeline_mode = #tpu.pipeline_mode<synchronous>, transform_indices = @transform_2, window_bounds = array<i64: 1, 256>}, {transform_indices = @transform_3, window_bounds = array<i64: 16, 256>}]} {
    %c0 = arith.constant 0 : index
    %c0_0 = arith.constant 0 : index
    %0 = vector.load %arg1[%c0, %c0_0] : memref<16x48xf32, #tpu.memory_space<vmem>>, vector<16x48xf32>
    %c0_1 = arith.constant 0 : index
    %c0_2 = arith.constant 0 : index
    %1 = vector.load %arg2[%c0_1, %c0_2] : memref<48x256xf32, #tpu.memory_space<vmem>>, vector<48x256xf32>
    %cst = arith.constant dense<0.000000e+00> : vector<16x256xf32>
    %2 = tpu.matmul %0, %1, %cst {dimension_numbers = #tpu.dot_dimension_numbers<[1], [0], [0], [1], [0, 0, 1, 1], [], []>} : vector<16x48xf32>, vector<48x256xf32>, vector<16x256xf32> -> vector<16x256xf32>
    %c0_3 = arith.constant 0 : index
    %c0_4 = arith.constant 0 : index
    %3 = vector.load %arg3[%c0_3, %c0_4] : memref<1x256xf32, #tpu.memory_space<vmem>>, vector<1x256xf32>
    %4 = vector.broadcast %3 : vector<1x256xf32> to vector<16x256xf32>
    %5 = arith.addf %2, %4 : vector<16x256xf32>
    %c0_5 = arith.constant 0 : index
    %c0_6 = arith.constant 0 : index
    %6 = vector.load %arg4[%c0_5, %c0_6] : memref<16x256xf32, #tpu.memory_space<vmem>>, vector<16x256xf32>
    tpu.vector_store %arg4[%c0_5, %c0_6], %5 {strides = array<i32>} : memref<16x256xf32, #tpu.memory_space<vmem>>, vector<16x256xf32>,
    return
  }
  func.func @transform_0(%arg0: i32) -> (i32, i32) {
    %c0_i32 = arith.constant 0 : i32
    %c0_i32_0 = arith.constant 0 : i32
    return %arg0, %c0_i32 : i32, i32
  }
  func.func @transform_1(%arg0: i32) -> (i32, i32) {
    %c0_i32 = arith.constant 0 : i32
    %c0_i32_0 = arith.constant 0 : i32
    %c0_i32_1 = arith.constant 0 : i32
    return %c0_i32, %c0_i32_0 : i32, i32
  }
  func.func @transform_2(%arg0: i32) -> (i32, i32) {
    %c0_i32 = arith.constant 0 : i32
    %c0_i32_0 = arith.constant 0 : i32
    %c0_i32_1 = arith.constant 0 : i32
    return %c0_i32, %c0_i32_0 : i32, i32
  }
  func.func @transform_3(%arg0: i32) -> (i32, i32) {
    %c0_i32 = arith.constant 0 : i32
    %c0_i32_0 = arith.constant 0 : i32
    return %arg0, %c0_i32 : i32, i32
  }
}

module attributes {stable_mosaic.version = 11 : i64} {
  func.func @_head_kernel(%arg0: i32, %arg1: memref<16x64xf32, #tpu.memory_space<vmem>>, %arg2: memref<2x32xf32, #tpu.memory_space<vmem>>, %arg3: memref<16x16xf32, #tpu.memory_space<vmem>>, %arg4: memref<16x2xf32, #tpu.memory_space<vmem>>, %arg5: memref<2x16xf32, #tpu.memory_space<vmem>>, %arg6: memref<64x32xf32, #tpu.memory_space<vmem>>, %arg7: memref<1x32xf32, #tpu.memory_space<vmem>>, %arg8: memref<32x32xf32, #tpu.memory_space<vmem>>, %arg9: memref<1x32xf32, #tpu.memory_space<vmem>>, %arg10: memref<32x16xf32, #tpu.memory_space<vmem>>, %arg11: memref<1x16xf32, #tpu.memory_space<vmem>>, %arg12: memref<32x32xf32, #tpu.memory_space<vmem>>, %arg13: memref<1x32xf32, #tpu.memory_space<vmem>>, %arg14: memref<32x50xf32, #tpu.memory_space<vmem>>, %arg15: memref<1x50xf32, #tpu.memory_space<vmem>>, %arg16: memref<50x50xf32, #tpu.memory_space<vmem>>, %arg17: memref<1x50xf32, #tpu.memory_space<vmem>>, %arg18: memref<50x32xf32, #tpu.memory_space<vmem>>, %arg19: memref<1x32xf32, #tpu.memory_space<vmem>>, %arg20: memref<32x32xf32, #tpu.memory_space<vmem>>, %arg21: memref<16x16xf32, #tpu.memory_space<vmem>>, %arg22: memref<16x16xf32, #tpu.memory_space<vmem>>, %arg23: memref<2x32xf32, #tpu.memory_space<vmem>>) attributes {dimension_semantics = [#tpu.dimension_semantics<arbitrary>], iteration_bounds = array<i64: 1>, scalar_prefetch = 0 : i64, scratch_operands = 0 : i64, tpu.core_type = #tpu.core_type<tc>, window_params = [{pipeline_mode = #tpu.pipeline_mode<synchronous>, transform_indices = @transform_0, window_bounds = array<i64: 16, 64>}, {pipeline_mode = #tpu.pipeline_mode<synchronous>, transform_indices = @transform_1, window_bounds = array<i64: 2, 32>}, {pipeline_mode = #tpu.pipeline_mode<synchronous>, transform_indices = @transform_2, window_bounds = array<i64: 16, 16>}, {pipeline_mode = #tpu.pipeline_mode<synchronous>, transform_indices = @transform_3, window_bounds = array<i64: 16, 2>}, {pipeline_mode = #tpu.pipeline_mode<synchronous>, transform_indices = @transform_4, window_bounds = array<i64: 2, 16>}, {pipeline_mode = #tpu.pipeline_mode<synchronous>, transform_indices = @transform_5, window_bounds = array<i64: 64, 32>}, {pipeline_mode = #tpu.pipeline_mode<synchronous>, transform_indices = @transform_6, window_bounds = array<i64: 1, 32>}, {pipeline_mode = #tpu.pipeline_mode<synchronous>, transform_indices = @transform_7, window_bounds = array<i64: 32, 32>}, {pipeline_mode = #tpu.pipeline_mode<synchronous>, transform_indices = @transform_8, window_bounds = array<i64: 1, 32>}, {pipeline_mode = #tpu.pipeline_mode<synchronous>, transform_indices = @transform_9, window_bounds = array<i64: 32, 16>}, {pipeline_mode = #tpu.pipeline_mode<synchronous>, transform_indices = @transform_10, window_bounds = array<i64: 1, 16>}, {pipeline_mode = #tpu.pipeline_mode<synchronous>, transform_indices = @transform_11, window_bounds = array<i64: 32, 32>}, {pipeline_mode = #tpu.pipeline_mode<synchronous>, transform_indices = @transform_12, window_bounds = array<i64: 1, 32>}, {pipeline_mode = #tpu.pipeline_mode<synchronous>, transform_indices = @transform_13, window_bounds = array<i64: 32, 50>}, {pipeline_mode = #tpu.pipeline_mode<synchronous>, transform_indices = @transform_14, window_bounds = array<i64: 1, 50>}, {pipeline_mode = #tpu.pipeline_mode<synchronous>, transform_indices = @transform_15, window_bounds = array<i64: 50, 50>}, {pipeline_mode = #tpu.pipeline_mode<synchronous>, transform_indices = @transform_16, window_bounds = array<i64: 1, 50>}, {pipeline_mode = #tpu.pipeline_mode<synchronous>, transform_indices = @transform_17, window_bounds = array<i64: 50, 32>}, {pipeline_mode = #tpu.pipeline_mode<synchronous>, transform_indices = @transform_18, window_bounds = array<i64: 1, 32>}, {pipeline_mode = #tpu.pipeline_mode<synchronous>, transform_indices = @transform_19, window_bounds = array<i64: 32, 32>}, {pipeline_mode = #tpu.pipeline_mode<synchronous>, transform_indices = @transform_20, window_bounds = array<i64: 16, 16>}, {pipeline_mode = #tpu.pipeline_mode<synchronous>, transform_indices = @transform_21, window_bounds = array<i64: 16, 16>}, {pipeline_mode = #tpu.pipeline_mode<synchronous>, transform_indices = @transform_22, window_bounds = array<i64: 2, 32>}]} {
    %c0 = arith.constant 0 : index
    %c0_0 = arith.constant 0 : index
    %0 = vector.load %arg1[%c0, %c0_0] : memref<16x64xf32, #tpu.memory_space<vmem>>, vector<16x64xf32>
    %c0_1 = arith.constant 0 : index
    %c0_2 = arith.constant 0 : index
    %1 = vector.load %arg2[%c0_1, %c0_2] : memref<2x32xf32, #tpu.memory_space<vmem>>, vector<2x32xf32>
    %c0_3 = arith.constant 0 : index
    %c0_4 = arith.constant 0 : index
    %2 = vector.load %arg4[%c0_3, %c0_4] : memref<16x2xf32, #tpu.memory_space<vmem>>, vector<16x2xf32>
    %c0_5 = arith.constant 0 : index
    %c0_6 = arith.constant 0 : index
    %3 = vector.load %arg5[%c0_5, %c0_6] : memref<2x16xf32, #tpu.memory_space<vmem>>, vector<2x16xf32>
    %c0_7 = arith.constant 0 : index
    %c0_8 = arith.constant 0 : index
    %4 = vector.load %arg6[%c0_7, %c0_8] : memref<64x32xf32, #tpu.memory_space<vmem>>, vector<64x32xf32>
    %cst = arith.constant dense<0.000000e+00> : vector<16x32xf32>
    %5 = tpu.matmul %0, %4, %cst {dimension_numbers = #tpu.dot_dimension_numbers<[1], [0], [0], [1], [0, 0, 1, 1], [], []>} : vector<16x64xf32>, vector<64x32xf32>, vector<16x32xf32> -> vector<16x32xf32>
    %c0_9 = arith.constant 0 : index
    %c0_10 = arith.constant 0 : index
    %6 = vector.load %arg7[%c0_9, %c0_10] : memref<1x32xf32, #tpu.memory_space<vmem>>, vector<1x32xf32>
    %7 = vector.broadcast %6 : vector<1x32xf32> to vector<16x32xf32>
    %8 = arith.addf %5, %7 : vector<16x32xf32>
    %9 = arith.negf %8 : vector<16x32xf32>
    %10 = math.exp %9 : vector<16x32xf32>
    %cst_11 = arith.constant 1.000000e+00 : f32
    %11 = vector.broadcast %cst_11 : f32 to vector<16x32xf32>
    %12 = arith.addf %11, %10 : vector<16x32xf32>
    %13 = arith.divf %11, %12 : vector<16x32xf32>
    %c0_12 = arith.constant 0 : index
    %c0_13 = arith.constant 0 : index
    %14 = vector.load %arg8[%c0_12, %c0_13] : memref<32x32xf32, #tpu.memory_space<vmem>>, vector<32x32xf32>
    %cst_14 = arith.constant dense<0.000000e+00> : vector<2x32xf32>
    %15 = tpu.matmul %1, %14, %cst_14 {dimension_numbers = #tpu.dot_dimension_numbers<[1], [0], [0], [1], [0, 0, 1, 1], [], []>} : vector<2x32xf32>, vector<32x32xf32>, vector<2x32xf32> -> vector<2x32xf32>
    %c0_15 = arith.constant 0 : index
    %c0_16 = arith.constant 0 : index
    %16 = vector.load %arg9[%c0_15, %c0_16] : memref<1x32xf32, #tpu.memory_space<vmem>>, vector<1x32xf32>
    %17 = vector.broadcast %16 : vector<1x32xf32> to vector<2x32xf32>
    %18 = arith.addf %15, %17 : vector<2x32xf32>
    %19 = arith.negf %18 : vector<2x32xf32>
    %20 = math.exp %19 : vector<2x32xf32>
    %cst_17 = arith.constant 1.000000e+00 : f32
    %21 = vector.broadcast %cst_17 : f32 to vector<2x32xf32>
    %22 = arith.addf %21, %20 : vector<2x32xf32>
    %23 = arith.divf %21, %22 : vector<2x32xf32>
    %cst_18 = arith.constant dense<0.000000e+00> : vector<16x32xf32>
    %24 = tpu.matmul %2, %23, %cst_18 {dimension_numbers = #tpu.dot_dimension_numbers<[1], [0], [0], [1], [0, 0, 1, 1], [], []>} : vector<16x2xf32>, vector<2x32xf32>, vector<16x32xf32> -> vector<16x32xf32>
    %25 = arith.mulf %13, %24 : vector<16x32xf32>
    %c0_19 = arith.constant 0 : index
    %c0_20 = arith.constant 0 : index
    %26 = vector.load %arg10[%c0_19, %c0_20] : memref<32x16xf32, #tpu.memory_space<vmem>>, vector<32x16xf32>
    %cst_21 = arith.constant dense<0.000000e+00> : vector<16x16xf32>
    %27 = tpu.matmul %25, %26, %cst_21 {dimension_numbers = #tpu.dot_dimension_numbers<[1], [0], [0], [1], [0, 0, 1, 1], [], []>} : vector<16x32xf32>, vector<32x16xf32>, vector<16x16xf32> -> vector<16x16xf32>
    %c0_22 = arith.constant 0 : index
    %c0_23 = arith.constant 0 : index
    %28 = vector.load %arg11[%c0_22, %c0_23] : memref<1x16xf32, #tpu.memory_space<vmem>>, vector<1x16xf32>
    %29 = vector.broadcast %28 : vector<1x16xf32> to vector<16x16xf32>
    %30 = arith.addf %27, %29 : vector<16x16xf32>
    %31 = arith.negf %30 : vector<16x16xf32>
    %32 = math.exp %31 : vector<16x16xf32>
    %cst_24 = arith.constant 1.000000e+00 : f32
    %33 = vector.broadcast %cst_24 : f32 to vector<16x16xf32>
    %34 = arith.addf %33, %32 : vector<16x16xf32>
    %35 = arith.divf %33, %34 : vector<16x16xf32>
    %c0_25 = arith.constant 0 : index
    %c0_26 = arith.constant 0 : index
    %36 = vector.load %arg21[%c0_25, %c0_26] : memref<16x16xf32, #tpu.memory_space<vmem>>, vector<16x16xf32>
    tpu.vector_store %arg21[%c0_25, %c0_26], %35 {strides = array<i32>} : memref<16x16xf32, #tpu.memory_space<vmem>>, vector<16x16xf32>,
    %c0_27 = arith.constant 0 : index
    %c0_28 = arith.constant 0 : index
    %37 = vector.load %arg3[%c0_27, %c0_28] : memref<16x16xf32, #tpu.memory_space<vmem>>, vector<16x16xf32>
    %38 = arith.subf %37, %35 : vector<16x16xf32>
    %cst_29 = arith.constant 0.000000e+00 : f32
    %cst_30 = arith.constant 1.000000e+00 : f32
    %39 = vector.broadcast %cst_29 : f32 to vector<16x16xf32>
    %40 = arith.maximumf %39, %38 : vector<16x16xf32>
    %41 = vector.broadcast %cst_30 : f32 to vector<16x16xf32>
    %42 = arith.minimumf %41, %40 : vector<16x16xf32>
    %c0_31 = arith.constant 0 : index
    %c0_32 = arith.constant 0 : index
    %43 = vector.load %arg22[%c0_31, %c0_32] : memref<16x16xf32, #tpu.memory_space<vmem>>, vector<16x16xf32>
    tpu.vector_store %arg22[%c0_31, %c0_32], %42 {strides = array<i32>} : memref<16x16xf32, #tpu.memory_space<vmem>>, vector<16x16xf32>,
    %c0_33 = arith.constant 0 : index
    %c0_34 = arith.constant 0 : index
    %44 = vector.load %arg14[%c0_33, %c0_34] : memref<32x50xf32, #tpu.memory_space<vmem>>, vector<32x50xf32>
    %cst_35 = arith.constant dense<0.000000e+00> : vector<16x50xf32>
    %45 = tpu.matmul %25, %44, %cst_35 {dimension_numbers = #tpu.dot_dimension_numbers<[1], [0], [0], [1], [0, 0, 1, 1], [], []>} : vector<16x32xf32>, vector<32x50xf32>, vector<16x50xf32> -> vector<16x50xf32>
    %c0_36 = arith.constant 0 : index
    %c0_37 = arith.constant 0 : index
    %46 = vector.load %arg15[%c0_36, %c0_37] : memref<1x50xf32, #tpu.memory_space<vmem>>, vector<1x50xf32>
    %47 = vector.broadcast %46 : vector<1x50xf32> to vector<16x50xf32>
    %48 = arith.addf %45, %47 : vector<16x50xf32>
    %c0_38 = arith.constant 0 : index
    %c0_39 = arith.constant 0 : index
    %49 = vector.load %arg16[%c0_38, %c0_39] : memref<50x50xf32, #tpu.memory_space<vmem>>, vector<50x50xf32>
    %cst_40 = arith.constant dense<0.000000e+00> : vector<16x50xf32>
    %50 = tpu.matmul %48, %49, %cst_40 {dimension_numbers = #tpu.dot_dimension_numbers<[1], [0], [0], [1], [0, 0, 1, 1], [], []>} : vector<16x50xf32>, vector<50x50xf32>, vector<16x50xf32> -> vector<16x50xf32>
    %c0_41 = arith.constant 0 : index
    %c0_42 = arith.constant 0 : index
    %51 = vector.load %arg17[%c0_41, %c0_42] : memref<1x50xf32, #tpu.memory_space<vmem>>, vector<1x50xf32>
    %52 = vector.broadcast %51 : vector<1x50xf32> to vector<16x50xf32>
    %53 = arith.addf %50, %52 : vector<16x50xf32>
    %c0_43 = arith.constant 0 : index
    %c0_44 = arith.constant 0 : index
    %54 = vector.load %arg18[%c0_43, %c0_44] : memref<50x32xf32, #tpu.memory_space<vmem>>, vector<50x32xf32>
    %cst_45 = arith.constant dense<0.000000e+00> : vector<16x32xf32>
    %55 = tpu.matmul %53, %54, %cst_45 {dimension_numbers = #tpu.dot_dimension_numbers<[1], [0], [0], [1], [0, 0, 1, 1], [], []>} : vector<16x50xf32>, vector<50x32xf32>, vector<16x32xf32> -> vector<16x32xf32>
    %c0_46 = arith.constant 0 : index
    %c0_47 = arith.constant 0 : index
    %56 = vector.load %arg19[%c0_46, %c0_47] : memref<1x32xf32, #tpu.memory_space<vmem>>, vector<1x32xf32>
    %57 = vector.broadcast %56 : vector<1x32xf32> to vector<16x32xf32>
    %58 = arith.addf %55, %57 : vector<16x32xf32>
    %59 = arith.negf %58 : vector<16x32xf32>
    %60 = math.exp %59 : vector<16x32xf32>
    %cst_48 = arith.constant 1.000000e+00 : f32
    %61 = vector.broadcast %cst_48 : f32 to vector<16x32xf32>
    %62 = arith.addf %61, %60 : vector<16x32xf32>
    %63 = arith.divf %61, %62 : vector<16x32xf32>
    %cst_49 = arith.constant dense<0.000000e+00> : vector<2x32xf32>
    %64 = tpu.matmul %3, %63, %cst_49 {dimension_numbers = #tpu.dot_dimension_numbers<[1], [0], [0], [1], [0, 0, 1, 1], [], []>} : vector<2x16xf32>, vector<16x32xf32>, vector<2x32xf32> -> vector<2x32xf32>
    %c0_50 = arith.constant 0 : index
    %c0_51 = arith.constant 0 : index
    %65 = vector.load %arg20[%c0_50, %c0_51] : memref<32x32xf32, #tpu.memory_space<vmem>>, vector<32x32xf32>
    %cst_52 = arith.constant dense<0.000000e+00> : vector<2x32xf32>
    %66 = tpu.matmul %64, %65, %cst_52 {dimension_numbers = #tpu.dot_dimension_numbers<[1], [0], [0], [1], [0, 0, 1, 1], [], []>} : vector<2x32xf32>, vector<32x32xf32>, vector<2x32xf32> -> vector<2x32xf32>
    %c0_53 = arith.constant 0 : index
    %c0_54 = arith.constant 0 : index
    %67 = vector.load %arg12[%c0_53, %c0_54] : memref<32x32xf32, #tpu.memory_space<vmem>>, vector<32x32xf32>
    %cst_55 = arith.constant dense<0.000000e+00> : vector<16x32xf32>
    %68 = tpu.matmul %25, %67, %cst_55 {dimension_numbers = #tpu.dot_dimension_numbers<[1], [0], [0], [1], [0, 0, 1, 1], [], []>} : vector<16x32xf32>, vector<32x32xf32>, vector<16x32xf32> -> vector<16x32xf32>
    %c0_56 = arith.constant 0 : index
    %c0_57 = arith.constant 0 : index
    %69 = vector.load %arg13[%c0_56, %c0_57] : memref<1x32xf32, #tpu.memory_space<vmem>>, vector<1x32xf32>
    %70 = vector.broadcast %69 : vector<1x32xf32> to vector<16x32xf32>
    %71 = arith.addf %68, %70 : vector<16x32xf32>
    %72 = arith.negf %71 : vector<16x32xf32>
    %73 = math.exp %72 : vector<16x32xf32>
    %cst_58 = arith.constant 1.000000e+00 : f32
    %74 = vector.broadcast %cst_58 : f32 to vector<16x32xf32>
    %75 = arith.addf %74, %73 : vector<16x32xf32>
    %76 = arith.divf %74, %75 : vector<16x32xf32>
    %cst_59 = arith.constant dense<0.000000e+00> : vector<2x32xf32>
    %77 = tpu.matmul %3, %76, %cst_59 {dimension_numbers = #tpu.dot_dimension_numbers<[1], [0], [0], [1], [0, 0, 1, 1], [], []>} : vector<2x16xf32>, vector<16x32xf32>, vector<2x32xf32> -> vector<2x32xf32>
    %78 = arith.mulf %77, %66 : vector<2x32xf32>
    %79 = arith.addf %78, %1 : vector<2x32xf32>
    %80 = arith.mulf %79, %79 : vector<2x32xf32>
    %cst_60 = arith.constant dense<0.000000e+00> : vector<2xf32>
    %81 = vector.multi_reduction <add>, %80, %cst_60 [1] : vector<2x32xf32> to vector<2xf32>
    %82 = vector.shape_cast %81 : vector<2xf32> to vector<2x1xf32>
    %83 = math.sqrt %82 : vector<2x1xf32>
    %84 = vector.broadcast %83 : vector<2x1xf32> to vector<2x32xf32>
    %85 = arith.divf %79, %84 : vector<2x32xf32>
    %c0_61 = arith.constant 0 : index
    %c0_62 = arith.constant 0 : index
    %86 = vector.load %arg23[%c0_61, %c0_62] : memref<2x32xf32, #tpu.memory_space<vmem>>, vector<2x32xf32>
    tpu.vector_store %arg23[%c0_61, %c0_62], %85 {strides = array<i32>} : memref<2x32xf32, #tpu.memory_space<vmem>>, vector<2x32xf32>,
    return
  }
  func.func @transform_0(%arg0: i32) -> (i32, i32) {
    %c0_i32 = arith.constant 0 : i32
    %c0_i32_0 = arith.constant 0 : i32
    %c0_i32_1 = arith.constant 0 : i32
    return %c0_i32, %c0_i32_0 : i32, i32
  }
  func.func @transform_1(%arg0: i32) -> (i32, i32) {
    %c0_i32 = arith.constant 0 : i32
    %c0_i32_0 = arith.constant 0 : i32
    %c0_i32_1 = arith.constant 0 : i32
    return %c0_i32, %c0_i32_0 : i32, i32
  }
  func.func @transform_2(%arg0: i32) -> (i32, i32) {
    %c0_i32 = arith.constant 0 : i32
    %c0_i32_0 = arith.constant 0 : i32
    %c0_i32_1 = arith.constant 0 : i32
    return %c0_i32, %c0_i32_0 : i32, i32
  }
  func.func @transform_3(%arg0: i32) -> (i32, i32) {
    %c0_i32 = arith.constant 0 : i32
    %c0_i32_0 = arith.constant 0 : i32
    %c0_i32_1 = arith.constant 0 : i32
    return %c0_i32, %c0_i32_0 : i32, i32
  }
  func.func @transform_4(%arg0: i32) -> (i32, i32) {
    %c0_i32 = arith.constant 0 : i32
    %c0_i32_0 = arith.constant 0 : i32
    %c0_i32_1 = arith.constant 0 : i32
    return %c0_i32, %c0_i32_0 : i32, i32
  }
  func.func @transform_5(%arg0: i32) -> (i32, i32) {
    %c0_i32 = arith.constant 0 : i32
    %c0_i32_0 = arith.constant 0 : i32
    %c0_i32_1 = arith.constant 0 : i32
    return %c0_i32, %c0_i32_0 : i32, i32
  }
  func.func @transform_6(%arg0: i32) -> (i32, i32) {
    %c0_i32 = arith.constant 0 : i32
    %c0_i32_0 = arith.constant 0 : i32
    %c0_i32_1 = arith.constant 0 : i32
    return %c0_i32, %c0_i32_0 : i32, i32
  }
  func.func @transform_7(%arg0: i32) -> (i32, i32) {
    %c0_i32 = arith.constant 0 : i32
    %c0_i32_0 = arith.constant 0 : i32
    %c0_i32_1 = arith.constant 0 : i32
    return %c0_i32, %c0_i32_0 : i32, i32
  }
  func.func @transform_8(%arg0: i32) -> (i32, i32) {
    %c0_i32 = arith.constant 0 : i32
    %c0_i32_0 = arith.constant 0 : i32
    %c0_i32_1 = arith.constant 0 : i32
    return %c0_i32, %c0_i32_0 : i32, i32
  }
  func.func @transform_9(%arg0: i32) -> (i32, i32) {
    %c0_i32 = arith.constant 0 : i32
    %c0_i32_0 = arith.constant 0 : i32
    %c0_i32_1 = arith.constant 0 : i32
    return %c0_i32, %c0_i32_0 : i32, i32
  }
  func.func @transform_10(%arg0: i32) -> (i32, i32) {
    %c0_i32 = arith.constant 0 : i32
    %c0_i32_0 = arith.constant 0 : i32
    %c0_i32_1 = arith.constant 0 : i32
    return %c0_i32, %c0_i32_0 : i32, i32
  }
  func.func @transform_11(%arg0: i32) -> (i32, i32) {
    %c0_i32 = arith.constant 0 : i32
    %c0_i32_0 = arith.constant 0 : i32
    %c0_i32_1 = arith.constant 0 : i32
    return %c0_i32, %c0_i32_0 : i32, i32
  }
  func.func @transform_12(%arg0: i32) -> (i32, i32) {
    %c0_i32 = arith.constant 0 : i32
    %c0_i32_0 = arith.constant 0 : i32
    %c0_i32_1 = arith.constant 0 : i32
    return %c0_i32, %c0_i32_0 : i32, i32
  }
  func.func @transform_13(%arg0: i32) -> (i32, i32) {
    %c0_i32 = arith.constant 0 : i32
    %c0_i32_0 = arith.constant 0 : i32
    %c0_i32_1 = arith.constant 0 : i32
    return %c0_i32, %c0_i32_0 : i32, i32
  }
  func.func @transform_14(%arg0: i32) -> (i32, i32) {
    %c0_i32 = arith.constant 0 : i32
    %c0_i32_0 = arith.constant 0 : i32
    %c0_i32_1 = arith.constant 0 : i32
    return %c0_i32, %c0_i32_0 : i32, i32
  }
  func.func @transform_15(%arg0: i32) -> (i32, i32) {
    %c0_i32 = arith.constant 0 : i32
    %c0_i32_0 = arith.constant 0 : i32
    %c0_i32_1 = arith.constant 0 : i32
    return %c0_i32, %c0_i32_0 : i32, i32
  }
  func.func @transform_16(%arg0: i32) -> (i32, i32) {
    %c0_i32 = arith.constant 0 : i32
    %c0_i32_0 = arith.constant 0 : i32
    %c0_i32_1 = arith.constant 0 : i32
    return %c0_i32, %c0_i32_0 : i32, i32
  }
  func.func @transform_17(%arg0: i32) -> (i32, i32) {
    %c0_i32 = arith.constant 0 : i32
    %c0_i32_0 = arith.constant 0 : i32
    %c0_i32_1 = arith.constant 0 : i32
    return %c0_i32, %c0_i32_0 : i32, i32
  }
  func.func @transform_18(%arg0: i32) -> (i32, i32) {
    %c0_i32 = arith.constant 0 : i32
    %c0_i32_0 = arith.constant 0 : i32
    %c0_i32_1 = arith.constant 0 : i32
    return %c0_i32, %c0_i32_0 : i32, i32
  }
  func.func @transform_19(%arg0: i32) -> (i32, i32) {
    %c0_i32 = arith.constant 0 : i32
    %c0_i32_0 = arith.constant 0 : i32
    %c0_i32_1 = arith.constant 0 : i32
    return %c0_i32, %c0_i32_0 : i32, i32
  }
  func.func @transform_20(%arg0: i32) -> (i32, i32) {
    %c0_i32 = arith.constant 0 : i32
    %c0_i32_0 = arith.constant 0 : i32
    %c0_i32_1 = arith.constant 0 : i32
    return %c0_i32, %c0_i32_0 : i32, i32
  }
  func.func @transform_21(%arg0: i32) -> (i32, i32) {
    %c0_i32 = arith.constant 0 : i32
    %c0_i32_0 = arith.constant 0 : i32
    %c0_i32_1 = arith.constant 0 : i32
    return %c0_i32, %c0_i32_0 : i32, i32
  }
  func.func @transform_22(%arg0: i32) -> (i32, i32) {
    %c0_i32 = arith.constant 0 : i32
    %c0_i32_0 = arith.constant 0 : i32
    %c0_i32_1 = arith.constant 0 : i32
    return %c0_i32, %c0_i32_0 : i32, i32
  }
}

</mosaic_0001>

<bundles_post_ra>
// kernel: rsan_forward.7
= control target key start
LH: loop header
LB: loop body
LE: loop exit
PB: predicated region body
PF: predicated region fallthrough
CT: control target
= control target key end

     0   :  { %vm38_vm0 = vcmask 523264   ;;  %s208_s1 = inlined_call_operand.vmem [shape: f32[64,256], index: 1, kind: input, shape index: {}]   ;;  %s209_s0 = inlined_call_operand.vmem [shape: f32[16,64], index: 0, kind: input, shape index: {}]   ;;  %s210_s2 = inlined_call_operand.vmem [shape: f32[1,256], index: 2, kind: input, shape index: {}]   ;;  %s211_s3 = inlined_call_operand.vmem [shape: f32[16,256], index: 3, kind: output, shape index: {}]  }
   0x1   :  { %v30_v0 = vld [vmem:[%s208_s1 + $0x70] sm:$0xff]  ;;  %v31_v1 = vld [vmem:[%s208_s1 + $0x78] sm:$0xff]  ;;  %v28_v2 = vld [vmem:[%s208_s1 + $0x60] sm:$0xff] }
   0x2   :  { %103 = vmatpush.msra.mxu2 %v30_v0  ;;  %111 = vmatpush.msra.mxu3 %v31_v1  ;;  %v29_v3 = vld [vmem:[%s208_s1 + $0x68] sm:$0xff]  ;;  %v26_v4 = vld [vmem:[%s208_s1 + $0x50] sm:$0xff]  ;;  %v27_v5 = vld [vmem:[%s208_s1 + $0x58] sm:$0xff] }
   0x3   :  { %53 = vmatpush.msra.mxu0 %v30_v0  ;;  %76 = vmatpush.msra.mxu1 %v31_v1  ;;  %v24_v6 = vld [vmem:[%s208_s1 + $0x40] sm:$0xff]  ;;  %v25_v7 = vld [vmem:[%s208_s1 + $0x48] sm:$0xff]  ;;  %v22_v8 = vld [vmem:[%s208_s1 + $0x30] sm:$0xff] }
   0x4   :  { %104 = vmatpush.msra.mxu2 %v28_v2  ;;  %112 = vmatpush.msra.mxu3 %v29_v3  ;;  %v23_v9 = vld [vmem:[%s208_s1 + $0x38] sm:$0xff]  ;;  %v20_v10 = vld [vmem:[%s208_s1 + $0x20] sm:$0xff]  ;;  %v21_v11 = vld [vmem:[%s208_s1 + $0x28] sm:$0xff] }
   0x5   :  { %54 = vmatpush.msra.mxu0 %v28_v2  ;;  %77 = vmatpush.msra.mxu1 %v29_v3  ;;  %v18_v12 = vld [vmem:[%s208_s1 + $0x10] sm:$0xff]  ;;  %v19_v13 = vld [vmem:[%s208_s1 + $0x18] sm:$0xff]  ;;  %v16_v14 = vld [vmem:[%s208_s1] sm:$0xff] }
   0x6   :  { %105 = vmatpush.msra.mxu2 %v26_v4  ;;  %113 = vmatpush.msra.mxu3 %v27_v5  ;;  %v17_v15 = vld [vmem:[%s208_s1 + $0x8] sm:$0xff]  ;;  %v14_v17 = vld [vmem:[%s209_s0] sm:$0xff] }
   0x7   :  { %55 = vmatpush.msra.mxu0 %v26_v4  ;;  %78 = vmatpush.msra.mxu1 %v27_v5  ;;  %v15_v16 = vld [vmem:[%s209_s0 + $0x8] sm:$0xff]  ;;  %v32_v18 = vld [vmem:[%s210_s2] sm:$0x3] }
   0x8   :  { %106 = vmatpush.msra.mxu2 %v24_v6  ;;  %114 = vmatpush.msra.mxu3 %v25_v7  ;;  %v34_v19 = vperm.slane %v32_v18, 0  ;;  %v35_v20 = vperm.slane %v32_v18, 1 }
   0x9   :  { %56 = vmatpush.msra.mxu0 %v24_v6  ;;  %79 = vmatpush.msra.mxu1 %v25_v7 }
   0xa   :  { %107 = vmatpush.msra.mxu2 %v22_v8  ;;  %115 = vmatpush.msra.mxu3 %v23_v9 }
   0xb   :  { %57 = vmatpush.msra.mxu0 %v22_v8  ;;  %80 = vmatpush.msra.mxu1 %v23_v9 }
   0xc   :  { %108 = vmatpush.msra.mxu2 %v20_v10  ;;  %116 = vmatpush.msra.mxu3 %v21_v11 }
   0xd   :  { %58 = vmatpush.msra.mxu0 %v20_v10  ;;  %81 = vmatpush.msra.mxu1 %v21_v11 }
   0xe   :  { %109 = vmatpush.msra.mxu2 %v18_v12  ;;  %117 = vmatpush.msra.mxu3 %v19_v13 }
   0xf   :  { %59 = vmatpush.msra.mxu0 %v18_v12  ;;  %82 = vmatpush.msra.mxu1 %v19_v13 }
  0x10   :  { %110 = vmatpush.msra.mxu2 %v16_v14  ;;  %118 = vmatpush.msra.mxu3 %v17_v15 }
  0x11   :  { %100 = vmatmul.msk.f32.vlgmr.msra.gmra.mxu2 %vm38_vm0, %v15_v16  ;;  %102 = vmatmul.msk.f32.vlgmr.msra.gmra.mxu3 %vm38_vm0, %v15_v16 }
  0x12   :  { %60 = vmatpush.msra.mxu0 %v16_v14  ;;  %83 = vmatpush.msra.mxu1 %v17_v15 }
  0x13   :  { %99 = vmatmul.msk.f32.vlgmr.msra.gmra.mxu0 %vm38_vm0, %v14_v17  ;;  %101 = vmatmul.msk.f32.vlgmr.msra.gmra.mxu1 %vm38_vm0, %v14_v17 }
  0x90   :  { %v62_v21 = vpop.f32.mrf.mxu0  ;;  %v85_v22 = vpop.f32.mrf.mxu1 }
  0x91   :  { %v63_v23 = vadd.f32 %v62_v21, %v34_v19  ;;  %v86_v24 = vadd.f32 %v85_v22, %v35_v20 }
  0x93   :  { %91 = vst [vmem:[%s211_s3] sm:$0xff] %v63_v23 }
  0x94   :  { %v65_v25 = vpop.f32.mrf.mxu2  ;;  %92 = vst [vmem:[%s211_s3 + $0x8] sm:$0xff] %v86_v24  ;;  %v88_v26 = vpop.f32.mrf.mxu3 }
  0x95   :  { %v66_v27 = vadd.f32 %v65_v25, %v34_v19  ;;  %v89_v28 = vadd.f32 %v88_v26, %v35_v20 }
  0x97   :  { %93 = vst [vmem:[%s211_s3 + $0x10] sm:$0xff] %v66_v27 }
  0x98   :  { %94 = vst [vmem:[%s211_s3 + $0x18] sm:$0xff] %v89_v28 }

// kernel: rsan_forward.5
= control target key start
LH: loop header
LB: loop body
LE: loop exit
PB: predicated region body
PF: predicated region fallthrough
CT: control target
= control target key end

     0   :  { %8 = vsyncpa [#allocation3], 0  ;;  %s157_s15 = smov [#allocation2]   ;;  %s158_s17 = smov 256   ;;  %s204_s0 = inlined_call_operand.vmem [shape: f32[16,48], index: 0, kind: input, shape index: {}]   ;;  %s205_s1 = inlined_call_operand.hbm [shape: f32[48,256], index: 1, kind: input, shape index: {}]   ;;  %s206_s2 = inlined_call_operand.vmem [shape: f32[1,256], index: 2, kind: input, shape index: {}]   ;;  %s207_s3 = inlined_call_operand.vmem [shape: f32[16,256], index: 3, kind: output, shape index: {}]  }
   0x1   :  { %s15_s14 = sshll.u32 %s205_s1, 4  ;;  %s17_s16 = sshll.u32 %s157_s15, 4  ;;  %s16_s14 = int_to_ptr.hbm [resolvable:$true] %s15_s14  ;;  %s18_s16 = int_to_ptr.vmem [resolvable:$true] %s17_s16 }
   0x2   :  { %s159_s18 = smov 16  }
   0x3   :  { %23 = dma.hbm_to_vmem [thread:$0]  %s16_s14, 1536, %s18_s16, [#allocation3], %s158_s17, %s158_s17, %s159_s18  }
   0x4   :  { %155 = dma.done.wait [#allocation3], 1536  }
   0x5   :  { %156 = vsyncadd [#allocation3], 4294965760  ;;  %v42_v0 = vld [vmem:[#allocation2 + $0x50] sm:$0xff]  ;;  %v43_v1 = vld [vmem:[#allocation2 + $0x58] sm:$0xff]  ;;  %vm50_vm0 = vcmask 392192  }
   0x6   :  { %v40_v2 = vld [vmem:[#allocation2 + $0x40] sm:$0xff]  ;;  %116 = vmatpush.msra.mxu2 %v42_v0  ;;  %122 = vmatpush.msra.mxu3 %v43_v1  ;;  %v41_v3 = vld [vmem:[#allocation2 + $0x48] sm:$0xff]  ;;  %v38_v4 = vld [vmem:[#allocation2 + $0x30] sm:$0xff] }
   0x7   :  { %v39_v5 = vld [vmem:[#allocation2 + $0x38] sm:$0xff]  ;;  %67 = vmatpush.msra.mxu0 %v42_v0  ;;  %90 = vmatpush.msra.mxu1 %v43_v1  ;;  %v36_v6 = vld [vmem:[#allocation2 + $0x20] sm:$0xff]  ;;  %v37_v7 = vld [vmem:[#allocation2 + $0x28] sm:$0xff] }
   0x8   :  { %117 = vmatpush.msra.mxu2 %v40_v2  ;;  %123 = vmatpush.msra.mxu3 %v41_v3  ;;  %v34_v8 = vld [vmem:[#allocation2 + $0x10] sm:$0xff]  ;;  %v35_v9 = vld [vmem:[#allocation2 + $0x18] sm:$0xff]  ;;  %v32_v10 = vld [vmem:[#allocation2] sm:$0xff] }
   0x9   :  { %68 = vmatpush.msra.mxu0 %v40_v2  ;;  %91 = vmatpush.msra.mxu1 %v41_v3  ;;  %v33_v11 = vld [vmem:[#allocation2 + $0x8] sm:$0xff]  ;;  %v30_v13 = vld [vmem:[%s204_s0] sm:$0xff] }
   0xa   :  { %118 = vmatpush.msra.mxu2 %v38_v4  ;;  %124 = vmatpush.msra.mxu3 %v39_v5  ;;  %v31_v12 = vld [vmem:[%s204_s0 + $0x8] sm:$0xff]  ;;  %v44_v14 = vld [vmem:[%s206_s2] sm:$0x3] }
   0xb   :  { %69 = vmatpush.msra.mxu0 %v38_v4  ;;  %92 = vmatpush.msra.mxu1 %v39_v5  ;;  %v46_v15 = vperm.slane %v44_v14, 0  ;;  %v47_v16 = vperm.slane %v44_v14, 1 }
   0xc   :  { %119 = vmatpush.msra.mxu2 %v36_v6  ;;  %125 = vmatpush.msra.mxu3 %v37_v7 }
   0xd   :  { %70 = vmatpush.msra.mxu0 %v36_v6  ;;  %93 = vmatpush.msra.mxu1 %v37_v7 }
   0xe   :  { %120 = vmatpush.msra.mxu2 %v34_v8  ;;  %126 = vmatpush.msra.mxu3 %v35_v9 }
   0xf   :  { %71 = vmatpush.msra.mxu0 %v34_v8  ;;  %94 = vmatpush.msra.mxu1 %v35_v9 }
  0x10   :  { %121 = vmatpush.msra.mxu2 %v32_v10  ;;  %127 = vmatpush.msra.mxu3 %v33_v11 }
  0x11   :  { %113 = vmatmul.msk.f32.vlgmr.msra.gmra.mxu2 %vm50_vm0, %v31_v12  ;;  %115 = vmatmul.msk.f32.vlgmr.msra.gmra.mxu3 %vm50_vm0, %v31_v12 }
  0x12   :  { %72 = vmatpush.msra.mxu0 %v32_v10  ;;  %95 = vmatpush.msra.mxu1 %v33_v11 }
  0x13   :  { %112 = vmatmul.msk.f32.vlgmr.msra.gmra.mxu0 %vm50_vm0, %v30_v13  ;;  %114 = vmatmul.msk.f32.vlgmr.msra.gmra.mxu1 %vm50_vm0, %v30_v13 }
  0x90   :  { %v74_v17 = vpop.f32.mrf.mxu0  ;;  %v97_v18 = vpop.f32.mrf.mxu1 }
  0x91   :  { %v75_v19 = vadd.f32 %v74_v17, %v46_v15  ;;  %v98_v20 = vadd.f32 %v97_v18, %v47_v16 }
  0x93   :  { %103 = vst [vmem:[%s207_s3] sm:$0xff] %v75_v19 }
  0x94   :  { %v77_v21 = vpop.f32.mrf.mxu2  ;;  %104 = vst [vmem:[%s207_s3 + $0x8] sm:$0xff] %v98_v20  ;;  %v100_v22 = vpop.f32.mrf.mxu3 }
  0x95   :  { %v78_v23 = vadd.f32 %v77_v21, %v46_v15  ;;  %v101_v24 = vadd.f32 %v100_v22, %v47_v16 }
  0x97   :  { %105 = vst [vmem:[%s207_s3 + $0x10] sm:$0xff] %v78_v23 }
  0x98   :  { %106 = vst [vmem:[%s207_s3 + $0x18] sm:$0xff] %v101_v24 }
  0x99   :  { %111 = vsyncpa [#allocation3], 1 }

// kernel: rsan_forward.8
= control target key start
LH: loop header
LB: loop body
LE: loop exit
PB: predicated region body
PF: predicated region fallthrough
CT: control target
= control target key end

     0   :  { %v1445_v8 = vmov 0.0   ;;  %v14_v22 = vlaneseq  ;;  %s1446_s5 = smov 64   ;;  %s1447_s6 = smov 32   ;;  %vm159_vm11 = vcmask 254976   ;;  %vm26_vm12 = vcmask 261120   ;;  %s1862_s2 = inlined_call_operand.vmem [shape: f32[32,128], index: 2, kind: input, shape index: {}]   ;;  %s1863_s1 = inlined_call_operand.vmem [shape: f32[32,128], index: 1, kind: input, shape index: {}]   ;;  %s1864_s0 = inlined_call_operand.vmem [shape: f32[8,2,256], index: 0, kind: input, shape index: {}]   ;;  %s1865_s3 = inlined_call_operand.vmem [shape: f32[8,2,64], index: 3, kind: output, shape index: {}]  }
   0x1   :  { %v1471_v0 = vld [vmem:[%s1862_s2 + $0x18] sm:$0xff]  ;;  %v1476_v1 = vld [vmem:[%s1862_s2 + $0x10] sm:$0xff]  ;;  %v1493_v4 = vld [vmem:[%s1862_s2 + $0x8] sm:$0xff] }
   0x2   :  { %67 = vmatpush.msra.mxu1 %v1471_v0  ;;  %v1482_v2 = vld [vmem:[%s1863_s1 + $0x18] sm:$0xff]  ;;  %v1487_v3 = vld [vmem:[%s1863_s1 + $0x10] sm:$0xff]  ;;  %216 = vmatpush.msra.mxu3 %v1471_v0  ;;  %v1501_v5 = vld [vmem:[%s1863_s1 + $0x8] sm:$0xff]  ;;  %v15_v23 = vand.u32 127, %v14_v22 }
   0x3   :  { %42 = vmatpush.msra.mxu0 %v1482_v2  ;;  %189 = vmatpush.msra.mxu2 %v1482_v2  ;;  %v1507_v6 = vld [vmem:[%s1862_s2] sm:$0xff]  ;;  %v1270_v9 = vld [vmem:[%s1864_s0 + $0x1c] sm:$0xf] }
   0x4   :  { %68 = vmatpush.msra.mxu1 %v1476_v1  ;;  %217 = vmatpush.msra.mxu3 %v1476_v1  ;;  %v1515_v7 = vld [vmem:[%s1863_s1] sm:$0xff]  ;;  %v76_v10 = vrot.slane %v1270_v9, 2  ;;  %vm16_vm0 = vcmp.ge.s32.totalorder %v15_v23, 64  ;;  %vm17_vm1 = vcmp.lt.s32.totalorder %v15_v23, 96 }
   0x5   :  { %43 = vmatpush.msra.mxu0 %v1487_v3  ;;  %190 = vmatpush.msra.mxu2 %v1487_v3  ;;  %v19_v11 = vld [vmem:[%s1864_s0] sm:$0xf]  ;;  %vm1554_vm5 = vmand %vm16_vm0, %vm17_vm1 }
   0x6   :  { %69 = vmatpush.msra.mxu1 %v1493_v4  ;;  %218 = vmatpush.msra.mxu3 %v1493_v4 }
   0x7   :  { %44 = vmatpush.msra.mxu0 %v1501_v5  ;;  %191 = vmatpush.msra.mxu2 %v1501_v5 }
   0x8   :  { %70 = vmatpush.msra.mxu1 %v1507_v6  ;;  %219 = vmatpush.msra.mxu3 %v1507_v6 }
   0x9   :  { %71 = vmatmul.f32.vlgmr.msra.gmra.mxu1 %v1445_v8  ;;  %45 = vmatpush.msra.mxu0 %v1515_v7 }
   0xa   :  { %46 = vmatmul.f32.vlgmr.msra.gmra.mxu0 %v1445_v8  ;;  %192 = vmatpush.msra.mxu2 %v1515_v7 }
   0xb   :  { %365 = vmatpush.msrb.mxu1 %v1471_v0  ;;  %338 = vmatpush.msrb.mxu0 %v1482_v2 }
   0xc   :  { %514 = vmatpush.msrb.mxu3 %v1471_v0  ;;  %487 = vmatpush.msrb.mxu2 %v1482_v2 }
   0xd   :  { %366 = vmatpush.msrb.mxu1 %v1476_v1  ;;  %339 = vmatpush.msrb.mxu0 %v1487_v3 }
   0xe   :  { %515 = vmatpush.msrb.mxu3 %v1476_v1  ;;  %488 = vmatpush.msrb.mxu2 %v1487_v3 }
   0xf   :  { %367 = vmatpush.msrb.mxu1 %v1493_v4  ;;  %340 = vmatpush.msrb.mxu0 %v1501_v5 }
  0x10   :  { %516 = vmatpush.msrb.mxu3 %v1493_v4  ;;  %489 = vmatpush.msrb.mxu2 %v1501_v5 }
  0x11   :  { %368 = vmatpush.msrb.mxu1 %v1507_v6  ;;  %341 = vmatpush.msrb.mxu0 %v1515_v7 }
  0x12   :  { %517 = vmatpush.msrb.mxu3 %v1507_v6  ;;  %490 = vmatpush.msrb.mxu2 %v1515_v7 }
  0x13   :  { %661 = vmatpush.msra.mxu1 %v1471_v0  ;;  %634 = vmatpush.msra.mxu0 %v1482_v2 }
  0x15   :  { %662 = vmatpush.msra.mxu1 %v1476_v1  ;;  %635 = vmatpush.msra.mxu0 %v1487_v3 }
  0x17   :  { %663 = vmatpush.msra.mxu1 %v1493_v4  ;;  %636 = vmatpush.msra.mxu0 %v1501_v5 }
  0x19   :  { %664 = vmatpush.msra.mxu1 %v1507_v6  ;;  %637 = vmatpush.msra.mxu0 %v1515_v7 }
  0x86   :  { %v72_v12 = vpop.f32.mrf.mxu1 }
  0x87   :  { %v78_v13 = vadd.f32 %v76_v10, %v72_v12  ;;  %v47_v14 = vpop.f32.mrf.mxu0  ;;  %v1273_v12 = vld [vmem:[%s1864_s0 + $0x4] sm:$0xf] }
  0x88   :  { %v50_v15 = vadd.f32 %v47_v14, %v19_v11 }
  0x89   :  { %v1272_v16 = vmul.f32 -1.442695, %v78_v13 }
  0x8a   :  { %v1271_v17 = vmul.f32 -1.442695, %v50_v15 }
  0x8b   :  { %1317 = vpow2.f32 %v1272_v16 }
  0x8c   :  { %1319 = vpow2.f32 %v1271_v17 }
  0x91   :  { %v1318_v18 = vpop.eup %1317 }
  0x92   :  { %v1320_v19 = vpop.eup %1319  ;;  %v121_v20 = vadd.f32 1.0, %v1318_v18 }
  0x93   :  { %v83_v21 = vadd.f32 1.0, %v1320_v19 }
  0x94   :  { %1321 = vrcp.f32 %v121_v20  ;;  %v133_v29 = vand.u32 2147483648, %v121_v20  ;;  %v131_v32 = vand.u32 2147483647, %v121_v20  ;;  %vm127_vm6 = vweird.f32 %v121_v20 }
  0x95   :  { %1323 = vrcp.f32 %v83_v21  ;;  %vm89_vm3 = vweird.f32 %v83_v21  ;;  %v95_v35 = vand.u32 2147483648, %v83_v21  ;;  %v93_v37 = vand.u32 2147483647, %v83_v21 }
  0x96   :  { %1325 = vtanh.f32 %v78_v13  ;;  %v134_v38 = vor.u32 1.1754944e-38, %v133_v29  ;;  %vm132_vm9 = vcmp.eq.f32.partialorder %v131_v32, 8.507059e+37 }
  0x97   :  { %1327 = vtanh.f32 %v50_v15  ;;  %v96_v43 = vor.u32 1.1754944e-38, %v95_v35  ;;  %vm94_vm10 = vcmp.eq.f32.partialorder %v93_v37, 8.507059e+37 }
  0x9a   :  { %v1322_v24 = vpop.eup %1321 }
  0x9b   :  { %v1324_v25 = vpop.eup %1323  ;;  %v123_v26 = vmul.f32 %v1322_v24, %v121_v20  ;;  %vm128_vm2 = vweird.f32 %v1322_v24 }
  0x9c   :  { %v85_v27 = vmul.f32 %v1324_v25, %v83_v21  ;;  %vm90_vm4 = vweird.f32 %v1324_v25  ;;  %vm129_vm7 = vmor %vm127_vm6, %vm128_vm2  ;;  %v1326_v41 = vpop.eup %1325 }
  0x9d   :  { %v124_v28 = vsub.f32 1.0, %v123_v26  ;;  %vm91_vm8 = vmor %vm89_vm3, %vm90_vm4  ;;  %v1328_v46 = vpop.eup %1327 }
  0x9e   :  { %v86_v30 = vsub.f32 1.0, %v85_v27 }
  0x9f   :  { %v125_v31 = vmul.f32 %v1322_v24, %v124_v28 }
  0xa0   :  { %v87_v34 = vmul.f32 %v1324_v25, %v86_v30 }
  0xa1   :  { %v126_v36 = vadd.f32 %v1322_v24, %v125_v31 }
  0xa2   :  { %v88_v39 = vadd.f32 %v1324_v25, %v87_v34 }
  0xa3   :  { %v130_v40 = vsel %vm129_vm7, %v1322_v24, %v126_v36 }
  0xa4   :  { %v135_v42 = vsel %vm132_vm9, %v134_v38, %v130_v40  ;;  %v92_v45 = vsel %vm91_vm8, %v1324_v25, %v88_v39 }
  0xa5   :  { %v137_v44 = vsel %vm1554_vm5, %v1326_v41, %v135_v42  ;;  %v97_v47 = vsel %vm94_vm10, %v96_v43, %v92_v45 }
  0xa6   :  { %140 = vrot.lane.b32.xlu0 %v137_v44, %s1446_s5  ;;  %v99_v48 = vsel %vm1554_vm5, %v1328_v46, %v97_v47  ;;  %v138_v53 = vmul.f32 0.0, %v137_v44 }
  0xa7   :  { %v100_v56 = vmul.f32 0.0, %v99_v48 }
  0xae   :  { %102 = vrot.lane.b32.xlu0 %v99_v48, %s1446_s5 }
 0x118   :  { %v141_v49 = vpop.permute.xlu0 %140 }
 0x119   :  { %v143_v50 = vmul.f32 %v141_v49, %v137_v44 }
 0x11b   :  { %145 = vrot.lane.b32.xlu1 %v143_v50, %s1447_s6 }
 0x120   :  { %v103_v51 = vpop.permute.xlu0 %102 }
 0x121   :  { %v105_v52 = vmul.f32 %v103_v51, %v99_v48 }
 0x123   :  { %107 = vrot.lane.b32.xlu1 %v105_v52, %s1447_s6 }
 0x18d   :  { %v146_v54 = vpop.permute.xlu1 %145 }
 0x18e   :  { %v1566_v55 = vadd.f32 %v146_v54, %v138_v53 }
 0x190   :  { %1329 = vtanh.f32 %v1566_v55 }
 0x195   :  { %v108_v57 = vpop.permute.xlu1 %107 }
 0x196   :  { %v1330_v58 = vpop.eup %1329  ;;  %v1569_v59 = vadd.f32 %v108_v57, %v100_v56 }
 0x197   :  { %151 = vrot.lane.b32.xlu2 %v1330_v58, %s1446_s5 }
 0x198   :  { %1331 = vtanh.f32 %v1569_v59 }
 0x19e   :  { %v1332_v60 = vpop.eup %1331 }
 0x19f   :  { %113 = vrot.lane.b32.xlu2 %v1332_v60, %s1446_s5 }
 0x1f1   :  { %v152_v61 = vpop.permute.xlu2 %151 }
 0x1f2   :  { %v154_v62 = vmul.f32 %v152_v61, %v137_v44 }
 0x1f4   :  { %162 = vrot.lane.b32.xlu0 %v154_v62, %s1447_s6 }
 0x1f9   :  { %v114_v63 = vpop.permute.xlu2 %113 }
 0x1fa   :  { %v116_v8 = vmul.f32 %v114_v63, %v99_v48 }
 0x1fc   :  { %156 = vrot.lane.b32.xlu1 %v116_v8, %s1447_s6 }
 0x266   :  { %v163_v9 = vpop.permute.xlu0 %162 }
 0x267   :  { %166 = vst.msk [vmem:[#allocation3 + $0xe] sm:$0x3] %vm159_vm11, %v163_v9  ;;  %1276 = vmatmul.msk.f32.vlgmr.msra.gmra.mxu3 %vm26_vm12, %v163_v9 }
 0x268   :  { %808 = vmatpush.msra.mxu3 %v1471_v0  ;;  %v1274_v0 = vld [vmem:[%s1864_s0 + $0x18] sm:$0xf] }
 0x26a   :  { %809 = vmatpush.msra.mxu3 %v1476_v1  ;;  %v225_v1 = vrot.slane %v1274_v0, 2 }
 0x26c   :  { %810 = vmatpush.msra.mxu3 %v1493_v4 }
 0x26e   :  { %v157_v10 = vpop.permute.xlu1 %156  ;;  %811 = vmatpush.msra.mxu3 %v1507_v6 }
 0x26f   :  { %160 = vst.msk [vmem:[#allocation2] sm:$0x3] %vm159_vm11, %v157_v10  ;;  %1275 = vmatmul.msk.f32.vlgmr.msra.gmra.mxu2 %vm26_vm12, %v157_v10 }
 0x270   :  { %781 = vmatpush.msra.mxu2 %v1482_v2 }
 0x272   :  { %782 = vmatpush.msra.mxu2 %v1487_v3 }
 0x274   :  { %783 = vmatpush.msra.mxu2 %v1501_v5 }
 0x276   :  { %784 = vmatpush.msra.mxu2 %v1515_v7 }
 0x2ea   :  { %v221_v4 = vpop.f32.mrf.mxu3 }
 0x2eb   :  { %v227_v11 = vadd.f32 %v225_v1, %v221_v4 }
 0x2ed   :  { %v1278_v6 = vmul.f32 -1.442695, %v227_v11 }
 0x2ef   :  { %1333 = vpow2.f32 %v1278_v6 }
 0x2f2   :  { %v194_v2 = vpop.f32.mrf.mxu2 }
 0x2f3   :  { %v197_v13 = vadd.f32 %v1273_v12, %v194_v2 }
 0x2f5   :  { %v1334_v3 = vpop.eup %1333  ;;  %v1277_v14 = vmul.f32 -1.442695, %v197_v13 }
 0x2f6   :  { %v270_v5 = vadd.f32 1.0, %v1334_v3 }
 0x2f7   :  { %1335 = vpow2.f32 %v1277_v14  ;;  %v1279_v14 = vld [vmem:[%s1864_s0 + $0x8] sm:$0xf] }
 0x2f8   :  { %1337 = vrcp.f32 %v270_v5  ;;  %v282_v19 = vand.u32 2147483648, %v270_v5  ;;  %v280_v21 = vand.u32 2147483647, %v270_v5  ;;  %vm276_vm14 = vweird.f32 %v270_v5 }
 0x2fa   :  { %v283_v24 = vor.u32 1.1754944e-38, %v282_v19  ;;  %vm281_vm0 = vcmp.eq.f32.partialorder %v280_v21, 8.507059e+37 }
 0x2fd   :  { %v1336_v7 = vpop.eup %1335 }
 0x2fe   :  { %v1338_v15 = vpop.eup %1337  ;;  %v232_v16 = vadd.f32 1.0, %v1336_v7 }
 0x2ff   :  { %v272_v17 = vmul.f32 %v1338_v15, %v270_v5  ;;  %vm277_vm13 = vweird.f32 %v1338_v15 }
 0x300   :  { %1339 = vrcp.f32 %v232_v16  ;;  %vm278_vm15 = vmor %vm276_vm14, %vm277_vm13  ;;  %v244_v31 = vand.u32 2147483648, %v232_v16  ;;  %v242_v34 = vand.u32 2147483647, %v232_v16  ;;  %vm238_vm2 = vweird.f32 %v232_v16 }
 0x301   :  { %v273_v18 = vsub.f32 1.0, %v272_v17  ;;  %1341 = vtanh.f32 %v227_v11 }
 0x302   :  { %1343 = vtanh.f32 %v197_v13  ;;  %v245_v36 = vor.u32 1.1754944e-38, %v244_v31  ;;  %vm243_vm4 = vcmp.eq.f32.partialorder %v242_v34, 8.507059e+37 }
 0x303   :  { %v274_v20 = vmul.f32 %v1338_v15, %v273_v18 }
 0x305   :  { %v275_v22 = vadd.f32 %v1338_v15, %v274_v20 }
 0x306   :  { %v1340_v23 = vpop.eup %1339 }
 0x307   :  { %v279_v25 = vsel %vm278_vm15, %v1338_v15, %v275_v22  ;;  %v234_v26 = vmul.f32 %v1340_v23, %v232_v16  ;;  %v1342_v27 = vpop.eup %1341  ;;  %vm239_vm1 = vweird.f32 %v1340_v23 }
 0x308   :  { %v284_v28 = vsel %vm281_vm0, %v283_v24, %v279_v25  ;;  %vm240_vm3 = vmor %vm238_vm2, %vm239_vm1  ;;  %v1344_v38 = vpop.eup %1343 }
 0x309   :  { %v286_v29 = vsel %vm1554_vm5, %v1342_v27, %v284_v28  ;;  %v235_v30 = vsub.f32 1.0, %v234_v26 }
 0x30a   :  { %289 = vrot.lane.b32.xlu2 %v286_v29, %s1446_s5  ;;  %v287_v45 = vmul.f32 %v286_v29, %v1566_v55 }
 0x30b   :  { %v236_v32 = vmul.f32 %v1340_v23, %v235_v30 }
 0x30d   :  { %v237_v35 = vadd.f32 %v1340_v23, %v236_v32 }
 0x30f   :  { %v241_v37 = vsel %vm240_vm3, %v1340_v23, %v237_v35 }
 0x310   :  { %v246_v39 = vsel %vm243_vm4, %v245_v36, %v241_v37 }
 0x311   :  { %v248_v40 = vsel %vm1554_vm5, %v1344_v38, %v246_v39 }
 0x312   :  { %251 = vrot.lane.b32.xlu0 %v248_v40, %s1446_s5  ;;  %v249_v48 = vmul.f32 %v248_v40, %v1569_v59  ;;  %v1280_v59 = vld [vmem:[%s1864_s0 + $0x14] sm:$0xf] }
 0x313   :  { %v374_v60 = vrot.slane %v1280_v59, 2 }
 0x364   :  { %v290_v41 = vpop.permute.xlu2 %289 }
 0x365   :  { %v292_v42 = vmul.f32 %v290_v41, %v286_v29 }
 0x367   :  { %294 = vrot.lane.b32.xlu1 %v292_v42, %s1447_s6 }
 0x384   :  { %v252_v43 = vpop.permute.xlu0 %251 }
 0x385   :  { %v254_v44 = vmul.f32 %v252_v43, %v248_v40 }
 0x387   :  { %256 = vrot.lane.b32.xlu2 %v254_v44, %s1447_s6 }
 0x3d9   :  { %v295_v46 = vpop.permute.xlu1 %294 }
 0x3da   :  { %v1603_v47 = vadd.f32 %v295_v46, %v287_v45 }
 0x3dc   :  { %1345 = vtanh.f32 %v1603_v47 }
 0x3e1   :  { %v257_v49 = vpop.permute.xlu2 %256 }
 0x3e2   :  { %v1346_v50 = vpop.eup %1345  ;;  %v1607_v51 = vadd.f32 %v257_v49, %v249_v48 }
 0x3e3   :  { %300 = vrot.lane.b32.xlu0 %v1346_v50, %s1446_s5 }
 0x3e4   :  { %1347 = vtanh.f32 %v1607_v51 }
 0x3ea   :  { %v1348_v52 = vpop.eup %1347 }
 0x3eb   :  { %262 = vrot.lane.b32.xlu1 %v1348_v52, %s1446_s5 }
 0x455   :  { %v301_v53 = vpop.permute.xlu0 %300 }
 0x456   :  { %v303_v54 = vmul.f32 %v301_v53, %v286_v29 }
 0x458   :  { %311 = vrot.lane.b32.xlu2 %v303_v54, %s1447_s6 }
 0x45d   :  { %v263_v55 = vpop.permute.xlu1 %262 }
 0x45e   :  { %v265_v56 = vmul.f32 %v263_v55, %v248_v40 }
 0x460   :  { %305 = vrot.lane.b32.xlu0 %v265_v56, %s1447_s6  ;;  %v1285_v56 = vld [vmem:[%s1864_s0 + $0xc] sm:$0xf] }
 0x4b2   :  { %v312_v57 = vpop.permute.xlu2 %311 }
 0x4b3   :  { %315 = vst.msk [vmem:[#allocation3 + $0xc] sm:$0x3] %vm159_vm11, %v312_v57  ;;  %1282 = vmatmul.msk.f32.vlgmr.msrb.gmra.mxu1 %vm26_vm12, %v312_v57 }
 0x4d2   :  { %v306_v58 = vpop.permute.xlu0 %305 }
 0x4d3   :  { %309 = vst.msk [vmem:[#allocation2 + $0x2] sm:$0x3] %vm159_vm11, %v306_v58  ;;  %1281 = vmatmul.msk.f32.vlgmr.msrb.gmra.mxu0 %vm26_vm12, %v306_v58 }
 0x530   :  { %v370_v61 = vpop.f32.mrf.mxu1 }
 0x531   :  { %v376_v62 = vadd.f32 %v374_v60, %v370_v61 }
 0x533   :  { %v1284_v63 = vmul.f32 -1.442695, %v376_v62 }
 0x535   :  { %1349 = vpow2.f32 %v1284_v63 }
 0x53b   :  { %v1350_v8 = vpop.eup %1349 }
 0x53c   :  { %v419_v9 = vadd.f32 1.0, %v1350_v8 }
 0x53e   :  { %1351 = vrcp.f32 %v419_v9  ;;  %v431_v4 = vand.u32 2147483648, %v419_v9  ;;  %v429_v6 = vand.u32 2147483647, %v419_v9  ;;  %vm425_vm7 = vweird.f32 %v419_v9 }
 0x53f   :  { %1353 = vtanh.f32 %v376_v62 }
 0x540   :  { %v432_v2 = vor.u32 1.1754944e-38, %v431_v4  ;;  %vm430_vm9 = vcmp.eq.f32.partialorder %v429_v6, 8.507059e+37 }
 0x544   :  { %v1352_v10 = vpop.eup %1351 }
 0x545   :  { %v421_v0 = vmul.f32 %v1352_v10, %v419_v9  ;;  %vm426_vm6 = vweird.f32 %v1352_v10  ;;  %v1354_v3 = vpop.eup %1353 }
 0x546   :  { %vm427_vm8 = vmor %vm425_vm7, %vm426_vm6 }
 0x547   :  { %v422_v1 = vsub.f32 1.0, %v421_v0 }
 0x549   :  { %v423_v11 = vmul.f32 %v1352_v10, %v422_v1 }
 0x54b   :  { %v424_v12 = vadd.f32 %v1352_v10, %v423_v11 }
 0x54d   :  { %v428_v13 = vsel %vm427_vm8, %v1352_v10, %v424_v12 }
 0x54e   :  { %v433_v5 = vsel %vm430_vm9, %v432_v2, %v428_v13 }
 0x54f   :  { %v435_v7 = vsel %vm1554_vm5, %v1354_v3, %v433_v5 }
 0x550   :  { %v343_v15 = vpop.f32.mrf.mxu0  ;;  %438 = vrot.lane.b32.xlu1 %v435_v7, %s1446_s5  ;;  %v436_v37 = vmul.f32 %v435_v7, %v1603_v47 }
 0x551   :  { %v346_v16 = vadd.f32 %v1279_v14, %v343_v15 }
 0x553   :  { %v1283_v17 = vmul.f32 -1.442695, %v346_v16 }
 0x555   :  { %1355 = vpow2.f32 %v1283_v17 }
 0x55b   :  { %v1356_v18 = vpop.eup %1355 }
 0x55c   :  { %v381_v19 = vadd.f32 1.0, %v1356_v18 }
 0x55e   :  { %1357 = vrcp.f32 %v381_v19  ;;  %v393_v23 = vand.u32 2147483648, %v381_v19  ;;  %v391_v25 = vand.u32 2147483647, %v381_v19  ;;  %vm387_vm13 = vweird.f32 %v381_v19 }
 0x55f   :  { %1359 = vtanh.f32 %v346_v16 }
 0x560   :  { %v394_v27 = vor.u32 1.1754944e-38, %v393_v23  ;;  %vm392_vm15 = vcmp.eq.f32.partialorder %v391_v25, 8.507059e+37 }
 0x564   :  { %v1358_v20 = vpop.eup %1357 }
 0x565   :  { %v383_v21 = vmul.f32 %v1358_v20, %v381_v19  ;;  %vm388_vm10 = vweird.f32 %v1358_v20  ;;  %v1360_v29 = vpop.eup %1359 }
 0x566   :  { %vm389_vm14 = vmor %vm387_vm13, %vm388_vm10 }
 0x567   :  { %v384_v22 = vsub.f32 1.0, %v383_v21 }
 0x569   :  { %v385_v24 = vmul.f32 %v1358_v20, %v384_v22 }
 0x56b   :  { %v386_v26 = vadd.f32 %v1358_v20, %v385_v24 }
 0x56d   :  { %v390_v28 = vsel %vm389_vm14, %v1358_v20, %v386_v26 }
 0x56e   :  { %v395_v30 = vsel %vm392_vm15, %v394_v27, %v390_v28 }
 0x56f   :  { %v397_v31 = vsel %vm1554_vm5, %v1360_v29, %v395_v30 }
 0x570   :  { %400 = vrot.lane.b32.xlu2 %v397_v31, %s1446_s5  ;;  %v398_v40 = vmul.f32 %v397_v31, %v1607_v51  ;;  %v1286_v51 = vld [vmem:[%s1864_s0 + $0x10] sm:$0xf] }
 0x571   :  { %v523_v52 = vrot.slane %v1286_v51, 2 }
 0x5c2   :  { %v439_v32 = vpop.permute.xlu1 %438 }
 0x5c3   :  { %v441_v34 = vmul.f32 %v439_v32, %v435_v7 }
 0x5c5   :  { %443 = vrot.lane.b32.xlu0 %v441_v34, %s1447_s6 }
 0x5ca   :  { %v401_v35 = vpop.permute.xlu2 %400 }
 0x5cb   :  { %v403_v36 = vmul.f32 %v401_v35, %v397_v31 }
 0x5cd   :  { %405 = vrot.lane.b32.xlu1 %v403_v36, %s1447_s6 }
 0x637   :  { %v444_v38 = vpop.permute.xlu0 %443 }
 0x638   :  { %v1633_v39 = vadd.f32 %v444_v38, %v436_v37 }
 0x63a   :  { %1361 = vtanh.f32 %v1633_v39 }
 0x63f   :  { %v406_v41 = vpop.permute.xlu1 %405 }
 0x640   :  { %v1362_v42 = vpop.eup %1361  ;;  %v1637_v43 = vadd.f32 %v406_v41, %v398_v40 }
 0x641   :  { %449 = vrot.lane.b32.xlu2 %v1362_v42, %s1446_s5 }
 0x642   :  { %1363 = vtanh.f32 %v1637_v43 }
 0x648   :  { %v1364_v44 = vpop.eup %1363 }
 0x649   :  { %411 = vrot.lane.b32.xlu0 %v1364_v44, %s1446_s5 }
 0x69b   :  { %v450_v45 = vpop.permute.xlu2 %449 }
 0x69c   :  { %v452_v46 = vmul.f32 %v450_v45, %v435_v7 }
 0x69e   :  { %460 = vrot.lane.b32.xlu1 %v452_v46, %s1447_s6 }
 0x6bb   :  { %v412_v47 = vpop.permute.xlu0 %411 }
 0x6bc   :  { %v414_v48 = vmul.f32 %v412_v47, %v397_v31 }
 0x6be   :  { %454 = vrot.lane.b32.xlu2 %v414_v48, %s1447_s6  ;;  %v1291_v48 = vld [vmem:[%s1864_s0 + $0x10] sm:$0xf] }
 0x710   :  { %v461_v49 = vpop.permute.xlu1 %460 }
 0x711   :  { %464 = vst.msk [vmem:[#allocation3 + $0xa] sm:$0x3] %vm159_vm11, %v461_v49  ;;  %1288 = vmatmul.msk.f32.vlgmr.msrb.gmra.mxu3 %vm26_vm12, %v461_v49 }
 0x718   :  { %v455_v50 = vpop.permute.xlu2 %454 }
 0x719   :  { %458 = vst.msk [vmem:[#allocation2 + $0x4] sm:$0x3] %vm159_vm11, %v455_v50  ;;  %1287 = vmatmul.msk.f32.vlgmr.msrb.gmra.mxu2 %vm26_vm12, %v455_v50 }
 0x794   :  { %v519_v53 = vpop.f32.mrf.mxu3 }
 0x795   :  { %v525_v54 = vadd.f32 %v523_v52, %v519_v53 }
 0x797   :  { %v1290_v55 = vmul.f32 -1.442695, %v525_v54 }
 0x799   :  { %1365 = vpow2.f32 %v1290_v55 }
 0x79c   :  { %v492_v57 = vpop.f32.mrf.mxu2 }
 0x79d   :  { %v495_v58 = vadd.f32 %v1285_v56, %v492_v57 }
 0x79f   :  { %v1366_v59 = vpop.eup %1365  ;;  %v1289_v60 = vmul.f32 -1.442695, %v495_v58 }
 0x7a0   :  { %v568_v61 = vadd.f32 1.0, %v1366_v59 }
 0x7a1   :  { %1367 = vpow2.f32 %v1289_v60 }
 0x7a2   :  { %1369 = vrcp.f32 %v568_v61  ;;  %v580_v0 = vand.u32 2147483648, %v568_v61  ;;  %v578_v4 = vand.u32 2147483647, %v568_v61  ;;  %vm574_vm1 = vweird.f32 %v568_v61 }
 0x7a4   :  { %v581_v12 = vor.u32 1.1754944e-38, %v580_v0  ;;  %vm579_vm3 = vcmp.eq.f32.partialorder %v578_v4, 8.507059e+37 }
 0x7a7   :  { %v1368_v62 = vpop.eup %1367 }
 0x7a8   :  { %v1370_v63 = vpop.eup %1369  ;;  %v530_v8 = vadd.f32 1.0, %v1368_v62 }
 0x7a9   :  { %v570_v9 = vmul.f32 %v1370_v63, %v568_v61  ;;  %vm575_vm0 = vweird.f32 %v1370_v63 }
 0x7aa   :  { %1371 = vrcp.f32 %v530_v8  ;;  %vm576_vm2 = vmor %vm574_vm1, %vm575_vm0  ;;  %v542_v15 = vand.u32 2147483648, %v530_v8  ;;  %v540_v17 = vand.u32 2147483647, %v530_v8  ;;  %vm536_vm6 = vweird.f32 %v530_v8 }
 0x7ab   :  { %v571_v10 = vsub.f32 1.0, %v570_v9  ;;  %1373 = vtanh.f32 %v525_v54 }
 0x7ac   :  { %1375 = vtanh.f32 %v495_v58  ;;  %v543_v19 = vor.u32 1.1754944e-38, %v542_v15  ;;  %vm541_vm8 = vcmp.eq.f32.partialorder %v540_v17, 8.507059e+37 }
 0x7ad   :  { %v572_v1 = vmul.f32 %v1370_v63, %v571_v10 }
 0x7af   :  { %v573_v11 = vadd.f32 %v1370_v63, %v572_v1 }
 0x7b0   :  { %v1372_v6 = vpop.eup %1371 }
 0x7b1   :  { %v577_v2 = vsel %vm576_vm2, %v1370_v63, %v573_v11  ;;  %v532_v13 = vmul.f32 %v1372_v6, %v530_v8  ;;  %v1374_v3 = vpop.eup %1373  ;;  %vm537_vm4 = vweird.f32 %v1372_v6 }
 0x7b2   :  { %v582_v14 = vsel %vm579_vm3, %v581_v12, %v577_v2  ;;  %vm538_vm7 = vmor %vm536_vm6, %vm537_vm4  ;;  %v1376_v21 = vpop.eup %1375 }
 0x7b3   :  { %v584_v5 = vsel %vm1554_vm5, %v1374_v3, %v582_v14  ;;  %v533_v7 = vsub.f32 1.0, %v532_v13 }
 0x7b4   :  { %587 = vrot.lane.b32.xlu0 %v584_v5, %s1446_s5  ;;  %v585_v28 = vmul.f32 %v584_v5, %v1633_v39 }
 0x7b5   :  { %v534_v16 = vmul.f32 %v1372_v6, %v533_v7 }
 0x7b7   :  { %v535_v18 = vadd.f32 %v1372_v6, %v534_v16 }
 0x7b9   :  { %v539_v20 = vsel %vm538_vm7, %v1372_v6, %v535_v18 }
 0x7ba   :  { %v544_v22 = vsel %vm541_vm8, %v543_v19, %v539_v20 }
 0x7bb   :  { %v546_v23 = vsel %vm1554_vm5, %v1376_v21, %v544_v22 }
 0x7bc   :  { %549 = vrot.lane.b32.xlu1 %v546_v23, %s1446_s5  ;;  %v547_v32 = vmul.f32 %v546_v23, %v1637_v43  ;;  %v1292_v43 = vld [vmem:[%s1864_s0 + $0xc] sm:$0xf] }
 0x7bd   :  { %v670_v44 = vrot.slane %v1292_v43, 2 }
 0x826   :  { %v588_v24 = vpop.permute.xlu0 %587 }
 0x827   :  { %v590_v25 = vmul.f32 %v588_v24, %v584_v5 }
 0x829   :  { %592 = vrot.lane.b32.xlu2 %v590_v25, %s1447_s6 }
 0x82e   :  { %v550_v26 = vpop.permute.xlu1 %549 }
 0x82f   :  { %v552_v27 = vmul.f32 %v550_v26, %v546_v23 }
 0x831   :  { %554 = vrot.lane.b32.xlu0 %v552_v27, %s1447_s6 }
 0x883   :  { %v593_v29 = vpop.permute.xlu2 %592 }
 0x884   :  { %v1663_v30 = vadd.f32 %v593_v29, %v585_v28 }
 0x886   :  { %1377 = vtanh.f32 %v1663_v30 }
 0x88c   :  { %v1378_v31 = vpop.eup %1377 }
 0x88d   :  { %598 = vrot.lane.b32.xlu1 %v1378_v31, %s1446_s5 }
 0x8a3   :  { %v555_v34 = vpop.permute.xlu0 %554 }
 0x8a4   :  { %v1668_v35 = vadd.f32 %v555_v34, %v547_v32 }
 0x8a6   :  { %1379 = vtanh.f32 %v1668_v35 }
 0x8ac   :  { %v1380_v36 = vpop.eup %1379 }
 0x8ad   :  { %560 = vrot.lane.b32.xlu2 %v1380_v36, %s1446_s5 }
 0x8ff   :  { %v599_v37 = vpop.permute.xlu1 %598 }
 0x900   :  { %v601_v38 = vmul.f32 %v599_v37, %v584_v5 }
 0x902   :  { %609 = vrot.lane.b32.xlu0 %v601_v38, %s1447_s6 }
 0x907   :  { %v561_v39 = vpop.permute.xlu2 %560 }
 0x908   :  { %v563_v40 = vmul.f32 %v561_v39, %v546_v23 }
 0x90a   :  { %603 = vrot.lane.b32.xlu1 %v563_v40, %s1447_s6 }
 0x974   :  { %v610_v41 = vpop.permute.xlu0 %609 }
 0x975   :  { %613 = vst.msk [vmem:[#allocation3 + $0x8] sm:$0x3] %vm159_vm11, %v610_v41  ;;  %1294 = vmatmul.msk.f32.vlgmr.msra.gmra.mxu1 %vm26_vm12, %v610_v41 }
 0x97c   :  { %v604_v42 = vpop.permute.xlu1 %603 }
 0x97d   :  { %607 = vst.msk [vmem:[#allocation2 + $0x6] sm:$0x3] %vm159_vm11, %v604_v42  ;;  %1293 = vmatmul.msk.f32.vlgmr.msra.gmra.mxu0 %vm26_vm12, %v604_v42 }
 0x9f2   :  { %v666_v45 = vpop.f32.mrf.mxu1 }
 0x9f3   :  { %v672_v46 = vadd.f32 %v670_v44, %v666_v45 }
 0x9f5   :  { %v1296_v47 = vmul.f32 -1.442695, %v672_v46 }
 0x9f7   :  { %1381 = vpow2.f32 %v1296_v47 }
 0x9fa   :  { %v639_v49 = vpop.f32.mrf.mxu0 }
 0x9fb   :  { %v642_v50 = vadd.f32 %v1291_v48, %v639_v49 }
 0x9fd   :  { %v1382_v51 = vpop.eup %1381  ;;  %v1295_v52 = vmul.f32 -1.442695, %v642_v50 }
 0x9fe   :  { %v715_v53 = vadd.f32 1.0, %v1382_v51 }
 0x9ff   :  { %1383 = vpow2.f32 %v1295_v52  ;;  %v1297_v52 = vld [vmem:[%s1864_s0 + $0x14] sm:$0xf] }
 0xa00   :  { %1385 = vrcp.f32 %v715_v53  ;;  %v727_v59 = vand.u32 2147483648, %v715_v53  ;;  %v725_v61 = vand.u32 2147483647, %v715_v53  ;;  %vm721_vm10 = vweird.f32 %v715_v53 }
 0xa02   :  { %v728_v8 = vor.u32 1.1754944e-38, %v727_v59  ;;  %vm726_vm14 = vcmp.eq.f32.partialorder %v725_v61, 8.507059e+37 }
 0xa05   :  { %v1384_v54 = vpop.eup %1383 }
 0xa06   :  { %v1386_v55 = vpop.eup %1385  ;;  %v677_v56 = vadd.f32 1.0, %v1384_v54 }
 0xa07   :  { %v717_v57 = vmul.f32 %v1386_v55, %v715_v53  ;;  %vm722_vm9 = vweird.f32 %v1386_v55 }
 0xa08   :  { %1387 = vrcp.f32 %v677_v56  ;;  %vm723_vm13 = vmor %vm721_vm10, %vm722_vm9  ;;  %v689_v6 = vand.u32 2147483648, %v677_v56  ;;  %v687_v2 = vand.u32 2147483647, %v677_v56  ;;  %vm683_vm0 = vweird.f32 %v677_v56 }
 0xa09   :  { %v718_v58 = vsub.f32 1.0, %v717_v57  ;;  %1389 = vtanh.f32 %v672_v46 }
 0xa0a   :  { %1391 = vtanh.f32 %v642_v50  ;;  %v690_v3 = vor.u32 1.1754944e-38, %v689_v6  ;;  %vm688_vm2 = vcmp.eq.f32.partialorder %v687_v2, 8.507059e+37 }
 0xa0b   :  { %v719_v60 = vmul.f32 %v1386_v55, %v718_v58 }
 0xa0d   :  { %v720_v62 = vadd.f32 %v1386_v55, %v719_v60 }
 0xa0e   :  { %v1388_v63 = vpop.eup %1387 }
 0xa0f   :  { %v724_v9 = vsel %vm723_vm13, %v1386_v55, %v720_v62  ;;  %v679_v10 = vmul.f32 %v1388_v63, %v677_v56  ;;  %v1390_v0 = vpop.eup %1389  ;;  %vm684_vm15 = vweird.f32 %v1388_v63 }
 0xa10   :  { %v729_v1 = vsel %vm726_vm14, %v728_v8, %v724_v9  ;;  %vm685_vm1 = vmor %vm683_vm0, %vm684_vm15  ;;  %v1392_v5 = vpop.eup %1391 }
 0xa11   :  { %v731_v4 = vsel %vm1554_vm5, %v1390_v0, %v729_v1  ;;  %v680_v11 = vsub.f32 1.0, %v679_v10 }
 0xa12   :  { %734 = vrot.lane.b32.xlu2 %v731_v4, %s1446_s5  ;;  %v732_v20 = vmul.f32 %v731_v4, %v1663_v30 }
 0xa13   :  { %v681_v12 = vmul.f32 %v1388_v63, %v680_v11 }
 0xa15   :  { %v682_v13 = vadd.f32 %v1388_v63, %v681_v12 }
 0xa17   :  { %v686_v14 = vsel %vm685_vm1, %v1388_v63, %v682_v13 }
 0xa18   :  { %v691_v7 = vsel %vm688_vm2, %v690_v3, %v686_v14 }
 0xa19   :  { %v693_v15 = vsel %vm1554_vm5, %v1392_v5, %v691_v7 }
 0xa1a   :  { %696 = vrot.lane.b32.xlu0 %v693_v15, %s1446_s5  ;;  %v694_v23 = vmul.f32 %v693_v15, %v1668_v35  ;;  %v1298_v35 = vld [vmem:[%s1864_s0 + $0x8] sm:$0xf] }
 0xa1b   :  { %v817_v36 = vrot.slane %v1298_v35, 2  ;;  %v1304_v35 = vld [vmem:[%s1864_s0 + $0x4] sm:$0xf] }
 0xa6c   :  { %v735_v16 = vpop.permute.xlu2 %734 }
 0xa6d   :  { %v737_v17 = vmul.f32 %v735_v16, %v731_v4 }
 0xa6f   :  { %739 = vrot.lane.b32.xlu1 %v737_v17, %s1447_s6 }
 0xa8c   :  { %v697_v18 = vpop.permute.xlu0 %696 }
 0xa8d   :  { %v699_v19 = vmul.f32 %v697_v18, %v693_v15 }
 0xa8f   :  { %701 = vrot.lane.b32.xlu2 %v699_v19, %s1447_s6 }
 0xae1   :  { %v740_v21 = vpop.permute.xlu1 %739 }
 0xae2   :  { %v1693_v22 = vadd.f32 %v740_v21, %v732_v20 }
 0xae4   :  { %1393 = vtanh.f32 %v1693_v22 }
 0xae9   :  { %v702_v24 = vpop.permute.xlu2 %701 }
 0xaea   :  { %v1394_v25 = vpop.eup %1393  ;;  %v1697_v26 = vadd.f32 %v702_v24, %v694_v23  ;;  %v939_v23 = vld [vmem:[%s1862_s2 + $0x10] sm:$0xff]  ;;  %v938_v24 = vld [vmem:[%s1862_s2 + $0x8] sm:$0xff] }
 0xaeb   :  { %745 = vrot.lane.b32.xlu0 %v1394_v25, %s1446_s5  ;;  %v937_v25 = vld [vmem:[%s1862_s2] sm:$0xff] }
 0xaec   :  { %1395 = vtanh.f32 %v1697_v26 }
 0xaf2   :  { %v1396_v27 = vpop.eup %1395 }
 0xaf3   :  { %707 = vrot.lane.b32.xlu1 %v1396_v27, %s1446_s5 }
 0xb5d   :  { %v746_v28 = vpop.permute.xlu0 %745 }
 0xb5e   :  { %v748_v29 = vmul.f32 %v746_v28, %v731_v4  ;;  %v913_v28 = vld [vmem:[%s1863_s1 + $0x18] sm:$0xff] }
 0xb5f   :  { %928 = vmatpush.msrb.mxu0 %v913_v28  ;;  %1075 = vmatpush.msrb.mxu2 %v913_v28 }
 0xb60   :  { %756 = vrot.lane.b32.xlu2 %v748_v29, %s1447_s6  ;;  %v912_v29 = vld [vmem:[%s1863_s1 + $0x10] sm:$0xff] }
 0xb61   :  { %929 = vmatpush.msrb.mxu0 %v912_v29  ;;  %1076 = vmatpush.msrb.mxu2 %v912_v29 }
 0xb65   :  { %v708_v30 = vpop.permute.xlu1 %707 }
 0xb66   :  { %v710_v31 = vmul.f32 %v708_v30, %v693_v15  ;;  %v911_v30 = vld [vmem:[%s1863_s1 + $0x8] sm:$0xff] }
 0xb67   :  { %930 = vmatpush.msrb.mxu0 %v911_v30  ;;  %1077 = vmatpush.msrb.mxu2 %v911_v30 }
 0xb68   :  { %750 = vrot.lane.b32.xlu0 %v710_v31, %s1447_s6  ;;  %v910_v31 = vld [vmem:[%s1863_s1] sm:$0xff] }
 0xb69   :  { %931 = vmatpush.msrb.mxu0 %v910_v31  ;;  %1078 = vmatpush.msrb.mxu2 %v910_v31  ;;  %v1309_v31 = vld [vmem:[%s1864_s0 + $0x1c] sm:$0xf] }
 0xbba   :  { %v757_v32 = vpop.permute.xlu2 %756 }
 0xbbb   :  { %760 = vst.msk [vmem:[#allocation3 + $0x6] sm:$0x3] %vm159_vm11, %v757_v32  ;;  %1300 = vmatmul.msk.f32.vlgmr.msra.gmra.mxu3 %vm26_vm12, %v757_v32 }
 0xbda   :  { %v751_v34 = vpop.permute.xlu0 %750 }
 0xbdb   :  { %754 = vst.msk [vmem:[#allocation2 + $0x8] sm:$0x3] %vm159_vm11, %v751_v34  ;;  %1299 = vmatmul.msk.f32.vlgmr.msra.gmra.mxu2 %vm26_vm12, %v751_v34 }
 0xc3e   :  { %v813_v37 = vpop.f32.mrf.mxu3 }
 0xc3f   :  { %v819_v38 = vadd.f32 %v817_v36, %v813_v37  ;;  %v964_v36 = vrot.slane %v1304_v35, 2 }
 0xc41   :  { %v1302_v39 = vmul.f32 -1.442695, %v819_v38 }
 0xc43   :  { %1397 = vpow2.f32 %v1302_v39 }
 0xc49   :  { %v1398_v40 = vpop.eup %1397 }
 0xc4a   :  { %v862_v41 = vadd.f32 1.0, %v1398_v40  ;;  %v1303_v40 = vld [vmem:[%s1864_s0 + $0x18] sm:$0xf] }
 0xc4c   :  { %1399 = vrcp.f32 %v862_v41  ;;  %v874_v45 = vand.u32 2147483648, %v862_v41  ;;  %v872_v47 = vand.u32 2147483647, %v862_v41  ;;  %vm868_vm4 = vweird.f32 %v862_v41 }
 0xc4d   :  { %1401 = vtanh.f32 %v819_v38 }
 0xc4e   :  { %v875_v49 = vor.u32 1.1754944e-38, %v874_v45  ;;  %vm873_vm7 = vcmp.eq.f32.partialorder %v872_v47, 8.507059e+37 }
 0xc52   :  { %v1400_v42 = vpop.eup %1399 }
 0xc53   :  { %v864_v43 = vmul.f32 %v1400_v42, %v862_v41  ;;  %vm869_vm3 = vweird.f32 %v1400_v42  ;;  %v1402_v51 = vpop.eup %1401 }
 0xc54   :  { %vm870_vm6 = vmor %vm868_vm4, %vm869_vm3 }
 0xc55   :  { %v865_v44 = vsub.f32 1.0, %v864_v43 }
 0xc57   :  { %v866_v46 = vmul.f32 %v1400_v42, %v865_v44 }
 0xc59   :  { %v867_v48 = vadd.f32 %v1400_v42, %v866_v46 }
 0xc5b   :  { %v871_v50 = vsel %vm870_vm6, %v1400_v42, %v867_v48 }
 0xc5c   :  { %v876_v53 = vsel %vm873_vm7, %v875_v49, %v871_v50 }
 0xc5d   :  { %v878_v54 = vsel %vm1554_vm5, %v1402_v51, %v876_v53 }
 0xc5e   :  { %v786_v55 = vpop.f32.mrf.mxu2  ;;  %881 = vrot.lane.b32.xlu1 %v878_v54, %s1446_s5  ;;  %v879_v14 = vmul.f32 %v878_v54, %v1693_v22  ;;  %v940_v22 = vld [vmem:[%s1862_s2 + $0x18] sm:$0xff] }
 0xc5f   :  { %v789_v56 = vadd.f32 %v1297_v52, %v786_v55  ;;  %955 = vmatpush.msrb.mxu1 %v940_v22  ;;  %1102 = vmatpush.msrb.mxu3 %v940_v22 }
 0xc61   :  { %v1301_v57 = vmul.f32 -1.442695, %v789_v56  ;;  %956 = vmatpush.msrb.mxu1 %v939_v23  ;;  %1103 = vmatpush.msrb.mxu3 %v939_v23 }
 0xc63   :  { %1403 = vpow2.f32 %v1301_v57  ;;  %957 = vmatpush.msrb.mxu1 %v938_v24  ;;  %1104 = vmatpush.msrb.mxu3 %v938_v24 }
 0xc65   :  { %958 = vmatpush.msrb.mxu1 %v937_v25  ;;  %1105 = vmatpush.msrb.mxu3 %v937_v25 }
 0xc69   :  { %v1404_v58 = vpop.eup %1403 }
 0xc6a   :  { %v824_v59 = vadd.f32 1.0, %v1404_v58 }
 0xc6c   :  { %1405 = vrcp.f32 %v824_v59  ;;  %v836_v63 = vand.u32 2147483648, %v824_v59  ;;  %v834_v9 = vand.u32 2147483647, %v824_v59  ;;  %vm830_vm9 = vweird.f32 %v824_v59 }
 0xc6d   :  { %1407 = vtanh.f32 %v789_v56 }
 0xc6e   :  { %v837_v0 = vor.u32 1.1754944e-38, %v836_v63  ;;  %vm835_vm13 = vcmp.eq.f32.partialorder %v834_v9, 8.507059e+37 }
 0xc72   :  { %v1406_v60 = vpop.eup %1405 }
 0xc73   :  { %v826_v61 = vmul.f32 %v1406_v60, %v824_v59  ;;  %vm831_vm8 = vweird.f32 %v1406_v60  ;;  %v1408_v4 = vpop.eup %1407 }
 0xc74   :  { %vm832_vm10 = vmor %vm830_vm9, %vm831_vm8 }
 0xc75   :  { %v827_v62 = vsub.f32 1.0, %v826_v61 }
 0xc77   :  { %v828_v8 = vmul.f32 %v1406_v60, %v827_v62 }
 0xc79   :  { %v829_v10 = vadd.f32 %v1406_v60, %v828_v8 }
 0xc7b   :  { %v833_v1 = vsel %vm832_vm10, %v1406_v60, %v829_v10 }
 0xc7c   :  { %v838_v11 = vsel %vm835_vm13, %v837_v0, %v833_v1 }
 0xc7d   :  { %v840_v6 = vsel %vm1554_vm5, %v1408_v4, %v838_v11 }
 0xc7e   :  { %843 = vrot.lane.b32.xlu2 %v840_v6, %s1446_s5  ;;  %v841_v15 = vmul.f32 %v840_v6, %v1697_v26 }
 0xcd0   :  { %v882_v12 = vpop.permute.xlu1 %881 }
 0xcd1   :  { %v884_v2 = vmul.f32 %v882_v12, %v878_v54 }
 0xcd3   :  { %886 = vrot.lane.b32.xlu0 %v884_v2, %s1447_s6 }
 0xcd8   :  { %v844_v13 = vpop.permute.xlu2 %843 }
 0xcd9   :  { %v846_v3 = vmul.f32 %v844_v13, %v840_v6 }
 0xcdb   :  { %848 = vrot.lane.b32.xlu1 %v846_v3, %s1447_s6 }
 0xd45   :  { %v887_v5 = vpop.permute.xlu0 %886 }
 0xd46   :  { %v1723_v7 = vadd.f32 %v887_v5, %v879_v14 }
 0xd48   :  { %1409 = vtanh.f32 %v1723_v7 }
 0xd4d   :  { %v849_v16 = vpop.permute.xlu1 %848 }
 0xd4e   :  { %v1410_v17 = vpop.eup %1409  ;;  %v1727_v18 = vadd.f32 %v849_v16, %v841_v15 }
 0xd4f   :  { %892 = vrot.lane.b32.xlu2 %v1410_v17, %s1446_s5 }
 0xd50   :  { %1411 = vtanh.f32 %v1727_v18 }
 0xd56   :  { %v1412_v19 = vpop.eup %1411 }
 0xd57   :  { %854 = vrot.lane.b32.xlu0 %v1412_v19, %s1446_s5 }
 0xda9   :  { %v893_v20 = vpop.permute.xlu2 %892 }
 0xdaa   :  { %v895_v21 = vmul.f32 %v893_v20, %v878_v54 }
 0xdac   :  { %903 = vrot.lane.b32.xlu1 %v895_v21, %s1447_s6 }
 0xdc9   :  { %v855_v26 = vpop.permute.xlu0 %854 }
 0xdca   :  { %v857_v27 = vmul.f32 %v855_v26, %v840_v6  ;;  %v1056_v26 = vld [vmem:[%s1864_s0] sm:$0xf] }
 0xdcc   :  { %897 = vrot.lane.b32.xlu2 %v857_v27, %s1447_s6  ;;  %v1111_v27 = vrot.slane %v1056_v26, 2  ;;  %v1216_v26 = vld [vmem:[#allocation3 + $0xe] sm:$0x3] }
 0xe1e   :  { %v904_v32 = vpop.permute.xlu1 %903 }
 0xe1f   :  { %907 = vst.msk [vmem:[#allocation3 + $0x4] sm:$0x3] %vm159_vm11, %v904_v32  ;;  %1306 = vmatmul.msk.f32.vlgmr.msrb.gmra.mxu1 %vm26_vm12, %v904_v32 }
 0xe26   :  { %v898_v34 = vpop.permute.xlu2 %897 }
 0xe27   :  { %901 = vst.msk [vmem:[#allocation2 + $0xa] sm:$0x3] %vm159_vm11, %v898_v34  ;;  %1305 = vmatmul.msk.f32.vlgmr.msrb.gmra.mxu0 %vm26_vm12, %v898_v34 }
 0xe9c   :  { %v960_v37 = vpop.f32.mrf.mxu1 }
 0xe9d   :  { %v966_v38 = vadd.f32 %v964_v36, %v960_v37 }
 0xe9f   :  { %v1308_v39 = vmul.f32 -1.442695, %v966_v38 }
 0xea1   :  { %1413 = vpow2.f32 %v1308_v39 }
 0xea4   :  { %v933_v41 = vpop.f32.mrf.mxu0 }
 0xea5   :  { %v936_v42 = vadd.f32 %v1303_v40, %v933_v41 }
 0xea7   :  { %v1414_v43 = vpop.eup %1413  ;;  %v1307_v44 = vmul.f32 -1.442695, %v936_v42 }
 0xea8   :  { %v1009_v45 = vadd.f32 1.0, %v1414_v43 }
 0xea9   :  { %1415 = vpow2.f32 %v1307_v44 }
 0xeaa   :  { %1417 = vrcp.f32 %v1009_v45  ;;  %v1021_v51 = vand.u32 2147483648, %v1009_v45  ;;  %v1019_v53 = vand.u32 2147483647, %v1009_v45  ;;  %vm1015_vm15 = vweird.f32 %v1009_v45 }
 0xeac   :  { %v1022_v56 = vor.u32 1.1754944e-38, %v1021_v51  ;;  %vm1020_vm1 = vcmp.eq.f32.partialorder %v1019_v53, 8.507059e+37 }
 0xeaf   :  { %v1416_v46 = vpop.eup %1415 }
 0xeb0   :  { %v1418_v47 = vpop.eup %1417  ;;  %v971_v48 = vadd.f32 1.0, %v1416_v46 }
 0xeb1   :  { %v1011_v49 = vmul.f32 %v1418_v47, %v1009_v45  ;;  %vm1016_vm14 = vweird.f32 %v1418_v47 }
 0xeb2   :  { %1419 = vrcp.f32 %v971_v48  ;;  %vm1017_vm0 = vmor %vm1015_vm15, %vm1016_vm14  ;;  %v983_v63 = vand.u32 2147483648, %v971_v48  ;;  %v981_v9 = vand.u32 2147483647, %v971_v48  ;;  %vm977_vm3 = vweird.f32 %v971_v48 }
 0xeb3   :  { %v1012_v50 = vsub.f32 1.0, %v1011_v49  ;;  %1421 = vtanh.f32 %v966_v38 }
 0xeb4   :  { %1423 = vtanh.f32 %v936_v42  ;;  %v984_v0 = vor.u32 1.1754944e-38, %v983_v63  ;;  %vm982_vm6 = vcmp.eq.f32.partialorder %v981_v9, 8.507059e+37 }
 0xeb5   :  { %v1013_v52 = vmul.f32 %v1418_v47, %v1012_v50 }
 0xeb7   :  { %v1014_v54 = vadd.f32 %v1418_v47, %v1013_v52 }
 0xeb8   :  { %v1420_v55 = vpop.eup %1419 }
 0xeb9   :  { %v1018_v57 = vsel %vm1017_vm0, %v1418_v47, %v1014_v54  ;;  %v973_v58 = vmul.f32 %v1420_v55, %v971_v48  ;;  %v1422_v59 = vpop.eup %1421  ;;  %vm978_vm2 = vweird.f32 %v1420_v55 }
 0xeba   :  { %v1023_v60 = vsel %vm1020_vm1, %v1022_v56, %v1018_v57  ;;  %vm979_vm4 = vmor %vm977_vm3, %vm978_vm2  ;;  %v1424_v4 = vpop.eup %1423 }
 0xebb   :  { %v1025_v61 = vsel %vm1554_vm5, %v1422_v59, %v1023_v60  ;;  %v974_v62 = vsub.f32 1.0, %v973_v58 }
 0xebc   :  { %1028 = vrot.lane.b32.xlu0 %v1025_v61, %s1446_s5  ;;  %v1026_v14 = vmul.f32 %v1025_v61, %v1723_v7 }
 0xebd   :  { %v975_v8 = vmul.f32 %v1420_v55, %v974_v62 }
 0xebf   :  { %v976_v10 = vadd.f32 %v1420_v55, %v975_v8 }
 0xec1   :  { %v980_v1 = vsel %vm979_vm4, %v1420_v55, %v976_v10 }
 0xec2   :  { %v985_v11 = vsel %vm982_vm6, %v984_v0, %v980_v1 }
 0xec3   :  { %v987_v6 = vsel %vm1554_vm5, %v1424_v4, %v985_v11 }
 0xec4   :  { %990 = vrot.lane.b32.xlu1 %v987_v6, %s1446_s5  ;;  %v988_v17 = vmul.f32 %v987_v6, %v1727_v18 }
 0xf2e   :  { %v1029_v12 = vpop.permute.xlu0 %1028 }
 0xf2f   :  { %v1031_v2 = vmul.f32 %v1029_v12, %v1025_v61 }
 0xf31   :  { %1033 = vrot.lane.b32.xlu2 %v1031_v2, %s1447_s6 }
 0xf36   :  { %v991_v13 = vpop.permute.xlu1 %990 }
 0xf37   :  { %v993_v3 = vmul.f32 %v991_v13, %v987_v6 }
 0xf39   :  { %995 = vrot.lane.b32.xlu0 %v993_v3, %s1447_s6  ;;  %v1211_v3 = vld [vmem:[#allocation3 + $0x4] sm:$0x3] }
 0xf8b   :  { %v1034_v5 = vpop.permute.xlu2 %1033 }
 0xf8c   :  { %v1777_v15 = vadd.f32 %v1034_v5, %v1026_v14  ;;  %v1212_v14 = vld [vmem:[#allocation3 + $0x6] sm:$0x3] }
 0xf8e   :  { %1425 = vtanh.f32 %v1777_v15 }
 0xf94   :  { %v1426_v16 = vpop.eup %1425 }
 0xf95   :  { %1039 = vrot.lane.b32.xlu1 %v1426_v16, %s1446_s5  ;;  %v1203_v16 = vld [vmem:[#allocation2 + $0x4] sm:$0x3] }
 0xfab   :  { %v996_v19 = vpop.permute.xlu0 %995 }
 0xfac   :  { %v1782_v20 = vadd.f32 %v996_v19, %v988_v17 }
 0xfae   :  { %1427 = vtanh.f32 %v1782_v20 }
 0xfb4   :  { %v1428_v21 = vpop.eup %1427 }
 0xfb5   :  { %1001 = vrot.lane.b32.xlu2 %v1428_v21, %s1446_s5 }
0x1007   :  { %v1040_v22 = vpop.permute.xlu1 %1039 }
0x1008   :  { %v1042_v7 = vmul.f32 %v1040_v22, %v1025_v61 }
0x100a   :  { %1050 = vrot.lane.b32.xlu0 %v1042_v7, %s1447_s6  ;;  %v1204_v7 = vld [vmem:[#allocation2 + $0x6] sm:$0x3] }
0x100f   :  { %v1002_v23 = vpop.permute.xlu2 %1001 }
0x1010   :  { %v1004_v24 = vmul.f32 %v1002_v23, %v987_v6 }
0x1012   :  { %1044 = vrot.lane.b32.xlu1 %v1004_v24, %s1447_s6 }
0x107c   :  { %v1051_v25 = vpop.permute.xlu0 %1050 }
0x107d   :  { %1054 = vst.msk [vmem:[#allocation3 + $0x2] sm:$0x3] %vm159_vm11, %v1051_v25  ;;  %1311 = vmatmul.msk.f32.vlgmr.msrb.gmra.mxu3 %vm26_vm12, %v1051_v25  ;;  %v1213_v25 = vld [vmem:[#allocation3 + $0x8] sm:$0x3] }
0x1084   :  { %v1045_v18 = vpop.permute.xlu1 %1044  ;;  %v1210_v22 = vld [vmem:[#allocation3 + $0x2] sm:$0x3] }
0x1085   :  { %1048 = vst.msk [vmem:[#allocation2 + $0xc] sm:$0x3] %vm159_vm11, %v1045_v18  ;;  %1310 = vmatmul.msk.f32.vlgmr.msrb.gmra.mxu2 %vm26_vm12, %v1045_v18  ;;  %v1214_v18 = vld [vmem:[#allocation3 + $0xa] sm:$0x3] }
0x1100   :  { %v1107_v28 = vpop.f32.mrf.mxu3 }
0x1101   :  { %v1113_v29 = vadd.f32 %v1111_v27, %v1107_v28  ;;  %v1202_v28 = vld [vmem:[#allocation2 + $0x2] sm:$0x3] }
0x1103   :  { %v1313_v30 = vmul.f32 -1.442695, %v1113_v29 }
0x1105   :  { %1429 = vpow2.f32 %v1313_v30 }
0x1108   :  { %v1080_v32 = vpop.f32.mrf.mxu2 }
0x1109   :  { %v1083_v34 = vadd.f32 %v1309_v31, %v1080_v32  ;;  %v1205_v32 = vld [vmem:[#allocation2 + $0x8] sm:$0x3] }
0x110b   :  { %v1430_v35 = vpop.eup %1429  ;;  %v1312_v36 = vmul.f32 -1.442695, %v1083_v34 }
0x110c   :  { %v1156_v37 = vadd.f32 1.0, %v1430_v35  ;;  %v1215_v35 = vld [vmem:[#allocation3 + $0xc] sm:$0x3] }
0x110d   :  { %1431 = vpow2.f32 %v1312_v36 }
0x110e   :  { %1433 = vrcp.f32 %v1156_v37  ;;  %v1168_v43 = vand.u32 2147483648, %v1156_v37  ;;  %v1166_v45 = vand.u32 2147483647, %v1156_v37  ;;  %vm1162_vm8 = vweird.f32 %v1156_v37 }
0x1110   :  { %v1169_v48 = vor.u32 1.1754944e-38, %v1168_v43  ;;  %vm1167_vm10 = vcmp.eq.f32.partialorder %v1166_v45, 8.507059e+37 }
0x1113   :  { %v1432_v38 = vpop.eup %1431 }
0x1114   :  { %v1434_v39 = vpop.eup %1433  ;;  %v1118_v40 = vadd.f32 1.0, %v1432_v38 }
0x1115   :  { %v1158_v41 = vmul.f32 %v1434_v39, %v1156_v37  ;;  %vm1163_vm7 = vweird.f32 %v1434_v39 }
0x1116   :  { %1435 = vrcp.f32 %v1118_v40  ;;  %vm1164_vm9 = vmor %vm1162_vm8, %vm1163_vm7  ;;  %v1130_v55 = vand.u32 2147483648, %v1118_v40  ;;  %v1128_v57 = vand.u32 2147483647, %v1118_v40  ;;  %vm1124_vm14 = vweird.f32 %v1118_v40 }
0x1117   :  { %v1159_v42 = vsub.f32 1.0, %v1158_v41  ;;  %1437 = vtanh.f32 %v1113_v29 }
0x1118   :  { %1439 = vtanh.f32 %v1083_v34  ;;  %v1131_v59 = vor.u32 1.1754944e-38, %v1130_v55  ;;  %vm1129_vm0 = vcmp.eq.f32.partialorder %v1128_v57, 8.507059e+37 }
0x1119   :  { %v1160_v44 = vmul.f32 %v1434_v39, %v1159_v42 }
0x111b   :  { %v1161_v46 = vadd.f32 %v1434_v39, %v1160_v44  ;;  %v1201_v44 = vld [vmem:[#allocation2] sm:$0x3] }
0x111c   :  { %v1436_v47 = vpop.eup %1435 }
0x111d   :  { %v1165_v49 = vsel %vm1164_vm9, %v1434_v39, %v1161_v46  ;;  %v1120_v50 = vmul.f32 %v1436_v47, %v1118_v40  ;;  %v1438_v51 = vpop.eup %1437  ;;  %vm1125_vm13 = vweird.f32 %v1436_v47  ;;  %v1206_v40 = vld [vmem:[#allocation2 + $0xa] sm:$0x3] }
0x111e   :  { %v1170_v52 = vsel %vm1167_vm10, %v1169_v48, %v1165_v49  ;;  %vm1126_vm15 = vmor %vm1124_vm14, %vm1125_vm13  ;;  %v1440_v61 = vpop.eup %1439 }
0x111f   :  { %v1172_v53 = vsel %vm1554_vm5, %v1438_v51, %v1170_v52  ;;  %v1121_v54 = vsub.f32 1.0, %v1120_v50 }
0x1120   :  { %1175 = vrot.lane.b32.xlu2 %v1172_v53, %s1446_s5  ;;  %v1173_v1 = vmul.f32 %v1172_v53, %v1777_v15 }
0x1121   :  { %v1122_v56 = vmul.f32 %v1436_v47, %v1121_v54 }
0x1123   :  { %v1123_v58 = vadd.f32 %v1436_v47, %v1122_v56 }
0x1125   :  { %v1127_v60 = vsel %vm1126_vm15, %v1436_v47, %v1123_v58  ;;  %v1207_v47 = vld [vmem:[#allocation2 + $0xc] sm:$0x3] }
0x1126   :  { %v1132_v62 = vsel %vm1129_vm0, %v1131_v59, %v1127_v60 }
0x1127   :  { %v1134_v63 = vsel %vm1554_vm5, %v1440_v61, %v1132_v62  ;;  %vm1257_vm5 = vcmask 517120  }
0x1128   :  { %1137 = vrot.lane.b32.xlu0 %v1134_v63, %s1446_s5  ;;  %v1135_v6 = vmul.f32 %v1134_v63, %v1782_v20 }
0x117a   :  { %v1176_v8 = vpop.permute.xlu2 %1175 }
0x117b   :  { %v1178_v9 = vmul.f32 %v1176_v8, %v1172_v53 }
0x117d   :  { %1180 = vrot.lane.b32.xlu1 %v1178_v9, %s1447_s6 }
0x119a   :  { %v1138_v10 = vpop.permute.xlu0 %1137 }
0x119b   :  { %v1140_v0 = vmul.f32 %v1138_v10, %v1134_v63 }
0x119d   :  { %1142 = vrot.lane.b32.xlu2 %v1140_v0, %s1447_s6 }
0x11ef   :  { %v1181_v4 = vpop.permute.xlu1 %1180 }
0x11f0   :  { %v1183_v11 = vadd.f32 %v1181_v4, %v1173_v1 }
0x11f2   :  { %1441 = vtanh.f32 %v1183_v11 }
0x11f7   :  { %v1143_v12 = vpop.permute.xlu2 %1142 }
0x11f8   :  { %v1442_v33 = vpop.eup %1441  ;;  %v1145_v2 = vadd.f32 %v1143_v12, %v1135_v6 }
0x11f9   :  { %1186 = vrot.lane.b32.xlu0 %v1442_v33, %s1446_s5 }
0x11fa   :  { %1443 = vtanh.f32 %v1145_v2 }
0x1200   :  { %v1444_v13 = vpop.eup %1443 }
0x1201   :  { %1229 = vrot.lane.b32.xlu0 %v1211_v3, %s1447_s6  ;;  %1148 = vrot.lane.b32.xlu1 %v1444_v13, %s1446_s5 }
0x1209   :  { %1231 = vrot.lane.b32.xlu1 %v1212_v14, %s1447_s6 }
0x126b   :  { %v1187_v5 = vpop.permute.xlu0 %1186 }
0x126c   :  { %v1189_v15 = vmul.f32 %v1187_v5, %v1172_v53 }
0x126e   :  { %1197 = vrot.lane.b32.xlu2 %v1189_v15, %s1447_s6 }
0x1273   :  { %v1230_v17 = vpop.permute.xlu0 %1229  ;;  %v1149_v19 = vpop.permute.xlu1 %1148 }
0x1274   :  { %v1251_v20 = vsel %vm26_vm12, %v1203_v16, %v1230_v17  ;;  %v1151_v21 = vmul.f32 %v1149_v19, %v1134_v63 }
0x1275   :  { %1260 = vst.msk [vmem:[%s1865_s3 + $0x4] sm:$0x3] %vm1257_vm5, %v1251_v20 }
0x1276   :  { %1227 = vrot.lane.b32.xlu2 %v1210_v22, %s1447_s6  ;;  %1191 = vrot.lane.b32.xlu0 %v1151_v21, %s1447_s6 }
0x127b   :  { %v1232_v23 = vpop.permute.xlu1 %1231 }
0x127c   :  { %v1252_v24 = vsel %vm26_vm12, %v1204_v7, %v1232_v23 }
0x127d   :  { %1261 = vst.msk [vmem:[%s1865_s3 + $0x6] sm:$0x3] %vm1257_vm5, %v1252_v24 }
0x127e   :  { %1233 = vrot.lane.b32.xlu2 %v1213_v25, %s1447_s6  ;;  %1235 = vrot.lane.b32.xlu0 %v1214_v18, %s1447_s6 }
0x1286   :  { %1239 = vrot.lane.b32.xlu2 %v1216_v26, %s1447_s6 }
0x12c8   :  { %v1198_v27 = vpop.permute.xlu2 %1197 }
0x12c9   :  { %1200 = vst.msk [vmem:[#allocation3] sm:$0x3] %vm159_vm11, %v1198_v27 }
0x12d0   :  { %v1228_v29 = vpop.permute.xlu2 %1227  ;;  %v1209_v30 = vld [vmem:[#allocation3] sm:$0x3] }
0x12d1   :  { %v1250_v31 = vsel %vm26_vm12, %v1202_v28, %v1228_v29  ;;  %1225 = vrot.lane.b32.xlu1 %v1209_v30, %s1447_s6 }
0x12d2   :  { %1259 = vst.msk [vmem:[%s1865_s3 + $0x2] sm:$0x3] %vm1257_vm5, %v1250_v31 }
0x12d8   :  { %v1234_v34 = vpop.permute.xlu2 %1233 }
0x12d9   :  { %v1253_v36 = vsel %vm26_vm12, %v1205_v32, %v1234_v34  ;;  %1237 = vrot.lane.b32.xlu1 %v1215_v35, %s1447_s6 }
0x12da   :  { %1262 = vst.msk [vmem:[%s1865_s3 + $0x8] sm:$0x3] %vm1257_vm5, %v1253_v36 }
0x12e0   :  { %v1240_v38 = vpop.permute.xlu2 %1239 }
0x12e8   :  { %v1192_v37 = vpop.permute.xlu0 %1191 }
0x12e9   :  { %1195 = vst.msk [vmem:[#allocation2 + $0xe] sm:$0x3] %vm159_vm11, %v1192_v37 }
0x12f0   :  { %v1208_v39 = vld [vmem:[#allocation2 + $0xe] sm:$0x3]  ;;  %v1236_v41 = vpop.permute.xlu0 %1235 }
0x12f1   :  { %v1256_v42 = vsel %vm26_vm12, %v1208_v39, %v1240_v38  ;;  %v1254_v43 = vsel %vm26_vm12, %v1206_v40, %v1236_v41 }
0x12f2   :  { %1265 = vst.msk [vmem:[%s1865_s3 + $0xe] sm:$0x3] %vm1257_vm5, %v1256_v42 }
0x12f3   :  { %1263 = vst.msk [vmem:[%s1865_s3 + $0xa] sm:$0x3] %vm1257_vm5, %v1254_v43 }
0x1343   :  { %v1226_v45 = vpop.permute.xlu1 %1225 }
0x1344   :  { %v1249_v46 = vsel %vm26_vm12, %v1201_v44, %v1226_v45 }
0x1345   :  { %1258 = vst.msk [vmem:[%s1865_s3] sm:$0x3] %vm1257_vm5, %v1249_v46 }
0x134b   :  { %v1238_v48 = vpop.permute.xlu1 %1237 }
0x134c   :  { %v1255_v49 = vsel %vm26_vm12, %v1207_v47, %v1238_v48 }
0x134d   :  { %1264 = vst.msk [vmem:[%s1865_s3 + $0xc] sm:$0x3] %vm1257_vm5, %v1255_v49 }

// kernel: rsan_forward.6
= control target key start
LH: loop header
LB: loop body
LE: loop exit
PB: predicated region body
PF: predicated region fallthrough
CT: control target
= control target key end

     0   :  { %8 = vsyncpa [#allocation5], 0  ;;  %s1491_s15 = smov [#allocation4]   ;;  %s1492_s17 = smov 128   ;;  %s1890_s0 = inlined_call_operand.vmem [shape: f32[8,2,256], index: 0, kind: input, shape index: {}]   ;;  %s1891_s1 = inlined_call_operand.vmem [shape: f32[32,128], index: 1, kind: input, shape index: {}]   ;;  %s1892_s2 = inlined_call_operand.hbm [shape: f32[32,128], index: 2, kind: input, shape index: {}]   ;;  %s1893_s3 = inlined_call_operand.vmem [shape: f32[8,2,64], index: 3, kind: output, shape index: {}]  }
   0x1   :  { %s17_s14 = sshll.u32 %s1892_s2, 4  ;;  %s19_s16 = sshll.u32 %s1491_s15, 4  ;;  %s18_s14 = int_to_ptr.hbm [resolvable:$true] %s17_s14  ;;  %s20_s16 = int_to_ptr.vmem [resolvable:$true] %s19_s16 }
   0x2   :  { %s1493_s18 = smov 8  }
   0x3   :  { %25 = dma.hbm_to_vmem [thread:$0]  %s18_s14, 512, %s20_s16, [#allocation5], %s1492_s17, %s1492_s17, %s1493_s18  }
   0x4   :  { %1489 = dma.done.wait [#allocation5], 512  }
   0x5   :  { %1490 = vsyncadd [#allocation5], 4294966784  ;;  %v1520_v0 = vld [vmem:[#allocation4 + $0x18] sm:$0xff]  ;;  %v1522_v1 = vld [vmem:[#allocation4 + $0x10] sm:$0xff]  ;;  %v1494_v8 = vmov 0.0   ;;  %v30_v22 = vlaneseq  ;;  %s1495_s30 = smov 64  }
   0x6   :  { %83 = vmatpush.msra.mxu1 %v1520_v0  ;;  %v1528_v2 = vld [vmem:[%s1891_s1 + $0x18] sm:$0xff]  ;;  %v1533_v3 = vld [vmem:[%s1891_s1 + $0x10] sm:$0xff]  ;;  %232 = vmatpush.msra.mxu3 %v1520_v0  ;;  %v1536_v4 = vld [vmem:[#allocation4 + $0x8] sm:$0xff]  ;;  %s1496_s4 = smov 32   ;;  %vm175_vm11 = vcmask 254976   ;;  %vm42_vm12 = vcmask 261120  }
   0x7   :  { %58 = vmatpush.msra.mxu0 %v1528_v2  ;;  %205 = vmatpush.msra.mxu2 %v1528_v2  ;;  %v1544_v5 = vld [vmem:[%s1891_s1 + $0x8] sm:$0xff]  ;;  %v1547_v6 = vld [vmem:[#allocation4] sm:$0xff]  ;;  %v1287_v9 = vld [vmem:[%s1890_s0 + $0x1c] sm:$0xf]  ;;  %v31_v23 = vand.u32 127, %v30_v22 }
   0x8   :  { %84 = vmatpush.msra.mxu1 %v1522_v1  ;;  %233 = vmatpush.msra.mxu3 %v1522_v1  ;;  %v1555_v7 = vld [vmem:[%s1891_s1] sm:$0xff]  ;;  %v92_v10 = vrot.slane %v1287_v9, 2 }
   0x9   :  { %59 = vmatpush.msra.mxu0 %v1533_v3  ;;  %206 = vmatpush.msra.mxu2 %v1533_v3  ;;  %v35_v11 = vld [vmem:[%s1890_s0] sm:$0xf]  ;;  %vm32_vm0 = vcmp.ge.s32.totalorder %v31_v23, 64  ;;  %vm33_vm1 = vcmp.lt.s32.totalorder %v31_v23, 96 }
   0xa   :  { %85 = vmatpush.msra.mxu1 %v1536_v4  ;;  %234 = vmatpush.msra.mxu3 %v1536_v4  ;;  %vm1594_vm5 = vmand %vm32_vm0, %vm33_vm1 }
   0xb   :  { %60 = vmatpush.msra.mxu0 %v1544_v5  ;;  %207 = vmatpush.msra.mxu2 %v1544_v5 }
   0xc   :  { %86 = vmatpush.msra.mxu1 %v1547_v6  ;;  %235 = vmatpush.msra.mxu3 %v1547_v6 }
   0xd   :  { %87 = vmatmul.f32.vlgmr.msra.gmra.mxu1 %v1494_v8  ;;  %61 = vmatpush.msra.mxu0 %v1555_v7 }
   0xe   :  { %62 = vmatmul.f32.vlgmr.msra.gmra.mxu0 %v1494_v8  ;;  %208 = vmatpush.msra.mxu2 %v1555_v7 }
   0xf   :  { %381 = vmatpush.msrb.mxu1 %v1520_v0  ;;  %354 = vmatpush.msrb.mxu0 %v1528_v2 }
  0x10   :  { %530 = vmatpush.msrb.mxu3 %v1520_v0  ;;  %503 = vmatpush.msrb.mxu2 %v1528_v2 }
  0x11   :  { %382 = vmatpush.msrb.mxu1 %v1522_v1  ;;  %355 = vmatpush.msrb.mxu0 %v1533_v3 }
  0x12   :  { %531 = vmatpush.msrb.mxu3 %v1522_v1  ;;  %504 = vmatpush.msrb.mxu2 %v1533_v3 }
  0x13   :  { %383 = vmatpush.msrb.mxu1 %v1536_v4  ;;  %356 = vmatpush.msrb.mxu0 %v1544_v5 }
  0x14   :  { %532 = vmatpush.msrb.mxu3 %v1536_v4  ;;  %505 = vmatpush.msrb.mxu2 %v1544_v5 }
  0x15   :  { %384 = vmatpush.msrb.mxu1 %v1547_v6  ;;  %357 = vmatpush.msrb.mxu0 %v1555_v7 }
  0x16   :  { %533 = vmatpush.msrb.mxu3 %v1547_v6  ;;  %506 = vmatpush.msrb.mxu2 %v1555_v7 }
  0x17   :  { %677 = vmatpush.msra.mxu1 %v1520_v0  ;;  %650 = vmatpush.msra.mxu0 %v1528_v2 }
  0x19   :  { %678 = vmatpush.msra.mxu1 %v1522_v1  ;;  %651 = vmatpush.msra.mxu0 %v1533_v3 }
  0x1b   :  { %679 = vmatpush.msra.mxu1 %v1536_v4  ;;  %652 = vmatpush.msra.mxu0 %v1544_v5 }
  0x1d   :  { %680 = vmatpush.msra.mxu1 %v1547_v6  ;;  %653 = vmatpush.msra.mxu0 %v1555_v7 }
  0x8a   :  { %v88_v12 = vpop.f32.mrf.mxu1 }
  0x8b   :  { %v94_v13 = vadd.f32 %v92_v10, %v88_v12  ;;  %v63_v14 = vpop.f32.mrf.mxu0  ;;  %v1290_v12 = vld [vmem:[%s1890_s0 + $0x4] sm:$0xf] }
  0x8c   :  { %v66_v15 = vadd.f32 %v63_v14, %v35_v11 }
  0x8d   :  { %v1289_v16 = vmul.f32 -1.442695, %v94_v13 }
  0x8e   :  { %v1288_v17 = vmul.f32 -1.442695, %v66_v15 }
  0x8f   :  { %1337 = vpow2.f32 %v1289_v16 }
  0x90   :  { %1339 = vpow2.f32 %v1288_v17 }
  0x95   :  { %v1338_v18 = vpop.eup %1337 }
  0x96   :  { %v1340_v19 = vpop.eup %1339  ;;  %v137_v20 = vadd.f32 1.0, %v1338_v18 }
  0x97   :  { %v99_v21 = vadd.f32 1.0, %v1340_v19 }
  0x98   :  { %1341 = vrcp.f32 %v137_v20  ;;  %v149_v29 = vand.u32 2147483648, %v137_v20  ;;  %v147_v32 = vand.u32 2147483647, %v137_v20  ;;  %vm143_vm6 = vweird.f32 %v137_v20 }
  0x99   :  { %1343 = vrcp.f32 %v99_v21  ;;  %vm105_vm3 = vweird.f32 %v99_v21  ;;  %v111_v35 = vand.u32 2147483648, %v99_v21  ;;  %v109_v37 = vand.u32 2147483647, %v99_v21 }
  0x9a   :  { %1345 = vtanh.f32 %v94_v13  ;;  %v150_v38 = vor.u32 1.1754944e-38, %v149_v29  ;;  %vm148_vm9 = vcmp.eq.f32.partialorder %v147_v32, 8.507059e+37 }
  0x9b   :  { %1347 = vtanh.f32 %v66_v15  ;;  %v112_v43 = vor.u32 1.1754944e-38, %v111_v35  ;;  %vm110_vm10 = vcmp.eq.f32.partialorder %v109_v37, 8.507059e+37 }
  0x9e   :  { %v1342_v24 = vpop.eup %1341 }
  0x9f   :  { %v1344_v25 = vpop.eup %1343  ;;  %v139_v26 = vmul.f32 %v1342_v24, %v137_v20  ;;  %vm144_vm2 = vweird.f32 %v1342_v24 }
  0xa0   :  { %v101_v27 = vmul.f32 %v1344_v25, %v99_v21  ;;  %vm106_vm4 = vweird.f32 %v1344_v25  ;;  %vm145_vm7 = vmor %vm143_vm6, %vm144_vm2  ;;  %v1346_v41 = vpop.eup %1345 }
  0xa1   :  { %v140_v28 = vsub.f32 1.0, %v139_v26  ;;  %vm107_vm8 = vmor %vm105_vm3, %vm106_vm4  ;;  %v1348_v46 = vpop.eup %1347 }
  0xa2   :  { %v102_v30 = vsub.f32 1.0, %v101_v27 }
  0xa3   :  { %v141_v31 = vmul.f32 %v1342_v24, %v140_v28 }
  0xa4   :  { %v103_v34 = vmul.f32 %v1344_v25, %v102_v30 }
  0xa5   :  { %v142_v36 = vadd.f32 %v1342_v24, %v141_v31 }
  0xa6   :  { %v104_v39 = vadd.f32 %v1344_v25, %v103_v34 }
  0xa7   :  { %v146_v40 = vsel %vm145_vm7, %v1342_v24, %v142_v36 }
  0xa8   :  { %v151_v42 = vsel %vm148_vm9, %v150_v38, %v146_v40  ;;  %v108_v45 = vsel %vm107_vm8, %v1344_v25, %v104_v39 }
  0xa9   :  { %v153_v44 = vsel %vm1594_vm5, %v1346_v41, %v151_v42  ;;  %v113_v47 = vsel %vm110_vm10, %v112_v43, %v108_v45 }
  0xaa   :  { %156 = vrot.lane.b32.xlu0 %v153_v44, %s1495_s30  ;;  %v115_v48 = vsel %vm1594_vm5, %v1348_v46, %v113_v47  ;;  %v154_v53 = vmul.f32 0.0, %v153_v44 }
  0xab   :  { %v116_v56 = vmul.f32 0.0, %v115_v48 }
  0xb2   :  { %118 = vrot.lane.b32.xlu0 %v115_v48, %s1495_s30 }
 0x11c   :  { %v157_v49 = vpop.permute.xlu0 %156 }
 0x11d   :  { %v159_v50 = vmul.f32 %v157_v49, %v153_v44 }
 0x11f   :  { %161 = vrot.lane.b32.xlu1 %v159_v50, %s1496_s4 }
 0x124   :  { %v119_v51 = vpop.permute.xlu0 %118 }
 0x125   :  { %v121_v52 = vmul.f32 %v119_v51, %v115_v48 }
 0x127   :  { %123 = vrot.lane.b32.xlu1 %v121_v52, %s1496_s4 }
 0x191   :  { %v162_v54 = vpop.permute.xlu1 %161 }
 0x192   :  { %v1606_v55 = vadd.f32 %v162_v54, %v154_v53 }
 0x194   :  { %1349 = vtanh.f32 %v1606_v55 }
 0x199   :  { %v124_v57 = vpop.permute.xlu1 %123 }
 0x19a   :  { %v1350_v58 = vpop.eup %1349  ;;  %v1609_v59 = vadd.f32 %v124_v57, %v116_v56 }
 0x19b   :  { %167 = vrot.lane.b32.xlu2 %v1350_v58, %s1495_s30 }
 0x19c   :  { %1351 = vtanh.f32 %v1609_v59 }
 0x1a2   :  { %v1352_v60 = vpop.eup %1351 }
 0x1a3   :  { %129 = vrot.lane.b32.xlu2 %v1352_v60, %s1495_s30 }
 0x1f5   :  { %v168_v61 = vpop.permute.xlu2 %167 }
 0x1f6   :  { %v170_v62 = vmul.f32 %v168_v61, %v153_v44 }
 0x1f8   :  { %178 = vrot.lane.b32.xlu0 %v170_v62, %s1496_s4 }
 0x1fd   :  { %v130_v63 = vpop.permute.xlu2 %129 }
 0x1fe   :  { %v132_v8 = vmul.f32 %v130_v63, %v115_v48 }
 0x200   :  { %172 = vrot.lane.b32.xlu1 %v132_v8, %s1496_s4 }
 0x26a   :  { %v179_v9 = vpop.permute.xlu0 %178 }
 0x26b   :  { %182 = vst.msk [vmem:[#allocation3 + $0xe] sm:$0x3] %vm175_vm11, %v179_v9  ;;  %1293 = vmatmul.msk.f32.vlgmr.msra.gmra.mxu3 %vm42_vm12, %v179_v9 }
 0x26c   :  { %824 = vmatpush.msra.mxu3 %v1520_v0  ;;  %v1291_v0 = vld [vmem:[%s1890_s0 + $0x18] sm:$0xf] }
 0x26e   :  { %825 = vmatpush.msra.mxu3 %v1522_v1  ;;  %v241_v1 = vrot.slane %v1291_v0, 2 }
 0x270   :  { %826 = vmatpush.msra.mxu3 %v1536_v4 }
 0x272   :  { %v173_v10 = vpop.permute.xlu1 %172  ;;  %827 = vmatpush.msra.mxu3 %v1547_v6 }
 0x273   :  { %176 = vst.msk [vmem:[#allocation2] sm:$0x3] %vm175_vm11, %v173_v10  ;;  %1292 = vmatmul.msk.f32.vlgmr.msra.gmra.mxu2 %vm42_vm12, %v173_v10 }
 0x274   :  { %797 = vmatpush.msra.mxu2 %v1528_v2 }
 0x276   :  { %798 = vmatpush.msra.mxu2 %v1533_v3 }
 0x278   :  { %799 = vmatpush.msra.mxu2 %v1544_v5 }
 0x27a   :  { %800 = vmatpush.msra.mxu2 %v1555_v7 }
 0x2ee   :  { %v237_v4 = vpop.f32.mrf.mxu3 }
 0x2ef   :  { %v243_v11 = vadd.f32 %v241_v1, %v237_v4 }
 0x2f1   :  { %v1295_v6 = vmul.f32 -1.442695, %v243_v11 }
 0x2f3   :  { %1353 = vpow2.f32 %v1295_v6 }
 0x2f6   :  { %v210_v2 = vpop.f32.mrf.mxu2 }
 0x2f7   :  { %v213_v13 = vadd.f32 %v1290_v12, %v210_v2 }
 0x2f9   :  { %v1354_v3 = vpop.eup %1353  ;;  %v1294_v14 = vmul.f32 -1.442695, %v213_v13 }
 0x2fa   :  { %v286_v5 = vadd.f32 1.0, %v1354_v3 }
 0x2fb   :  { %1355 = vpow2.f32 %v1294_v14  ;;  %v1296_v14 = vld [vmem:[%s1890_s0 + $0x8] sm:$0xf] }
 0x2fc   :  { %1357 = vrcp.f32 %v286_v5  ;;  %v298_v19 = vand.u32 2147483648, %v286_v5  ;;  %v296_v21 = vand.u32 2147483647, %v286_v5  ;;  %vm292_vm14 = vweird.f32 %v286_v5 }
 0x2fe   :  { %v299_v24 = vor.u32 1.1754944e-38, %v298_v19  ;;  %vm297_vm0 = vcmp.eq.f32.partialorder %v296_v21, 8.507059e+37 }
 0x301   :  { %v1356_v7 = vpop.eup %1355 }
 0x302   :  { %v1358_v15 = vpop.eup %1357  ;;  %v248_v16 = vadd.f32 1.0, %v1356_v7 }
 0x303   :  { %v288_v17 = vmul.f32 %v1358_v15, %v286_v5  ;;  %vm293_vm13 = vweird.f32 %v1358_v15 }
 0x304   :  { %1359 = vrcp.f32 %v248_v16  ;;  %vm294_vm15 = vmor %vm292_vm14, %vm293_vm13  ;;  %v260_v31 = vand.u32 2147483648, %v248_v16  ;;  %v258_v34 = vand.u32 2147483647, %v248_v16  ;;  %vm254_vm2 = vweird.f32 %v248_v16 }
 0x305   :  { %v289_v18 = vsub.f32 1.0, %v288_v17  ;;  %1361 = vtanh.f32 %v243_v11 }
 0x306   :  { %1363 = vtanh.f32 %v213_v13  ;;  %v261_v36 = vor.u32 1.1754944e-38, %v260_v31  ;;  %vm259_vm4 = vcmp.eq.f32.partialorder %v258_v34, 8.507059e+37 }
 0x307   :  { %v290_v20 = vmul.f32 %v1358_v15, %v289_v18 }
 0x309   :  { %v291_v22 = vadd.f32 %v1358_v15, %v290_v20 }
 0x30a   :  { %v1360_v23 = vpop.eup %1359 }
 0x30b   :  { %v295_v25 = vsel %vm294_vm15, %v1358_v15, %v291_v22  ;;  %v250_v26 = vmul.f32 %v1360_v23, %v248_v16  ;;  %v1362_v27 = vpop.eup %1361  ;;  %vm255_vm1 = vweird.f32 %v1360_v23 }
 0x30c   :  { %v300_v28 = vsel %vm297_vm0, %v299_v24, %v295_v25  ;;  %vm256_vm3 = vmor %vm254_vm2, %vm255_vm1  ;;  %v1364_v38 = vpop.eup %1363 }
 0x30d   :  { %v302_v29 = vsel %vm1594_vm5, %v1362_v27, %v300_v28  ;;  %v251_v30 = vsub.f32 1.0, %v250_v26 }
 0x30e   :  { %305 = vrot.lane.b32.xlu2 %v302_v29, %s1495_s30  ;;  %v303_v45 = vmul.f32 %v302_v29, %v1606_v55 }
 0x30f   :  { %v252_v32 = vmul.f32 %v1360_v23, %v251_v30 }
 0x311   :  { %v253_v35 = vadd.f32 %v1360_v23, %v252_v32 }
 0x313   :  { %v257_v37 = vsel %vm256_vm3, %v1360_v23, %v253_v35 }
 0x314   :  { %v262_v39 = vsel %vm259_vm4, %v261_v36, %v257_v37 }
 0x315   :  { %v264_v40 = vsel %vm1594_vm5, %v1364_v38, %v262_v39 }
 0x316   :  { %267 = vrot.lane.b32.xlu0 %v264_v40, %s1495_s30  ;;  %v265_v48 = vmul.f32 %v264_v40, %v1609_v59  ;;  %v1297_v59 = vld [vmem:[%s1890_s0 + $0x14] sm:$0xf] }
 0x317   :  { %v390_v60 = vrot.slane %v1297_v59, 2 }
 0x368   :  { %v306_v41 = vpop.permute.xlu2 %305 }
 0x369   :  { %v308_v42 = vmul.f32 %v306_v41, %v302_v29 }
 0x36b   :  { %310 = vrot.lane.b32.xlu1 %v308_v42, %s1496_s4 }
 0x388   :  { %v268_v43 = vpop.permute.xlu0 %267 }
 0x389   :  { %v270_v44 = vmul.f32 %v268_v43, %v264_v40 }
 0x38b   :  { %272 = vrot.lane.b32.xlu2 %v270_v44, %s1496_s4 }
 0x3dd   :  { %v311_v46 = vpop.permute.xlu1 %310 }
 0x3de   :  { %v1643_v47 = vadd.f32 %v311_v46, %v303_v45 }
 0x3e0   :  { %1365 = vtanh.f32 %v1643_v47 }
 0x3e5   :  { %v273_v49 = vpop.permute.xlu2 %272 }
 0x3e6   :  { %v1366_v50 = vpop.eup %1365  ;;  %v1647_v51 = vadd.f32 %v273_v49, %v265_v48 }
 0x3e7   :  { %316 = vrot.lane.b32.xlu0 %v1366_v50, %s1495_s30 }
 0x3e8   :  { %1367 = vtanh.f32 %v1647_v51 }
 0x3ee   :  { %v1368_v52 = vpop.eup %1367 }
 0x3ef   :  { %278 = vrot.lane.b32.xlu1 %v1368_v52, %s1495_s30 }
 0x459   :  { %v317_v53 = vpop.permute.xlu0 %316 }
 0x45a   :  { %v319_v54 = vmul.f32 %v317_v53, %v302_v29 }
 0x45c   :  { %327 = vrot.lane.b32.xlu2 %v319_v54, %s1496_s4 }
 0x461   :  { %v279_v55 = vpop.permute.xlu1 %278 }
 0x462   :  { %v281_v56 = vmul.f32 %v279_v55, %v264_v40 }
 0x464   :  { %321 = vrot.lane.b32.xlu0 %v281_v56, %s1496_s4  ;;  %v1302_v56 = vld [vmem:[%s1890_s0 + $0xc] sm:$0xf] }
 0x4b6   :  { %v328_v57 = vpop.permute.xlu2 %327 }
 0x4b7   :  { %331 = vst.msk [vmem:[#allocation3 + $0xc] sm:$0x3] %vm175_vm11, %v328_v57  ;;  %1299 = vmatmul.msk.f32.vlgmr.msrb.gmra.mxu1 %vm42_vm12, %v328_v57 }
 0x4d6   :  { %v322_v58 = vpop.permute.xlu0 %321 }
 0x4d7   :  { %325 = vst.msk [vmem:[#allocation2 + $0x2] sm:$0x3] %vm175_vm11, %v322_v58  ;;  %1298 = vmatmul.msk.f32.vlgmr.msrb.gmra.mxu0 %vm42_vm12, %v322_v58 }
 0x534   :  { %v386_v61 = vpop.f32.mrf.mxu1 }
 0x535   :  { %v392_v62 = vadd.f32 %v390_v60, %v386_v61 }
 0x537   :  { %v1301_v63 = vmul.f32 -1.442695, %v392_v62 }
 0x539   :  { %1369 = vpow2.f32 %v1301_v63 }
 0x53f   :  { %v1370_v8 = vpop.eup %1369 }
 0x540   :  { %v435_v9 = vadd.f32 1.0, %v1370_v8 }
 0x542   :  { %1371 = vrcp.f32 %v435_v9  ;;  %v447_v4 = vand.u32 2147483648, %v435_v9  ;;  %v445_v6 = vand.u32 2147483647, %v435_v9  ;;  %vm441_vm7 = vweird.f32 %v435_v9 }
 0x543   :  { %1373 = vtanh.f32 %v392_v62 }
 0x544   :  { %v448_v2 = vor.u32 1.1754944e-38, %v447_v4  ;;  %vm446_vm9 = vcmp.eq.f32.partialorder %v445_v6, 8.507059e+37 }
 0x548   :  { %v1372_v10 = vpop.eup %1371 }
 0x549   :  { %v437_v0 = vmul.f32 %v1372_v10, %v435_v9  ;;  %vm442_vm6 = vweird.f32 %v1372_v10  ;;  %v1374_v3 = vpop.eup %1373 }
 0x54a   :  { %vm443_vm8 = vmor %vm441_vm7, %vm442_vm6 }
 0x54b   :  { %v438_v1 = vsub.f32 1.0, %v437_v0 }
 0x54d   :  { %v439_v11 = vmul.f32 %v1372_v10, %v438_v1 }
 0x54f   :  { %v440_v12 = vadd.f32 %v1372_v10, %v439_v11 }
 0x551   :  { %v444_v13 = vsel %vm443_vm8, %v1372_v10, %v440_v12 }
 0x552   :  { %v449_v5 = vsel %vm446_vm9, %v448_v2, %v444_v13 }
 0x553   :  { %v451_v7 = vsel %vm1594_vm5, %v1374_v3, %v449_v5 }
 0x554   :  { %v359_v15 = vpop.f32.mrf.mxu0  ;;  %454 = vrot.lane.b32.xlu1 %v451_v7, %s1495_s30  ;;  %v452_v37 = vmul.f32 %v451_v7, %v1643_v47 }
 0x555   :  { %v362_v16 = vadd.f32 %v1296_v14, %v359_v15 }
 0x557   :  { %v1300_v17 = vmul.f32 -1.442695, %v362_v16 }
 0x559   :  { %1375 = vpow2.f32 %v1300_v17 }
 0x55f   :  { %v1376_v18 = vpop.eup %1375 }
 0x560   :  { %v397_v19 = vadd.f32 1.0, %v1376_v18 }
 0x562   :  { %1377 = vrcp.f32 %v397_v19  ;;  %v409_v23 = vand.u32 2147483648, %v397_v19  ;;  %v407_v25 = vand.u32 2147483647, %v397_v19  ;;  %vm403_vm13 = vweird.f32 %v397_v19 }
 0x563   :  { %1379 = vtanh.f32 %v362_v16 }
 0x564   :  { %v410_v27 = vor.u32 1.1754944e-38, %v409_v23  ;;  %vm408_vm15 = vcmp.eq.f32.partialorder %v407_v25, 8.507059e+37 }
 0x568   :  { %v1378_v20 = vpop.eup %1377 }
 0x569   :  { %v399_v21 = vmul.f32 %v1378_v20, %v397_v19  ;;  %vm404_vm10 = vweird.f32 %v1378_v20  ;;  %v1380_v29 = vpop.eup %1379 }
 0x56a   :  { %vm405_vm14 = vmor %vm403_vm13, %vm404_vm10 }
 0x56b   :  { %v400_v22 = vsub.f32 1.0, %v399_v21 }
 0x56d   :  { %v401_v24 = vmul.f32 %v1378_v20, %v400_v22 }
 0x56f   :  { %v402_v26 = vadd.f32 %v1378_v20, %v401_v24 }
 0x571   :  { %v406_v28 = vsel %vm405_vm14, %v1378_v20, %v402_v26 }
 0x572   :  { %v411_v30 = vsel %vm408_vm15, %v410_v27, %v406_v28 }
 0x573   :  { %v413_v31 = vsel %vm1594_vm5, %v1380_v29, %v411_v30 }
 0x574   :  { %416 = vrot.lane.b32.xlu2 %v413_v31, %s1495_s30  ;;  %v414_v40 = vmul.f32 %v413_v31, %v1647_v51  ;;  %v1303_v51 = vld [vmem:[%s1890_s0 + $0x10] sm:$0xf] }
 0x575   :  { %v539_v52 = vrot.slane %v1303_v51, 2 }
 0x5c6   :  { %v455_v32 = vpop.permute.xlu1 %454 }
 0x5c7   :  { %v457_v34 = vmul.f32 %v455_v32, %v451_v7 }
 0x5c9   :  { %459 = vrot.lane.b32.xlu0 %v457_v34, %s1496_s4 }
 0x5ce   :  { %v417_v35 = vpop.permute.xlu2 %416 }
 0x5cf   :  { %v419_v36 = vmul.f32 %v417_v35, %v413_v31 }
 0x5d1   :  { %421 = vrot.lane.b32.xlu1 %v419_v36, %s1496_s4 }
 0x63b   :  { %v460_v38 = vpop.permute.xlu0 %459 }
 0x63c   :  { %v1673_v39 = vadd.f32 %v460_v38, %v452_v37 }
 0x63e   :  { %1381 = vtanh.f32 %v1673_v39 }
 0x643   :  { %v422_v41 = vpop.permute.xlu1 %421 }
 0x644   :  { %v1382_v42 = vpop.eup %1381  ;;  %v1677_v43 = vadd.f32 %v422_v41, %v414_v40 }
 0x645   :  { %465 = vrot.lane.b32.xlu2 %v1382_v42, %s1495_s30 }
 0x646   :  { %1383 = vtanh.f32 %v1677_v43 }
 0x64c   :  { %v1384_v44 = vpop.eup %1383 }
 0x64d   :  { %427 = vrot.lane.b32.xlu0 %v1384_v44, %s1495_s30 }
 0x69f   :  { %v466_v45 = vpop.permute.xlu2 %465 }
 0x6a0   :  { %v468_v46 = vmul.f32 %v466_v45, %v451_v7 }
 0x6a2   :  { %476 = vrot.lane.b32.xlu1 %v468_v46, %s1496_s4 }
 0x6bf   :  { %v428_v47 = vpop.permute.xlu0 %427 }
 0x6c0   :  { %v430_v48 = vmul.f32 %v428_v47, %v413_v31 }
 0x6c2   :  { %470 = vrot.lane.b32.xlu2 %v430_v48, %s1496_s4  ;;  %v1308_v48 = vld [vmem:[%s1890_s0 + $0x10] sm:$0xf] }
 0x714   :  { %v477_v49 = vpop.permute.xlu1 %476 }
 0x715   :  { %480 = vst.msk [vmem:[#allocation3 + $0xa] sm:$0x3] %vm175_vm11, %v477_v49  ;;  %1305 = vmatmul.msk.f32.vlgmr.msrb.gmra.mxu3 %vm42_vm12, %v477_v49 }
 0x71c   :  { %v471_v50 = vpop.permute.xlu2 %470 }
 0x71d   :  { %474 = vst.msk [vmem:[#allocation2 + $0x4] sm:$0x3] %vm175_vm11, %v471_v50  ;;  %1304 = vmatmul.msk.f32.vlgmr.msrb.gmra.mxu2 %vm42_vm12, %v471_v50 }
 0x798   :  { %v535_v53 = vpop.f32.mrf.mxu3 }
 0x799   :  { %v541_v54 = vadd.f32 %v539_v52, %v535_v53 }
 0x79b   :  { %v1307_v55 = vmul.f32 -1.442695, %v541_v54 }
 0x79d   :  { %1385 = vpow2.f32 %v1307_v55 }
 0x7a0   :  { %v508_v57 = vpop.f32.mrf.mxu2 }
 0x7a1   :  { %v511_v58 = vadd.f32 %v1302_v56, %v508_v57 }
 0x7a3   :  { %v1386_v59 = vpop.eup %1385  ;;  %v1306_v60 = vmul.f32 -1.442695, %v511_v58 }
 0x7a4   :  { %v584_v61 = vadd.f32 1.0, %v1386_v59 }
 0x7a5   :  { %1387 = vpow2.f32 %v1306_v60 }
 0x7a6   :  { %1389 = vrcp.f32 %v584_v61  ;;  %v596_v0 = vand.u32 2147483648, %v584_v61  ;;  %v594_v4 = vand.u32 2147483647, %v584_v61  ;;  %vm590_vm1 = vweird.f32 %v584_v61 }
 0x7a8   :  { %v597_v12 = vor.u32 1.1754944e-38, %v596_v0  ;;  %vm595_vm3 = vcmp.eq.f32.partialorder %v594_v4, 8.507059e+37 }
 0x7ab   :  { %v1388_v62 = vpop.eup %1387 }
 0x7ac   :  { %v1390_v63 = vpop.eup %1389  ;;  %v546_v8 = vadd.f32 1.0, %v1388_v62 }
 0x7ad   :  { %v586_v9 = vmul.f32 %v1390_v63, %v584_v61  ;;  %vm591_vm0 = vweird.f32 %v1390_v63 }
 0x7ae   :  { %1391 = vrcp.f32 %v546_v8  ;;  %vm592_vm2 = vmor %vm590_vm1, %vm591_vm0  ;;  %v558_v15 = vand.u32 2147483648, %v546_v8  ;;  %v556_v17 = vand.u32 2147483647, %v546_v8  ;;  %vm552_vm6 = vweird.f32 %v546_v8 }
 0x7af   :  { %v587_v10 = vsub.f32 1.0, %v586_v9  ;;  %1393 = vtanh.f32 %v541_v54 }
 0x7b0   :  { %1395 = vtanh.f32 %v511_v58  ;;  %v559_v19 = vor.u32 1.1754944e-38, %v558_v15  ;;  %vm557_vm8 = vcmp.eq.f32.partialorder %v556_v17, 8.507059e+37 }
 0x7b1   :  { %v588_v1 = vmul.f32 %v1390_v63, %v587_v10 }
 0x7b3   :  { %v589_v11 = vadd.f32 %v1390_v63, %v588_v1 }
 0x7b4   :  { %v1392_v6 = vpop.eup %1391 }
 0x7b5   :  { %v593_v2 = vsel %vm592_vm2, %v1390_v63, %v589_v11  ;;  %v548_v13 = vmul.f32 %v1392_v6, %v546_v8  ;;  %v1394_v3 = vpop.eup %1393  ;;  %vm553_vm4 = vweird.f32 %v1392_v6 }
 0x7b6   :  { %v598_v14 = vsel %vm595_vm3, %v597_v12, %v593_v2  ;;  %vm554_vm7 = vmor %vm552_vm6, %vm553_vm4  ;;  %v1396_v21 = vpop.eup %1395 }
 0x7b7   :  { %v600_v5 = vsel %vm1594_vm5, %v1394_v3, %v598_v14  ;;  %v549_v7 = vsub.f32 1.0, %v548_v13 }
 0x7b8   :  { %603 = vrot.lane.b32.xlu0 %v600_v5, %s1495_s30  ;;  %v601_v28 = vmul.f32 %v600_v5, %v1673_v39 }
 0x7b9   :  { %v550_v16 = vmul.f32 %v1392_v6, %v549_v7 }
 0x7bb   :  { %v551_v18 = vadd.f32 %v1392_v6, %v550_v16 }
 0x7bd   :  { %v555_v20 = vsel %vm554_vm7, %v1392_v6, %v551_v18 }
 0x7be   :  { %v560_v22 = vsel %vm557_vm8, %v559_v19, %v555_v20 }
 0x7bf   :  { %v562_v23 = vsel %vm1594_vm5, %v1396_v21, %v560_v22 }
 0x7c0   :  { %565 = vrot.lane.b32.xlu1 %v562_v23, %s1495_s30  ;;  %v563_v32 = vmul.f32 %v562_v23, %v1677_v43  ;;  %v1309_v43 = vld [vmem:[%s1890_s0 + $0xc] sm:$0xf] }
 0x7c1   :  { %v686_v44 = vrot.slane %v1309_v43, 2 }
 0x82a   :  { %v604_v24 = vpop.permute.xlu0 %603 }
 0x82b   :  { %v606_v25 = vmul.f32 %v604_v24, %v600_v5 }
 0x82d   :  { %608 = vrot.lane.b32.xlu2 %v606_v25, %s1496_s4 }
 0x832   :  { %v566_v26 = vpop.permute.xlu1 %565 }
 0x833   :  { %v568_v27 = vmul.f32 %v566_v26, %v562_v23 }
 0x835   :  { %570 = vrot.lane.b32.xlu0 %v568_v27, %s1496_s4 }
 0x887   :  { %v609_v29 = vpop.permute.xlu2 %608 }
 0x888   :  { %v1703_v30 = vadd.f32 %v609_v29, %v601_v28 }
 0x88a   :  { %1397 = vtanh.f32 %v1703_v30 }
 0x890   :  { %v1398_v31 = vpop.eup %1397 }
 0x891   :  { %614 = vrot.lane.b32.xlu1 %v1398_v31, %s1495_s30 }
 0x8a7   :  { %v571_v34 = vpop.permute.xlu0 %570 }
 0x8a8   :  { %v1708_v35 = vadd.f32 %v571_v34, %v563_v32 }
 0x8aa   :  { %1399 = vtanh.f32 %v1708_v35 }
 0x8b0   :  { %v1400_v36 = vpop.eup %1399 }
 0x8b1   :  { %576 = vrot.lane.b32.xlu2 %v1400_v36, %s1495_s30 }
 0x903   :  { %v615_v37 = vpop.permute.xlu1 %614 }
 0x904   :  { %v617_v38 = vmul.f32 %v615_v37, %v600_v5 }
 0x906   :  { %625 = vrot.lane.b32.xlu0 %v617_v38, %s1496_s4 }
 0x90b   :  { %v577_v39 = vpop.permute.xlu2 %576 }
 0x90c   :  { %v579_v40 = vmul.f32 %v577_v39, %v562_v23 }
 0x90e   :  { %619 = vrot.lane.b32.xlu1 %v579_v40, %s1496_s4 }
 0x978   :  { %v626_v41 = vpop.permute.xlu0 %625 }
 0x979   :  { %629 = vst.msk [vmem:[#allocation3 + $0x8] sm:$0x3] %vm175_vm11, %v626_v41  ;;  %1311 = vmatmul.msk.f32.vlgmr.msra.gmra.mxu1 %vm42_vm12, %v626_v41 }
 0x980   :  { %v620_v42 = vpop.permute.xlu1 %619 }
 0x981   :  { %623 = vst.msk [vmem:[#allocation2 + $0x6] sm:$0x3] %vm175_vm11, %v620_v42  ;;  %1310 = vmatmul.msk.f32.vlgmr.msra.gmra.mxu0 %vm42_vm12, %v620_v42 }
 0x9f6   :  { %v682_v45 = vpop.f32.mrf.mxu1 }
 0x9f7   :  { %v688_v46 = vadd.f32 %v686_v44, %v682_v45 }
 0x9f9   :  { %v1313_v47 = vmul.f32 -1.442695, %v688_v46 }
 0x9fb   :  { %1401 = vpow2.f32 %v1313_v47 }
 0x9fe   :  { %v655_v49 = vpop.f32.mrf.mxu0 }
 0x9ff   :  { %v658_v50 = vadd.f32 %v1308_v48, %v655_v49 }
 0xa01   :  { %v1402_v51 = vpop.eup %1401  ;;  %v1312_v52 = vmul.f32 -1.442695, %v658_v50 }
 0xa02   :  { %v731_v53 = vadd.f32 1.0, %v1402_v51 }
 0xa03   :  { %1403 = vpow2.f32 %v1312_v52  ;;  %v1314_v52 = vld [vmem:[%s1890_s0 + $0x14] sm:$0xf] }
 0xa04   :  { %1405 = vrcp.f32 %v731_v53  ;;  %v743_v59 = vand.u32 2147483648, %v731_v53  ;;  %v741_v61 = vand.u32 2147483647, %v731_v53  ;;  %vm737_vm10 = vweird.f32 %v731_v53 }
 0xa06   :  { %v744_v8 = vor.u32 1.1754944e-38, %v743_v59  ;;  %vm742_vm14 = vcmp.eq.f32.partialorder %v741_v61, 8.507059e+37 }
 0xa09   :  { %v1404_v54 = vpop.eup %1403 }
 0xa0a   :  { %v1406_v55 = vpop.eup %1405  ;;  %v693_v56 = vadd.f32 1.0, %v1404_v54 }
 0xa0b   :  { %v733_v57 = vmul.f32 %v1406_v55, %v731_v53  ;;  %vm738_vm9 = vweird.f32 %v1406_v55 }
 0xa0c   :  { %1407 = vrcp.f32 %v693_v56  ;;  %vm739_vm13 = vmor %vm737_vm10, %vm738_vm9  ;;  %v705_v6 = vand.u32 2147483648, %v693_v56  ;;  %v703_v2 = vand.u32 2147483647, %v693_v56  ;;  %vm699_vm0 = vweird.f32 %v693_v56 }
 0xa0d   :  { %v734_v58 = vsub.f32 1.0, %v733_v57  ;;  %1409 = vtanh.f32 %v688_v46 }
 0xa0e   :  { %1411 = vtanh.f32 %v658_v50  ;;  %v706_v3 = vor.u32 1.1754944e-38, %v705_v6  ;;  %vm704_vm2 = vcmp.eq.f32.partialorder %v703_v2, 8.507059e+37 }
 0xa0f   :  { %v735_v60 = vmul.f32 %v1406_v55, %v734_v58 }
 0xa11   :  { %v736_v62 = vadd.f32 %v1406_v55, %v735_v60 }
 0xa12   :  { %v1408_v63 = vpop.eup %1407 }
 0xa13   :  { %v740_v9 = vsel %vm739_vm13, %v1406_v55, %v736_v62  ;;  %v695_v10 = vmul.f32 %v1408_v63, %v693_v56  ;;  %v1410_v0 = vpop.eup %1409  ;;  %vm700_vm15 = vweird.f32 %v1408_v63 }
 0xa14   :  { %v745_v1 = vsel %vm742_vm14, %v744_v8, %v740_v9  ;;  %vm701_vm1 = vmor %vm699_vm0, %vm700_vm15  ;;  %v1412_v5 = vpop.eup %1411 }
 0xa15   :  { %v747_v4 = vsel %vm1594_vm5, %v1410_v0, %v745_v1  ;;  %v696_v11 = vsub.f32 1.0, %v695_v10 }
 0xa16   :  { %750 = vrot.lane.b32.xlu2 %v747_v4, %s1495_s30  ;;  %v748_v20 = vmul.f32 %v747_v4, %v1703_v30 }
 0xa17   :  { %v697_v12 = vmul.f32 %v1408_v63, %v696_v11 }
 0xa19   :  { %v698_v13 = vadd.f32 %v1408_v63, %v697_v12 }
 0xa1b   :  { %v702_v14 = vsel %vm701_vm1, %v1408_v63, %v698_v13 }
 0xa1c   :  { %v707_v7 = vsel %vm704_vm2, %v706_v3, %v702_v14 }
 0xa1d   :  { %v709_v15 = vsel %vm1594_vm5, %v1412_v5, %v707_v7 }
 0xa1e   :  { %712 = vrot.lane.b32.xlu0 %v709_v15, %s1495_s30  ;;  %v710_v23 = vmul.f32 %v709_v15, %v1708_v35  ;;  %v1315_v35 = vld [vmem:[%s1890_s0 + $0x8] sm:$0xf] }
 0xa1f   :  { %v833_v36 = vrot.slane %v1315_v35, 2  ;;  %v1321_v35 = vld [vmem:[%s1890_s0 + $0x4] sm:$0xf] }
 0xa70   :  { %v751_v16 = vpop.permute.xlu2 %750 }
 0xa71   :  { %v753_v17 = vmul.f32 %v751_v16, %v747_v4 }
 0xa73   :  { %755 = vrot.lane.b32.xlu1 %v753_v17, %s1496_s4 }
 0xa90   :  { %v713_v18 = vpop.permute.xlu0 %712 }
 0xa91   :  { %v715_v19 = vmul.f32 %v713_v18, %v709_v15 }
 0xa93   :  { %717 = vrot.lane.b32.xlu2 %v715_v19, %s1496_s4 }
 0xae5   :  { %v756_v21 = vpop.permute.xlu1 %755 }
 0xae6   :  { %v1733_v22 = vadd.f32 %v756_v21, %v748_v20 }
 0xae8   :  { %1413 = vtanh.f32 %v1733_v22 }
 0xaed   :  { %v718_v24 = vpop.permute.xlu2 %717 }
 0xaee   :  { %v1414_v25 = vpop.eup %1413  ;;  %v1737_v26 = vadd.f32 %v718_v24, %v710_v23  ;;  %v955_v23 = vld [vmem:[#allocation4 + $0x10] sm:$0xff]  ;;  %v954_v24 = vld [vmem:[#allocation4 + $0x8] sm:$0xff] }
 0xaef   :  { %761 = vrot.lane.b32.xlu0 %v1414_v25, %s1495_s30  ;;  %v953_v25 = vld [vmem:[#allocation4] sm:$0xff] }
 0xaf0   :  { %1415 = vtanh.f32 %v1737_v26 }
 0xaf6   :  { %v1416_v27 = vpop.eup %1415 }
 0xaf7   :  { %723 = vrot.lane.b32.xlu1 %v1416_v27, %s1495_s30 }
 0xb61   :  { %v762_v28 = vpop.permute.xlu0 %761 }
 0xb62   :  { %v764_v29 = vmul.f32 %v762_v28, %v747_v4  ;;  %v929_v28 = vld [vmem:[%s1891_s1 + $0x18] sm:$0xff] }
 0xb63   :  { %944 = vmatpush.msrb.mxu0 %v929_v28  ;;  %1091 = vmatpush.msrb.mxu2 %v929_v28 }
 0xb64   :  { %772 = vrot.lane.b32.xlu2 %v764_v29, %s1496_s4  ;;  %v928_v29 = vld [vmem:[%s1891_s1 + $0x10] sm:$0xff] }
 0xb65   :  { %945 = vmatpush.msrb.mxu0 %v928_v29  ;;  %1092 = vmatpush.msrb.mxu2 %v928_v29 }
 0xb69   :  { %v724_v30 = vpop.permute.xlu1 %723 }
 0xb6a   :  { %v726_v31 = vmul.f32 %v724_v30, %v709_v15  ;;  %v927_v30 = vld [vmem:[%s1891_s1 + $0x8] sm:$0xff] }
 0xb6b   :  { %946 = vmatpush.msrb.mxu0 %v927_v30  ;;  %1093 = vmatpush.msrb.mxu2 %v927_v30 }
 0xb6c   :  { %766 = vrot.lane.b32.xlu0 %v726_v31, %s1496_s4  ;;  %v926_v31 = vld [vmem:[%s1891_s1] sm:$0xff] }
 0xb6d   :  { %947 = vmatpush.msrb.mxu0 %v926_v31  ;;  %1094 = vmatpush.msrb.mxu2 %v926_v31  ;;  %v1326_v31 = vld [vmem:[%s1890_s0 + $0x1c] sm:$0xf] }
 0xbbe   :  { %v773_v32 = vpop.permute.xlu2 %772 }
 0xbbf   :  { %776 = vst.msk [vmem:[#allocation3 + $0x6] sm:$0x3] %vm175_vm11, %v773_v32  ;;  %1317 = vmatmul.msk.f32.vlgmr.msra.gmra.mxu3 %vm42_vm12, %v773_v32 }
 0xbde   :  { %v767_v34 = vpop.permute.xlu0 %766 }
 0xbdf   :  { %770 = vst.msk [vmem:[#allocation2 + $0x8] sm:$0x3] %vm175_vm11, %v767_v34  ;;  %1316 = vmatmul.msk.f32.vlgmr.msra.gmra.mxu2 %vm42_vm12, %v767_v34 }
 0xc42   :  { %v829_v37 = vpop.f32.mrf.mxu3 }
 0xc43   :  { %v835_v38 = vadd.f32 %v833_v36, %v829_v37  ;;  %v980_v36 = vrot.slane %v1321_v35, 2 }
 0xc45   :  { %v1319_v39 = vmul.f32 -1.442695, %v835_v38 }
 0xc47   :  { %1417 = vpow2.f32 %v1319_v39 }
 0xc4d   :  { %v1418_v40 = vpop.eup %1417 }
 0xc4e   :  { %v878_v41 = vadd.f32 1.0, %v1418_v40  ;;  %v1320_v40 = vld [vmem:[%s1890_s0 + $0x18] sm:$0xf] }
 0xc50   :  { %1419 = vrcp.f32 %v878_v41  ;;  %v890_v45 = vand.u32 2147483648, %v878_v41  ;;  %v888_v47 = vand.u32 2147483647, %v878_v41  ;;  %vm884_vm4 = vweird.f32 %v878_v41 }
 0xc51   :  { %1421 = vtanh.f32 %v835_v38 }
 0xc52   :  { %v891_v49 = vor.u32 1.1754944e-38, %v890_v45  ;;  %vm889_vm7 = vcmp.eq.f32.partialorder %v888_v47, 8.507059e+37 }
 0xc56   :  { %v1420_v42 = vpop.eup %1419 }
 0xc57   :  { %v880_v43 = vmul.f32 %v1420_v42, %v878_v41  ;;  %vm885_vm3 = vweird.f32 %v1420_v42  ;;  %v1422_v51 = vpop.eup %1421 }
 0xc58   :  { %vm886_vm6 = vmor %vm884_vm4, %vm885_vm3 }
 0xc59   :  { %v881_v44 = vsub.f32 1.0, %v880_v43 }
 0xc5b   :  { %v882_v46 = vmul.f32 %v1420_v42, %v881_v44 }
 0xc5d   :  { %v883_v48 = vadd.f32 %v1420_v42, %v882_v46 }
 0xc5f   :  { %v887_v50 = vsel %vm886_vm6, %v1420_v42, %v883_v48 }
 0xc60   :  { %v892_v53 = vsel %vm889_vm7, %v891_v49, %v887_v50 }
 0xc61   :  { %v894_v54 = vsel %vm1594_vm5, %v1422_v51, %v892_v53 }
 0xc62   :  { %v802_v55 = vpop.f32.mrf.mxu2  ;;  %897 = vrot.lane.b32.xlu1 %v894_v54, %s1495_s30  ;;  %v895_v14 = vmul.f32 %v894_v54, %v1733_v22  ;;  %v956_v22 = vld [vmem:[#allocation4 + $0x18] sm:$0xff] }
 0xc63   :  { %v805_v56 = vadd.f32 %v1314_v52, %v802_v55  ;;  %971 = vmatpush.msrb.mxu1 %v956_v22  ;;  %1118 = vmatpush.msrb.mxu3 %v956_v22 }
 0xc65   :  { %v1318_v57 = vmul.f32 -1.442695, %v805_v56  ;;  %972 = vmatpush.msrb.mxu1 %v955_v23  ;;  %1119 = vmatpush.msrb.mxu3 %v955_v23 }
 0xc67   :  { %1423 = vpow2.f32 %v1318_v57  ;;  %973 = vmatpush.msrb.mxu1 %v954_v24  ;;  %1120 = vmatpush.msrb.mxu3 %v954_v24 }
 0xc69   :  { %974 = vmatpush.msrb.mxu1 %v953_v25  ;;  %1121 = vmatpush.msrb.mxu3 %v953_v25 }
 0xc6d   :  { %v1424_v58 = vpop.eup %1423 }
 0xc6e   :  { %v840_v59 = vadd.f32 1.0, %v1424_v58 }
 0xc70   :  { %1425 = vrcp.f32 %v840_v59  ;;  %v852_v63 = vand.u32 2147483648, %v840_v59  ;;  %v850_v9 = vand.u32 2147483647, %v840_v59  ;;  %vm846_vm9 = vweird.f32 %v840_v59 }
 0xc71   :  { %1427 = vtanh.f32 %v805_v56 }
 0xc72   :  { %v853_v0 = vor.u32 1.1754944e-38, %v852_v63  ;;  %vm851_vm13 = vcmp.eq.f32.partialorder %v850_v9, 8.507059e+37 }
 0xc76   :  { %v1426_v60 = vpop.eup %1425 }
 0xc77   :  { %v842_v61 = vmul.f32 %v1426_v60, %v840_v59  ;;  %vm847_vm8 = vweird.f32 %v1426_v60  ;;  %v1428_v4 = vpop.eup %1427 }
 0xc78   :  { %vm848_vm10 = vmor %vm846_vm9, %vm847_vm8 }
 0xc79   :  { %v843_v62 = vsub.f32 1.0, %v842_v61 }
 0xc7b   :  { %v844_v8 = vmul.f32 %v1426_v60, %v843_v62 }
 0xc7d   :  { %v845_v10 = vadd.f32 %v1426_v60, %v844_v8 }
 0xc7f   :  { %v849_v1 = vsel %vm848_vm10, %v1426_v60, %v845_v10 }
 0xc80   :  { %v854_v11 = vsel %vm851_vm13, %v853_v0, %v849_v1 }
 0xc81   :  { %v856_v6 = vsel %vm1594_vm5, %v1428_v4, %v854_v11 }
 0xc82   :  { %859 = vrot.lane.b32.xlu2 %v856_v6, %s1495_s30  ;;  %v857_v15 = vmul.f32 %v856_v6, %v1737_v26 }
 0xcd4   :  { %v898_v12 = vpop.permute.xlu1 %897 }
 0xcd5   :  { %v900_v2 = vmul.f32 %v898_v12, %v894_v54 }
 0xcd7   :  { %902 = vrot.lane.b32.xlu0 %v900_v2, %s1496_s4 }
 0xcdc   :  { %v860_v13 = vpop.permute.xlu2 %859 }
 0xcdd   :  { %v862_v3 = vmul.f32 %v860_v13, %v856_v6 }
 0xcdf   :  { %864 = vrot.lane.b32.xlu1 %v862_v3, %s1496_s4 }
 0xd49   :  { %v903_v5 = vpop.permute.xlu0 %902 }
 0xd4a   :  { %v1763_v7 = vadd.f32 %v903_v5, %v895_v14 }
 0xd4c   :  { %1429 = vtanh.f32 %v1763_v7 }
 0xd51   :  { %v865_v16 = vpop.permute.xlu1 %864 }
 0xd52   :  { %v1430_v17 = vpop.eup %1429  ;;  %v1767_v18 = vadd.f32 %v865_v16, %v857_v15 }
 0xd53   :  { %908 = vrot.lane.b32.xlu2 %v1430_v17, %s1495_s30 }
 0xd54   :  { %1431 = vtanh.f32 %v1767_v18 }
 0xd5a   :  { %v1432_v19 = vpop.eup %1431 }
 0xd5b   :  { %870 = vrot.lane.b32.xlu0 %v1432_v19, %s1495_s30 }
 0xdad   :  { %v909_v20 = vpop.permute.xlu2 %908 }
 0xdae   :  { %v911_v21 = vmul.f32 %v909_v20, %v894_v54 }
 0xdb0   :  { %919 = vrot.lane.b32.xlu1 %v911_v21, %s1496_s4 }
 0xdcd   :  { %v871_v26 = vpop.permute.xlu0 %870 }
 0xdce   :  { %v873_v27 = vmul.f32 %v871_v26, %v856_v6  ;;  %v1072_v26 = vld [vmem:[%s1890_s0] sm:$0xf] }
 0xdd0   :  { %913 = vrot.lane.b32.xlu2 %v873_v27, %s1496_s4  ;;  %v1127_v27 = vrot.slane %v1072_v26, 2  ;;  %v1232_v26 = vld [vmem:[#allocation3 + $0xe] sm:$0x3] }
 0xe22   :  { %v920_v32 = vpop.permute.xlu1 %919 }
 0xe23   :  { %923 = vst.msk [vmem:[#allocation3 + $0x4] sm:$0x3] %vm175_vm11, %v920_v32  ;;  %1323 = vmatmul.msk.f32.vlgmr.msrb.gmra.mxu1 %vm42_vm12, %v920_v32 }
 0xe2a   :  { %v914_v34 = vpop.permute.xlu2 %913 }
 0xe2b   :  { %917 = vst.msk [vmem:[#allocation2 + $0xa] sm:$0x3] %vm175_vm11, %v914_v34  ;;  %1322 = vmatmul.msk.f32.vlgmr.msrb.gmra.mxu0 %vm42_vm12, %v914_v34 }
 0xea0   :  { %v976_v37 = vpop.f32.mrf.mxu1 }
 0xea1   :  { %v982_v38 = vadd.f32 %v980_v36, %v976_v37 }
 0xea3   :  { %v1325_v39 = vmul.f32 -1.442695, %v982_v38 }
 0xea5   :  { %1433 = vpow2.f32 %v1325_v39 }
 0xea8   :  { %v949_v41 = vpop.f32.mrf.mxu0 }
 0xea9   :  { %v952_v42 = vadd.f32 %v1320_v40, %v949_v41 }
 0xeab   :  { %v1434_v43 = vpop.eup %1433  ;;  %v1324_v44 = vmul.f32 -1.442695, %v952_v42 }
 0xeac   :  { %v1025_v45 = vadd.f32 1.0, %v1434_v43 }
 0xead   :  { %1435 = vpow2.f32 %v1324_v44 }
 0xeae   :  { %1437 = vrcp.f32 %v1025_v45  ;;  %v1037_v51 = vand.u32 2147483648, %v1025_v45  ;;  %v1035_v53 = vand.u32 2147483647, %v1025_v45  ;;  %vm1031_vm15 = vweird.f32 %v1025_v45 }
 0xeb0   :  { %v1038_v56 = vor.u32 1.1754944e-38, %v1037_v51  ;;  %vm1036_vm1 = vcmp.eq.f32.partialorder %v1035_v53, 8.507059e+37 }
 0xeb3   :  { %v1436_v46 = vpop.eup %1435 }
 0xeb4   :  { %v1438_v47 = vpop.eup %1437  ;;  %v987_v48 = vadd.f32 1.0, %v1436_v46 }
 0xeb5   :  { %v1027_v49 = vmul.f32 %v1438_v47, %v1025_v45  ;;  %vm1032_vm14 = vweird.f32 %v1438_v47 }
 0xeb6   :  { %1439 = vrcp.f32 %v987_v48  ;;  %vm1033_vm0 = vmor %vm1031_vm15, %vm1032_vm14  ;;  %v999_v63 = vand.u32 2147483648, %v987_v48  ;;  %v997_v9 = vand.u32 2147483647, %v987_v48  ;;  %vm993_vm3 = vweird.f32 %v987_v48 }
 0xeb7   :  { %v1028_v50 = vsub.f32 1.0, %v1027_v49  ;;  %1441 = vtanh.f32 %v982_v38 }
 0xeb8   :  { %1443 = vtanh.f32 %v952_v42  ;;  %v1000_v0 = vor.u32 1.1754944e-38, %v999_v63  ;;  %vm998_vm6 = vcmp.eq.f32.partialorder %v997_v9, 8.507059e+37 }
 0xeb9   :  { %v1029_v52 = vmul.f32 %v1438_v47, %v1028_v50 }
 0xebb   :  { %v1030_v54 = vadd.f32 %v1438_v47, %v1029_v52 }
 0xebc   :  { %v1440_v55 = vpop.eup %1439 }
 0xebd   :  { %v1034_v57 = vsel %vm1033_vm0, %v1438_v47, %v1030_v54  ;;  %v989_v58 = vmul.f32 %v1440_v55, %v987_v48  ;;  %v1442_v59 = vpop.eup %1441  ;;  %vm994_vm2 = vweird.f32 %v1440_v55 }
 0xebe   :  { %v1039_v60 = vsel %vm1036_vm1, %v1038_v56, %v1034_v57  ;;  %vm995_vm4 = vmor %vm993_vm3, %vm994_vm2  ;;  %v1444_v4 = vpop.eup %1443 }
 0xebf   :  { %v1041_v61 = vsel %vm1594_vm5, %v1442_v59, %v1039_v60  ;;  %v990_v62 = vsub.f32 1.0, %v989_v58 }
 0xec0   :  { %1044 = vrot.lane.b32.xlu0 %v1041_v61, %s1495_s30  ;;  %v1042_v14 = vmul.f32 %v1041_v61, %v1763_v7 }
 0xec1   :  { %v991_v8 = vmul.f32 %v1440_v55, %v990_v62 }
 0xec3   :  { %v992_v10 = vadd.f32 %v1440_v55, %v991_v8 }
 0xec5   :  { %v996_v1 = vsel %vm995_vm4, %v1440_v55, %v992_v10 }
 0xec6   :  { %v1001_v11 = vsel %vm998_vm6, %v1000_v0, %v996_v1 }
 0xec7   :  { %v1003_v6 = vsel %vm1594_vm5, %v1444_v4, %v1001_v11 }
 0xec8   :  { %1006 = vrot.lane.b32.xlu1 %v1003_v6, %s1495_s30  ;;  %v1004_v17 = vmul.f32 %v1003_v6, %v1767_v18 }
 0xf32   :  { %v1045_v12 = vpop.permute.xlu0 %1044 }
 0xf33   :  { %v1047_v2 = vmul.f32 %v1045_v12, %v1041_v61 }
 0xf35   :  { %1049 = vrot.lane.b32.xlu2 %v1047_v2, %s1496_s4 }
 0xf3a   :  { %v1007_v13 = vpop.permute.xlu1 %1006 }
 0xf3b   :  { %v1009_v3 = vmul.f32 %v1007_v13, %v1003_v6 }
 0xf3d   :  { %1011 = vrot.lane.b32.xlu0 %v1009_v3, %s1496_s4  ;;  %v1227_v3 = vld [vmem:[#allocation3 + $0x4] sm:$0x3] }
 0xf8f   :  { %v1050_v5 = vpop.permute.xlu2 %1049 }
 0xf90   :  { %v1805_v15 = vadd.f32 %v1050_v5, %v1042_v14  ;;  %v1228_v14 = vld [vmem:[#allocation3 + $0x6] sm:$0x3] }
 0xf92   :  { %1445 = vtanh.f32 %v1805_v15 }
 0xf98   :  { %v1446_v16 = vpop.eup %1445 }
 0xf99   :  { %1055 = vrot.lane.b32.xlu1 %v1446_v16, %s1495_s30  ;;  %v1219_v16 = vld [vmem:[#allocation2 + $0x4] sm:$0x3] }
 0xfaf   :  { %v1012_v19 = vpop.permute.xlu0 %1011 }
 0xfb0   :  { %v1810_v20 = vadd.f32 %v1012_v19, %v1004_v17 }
 0xfb2   :  { %1447 = vtanh.f32 %v1810_v20 }
 0xfb8   :  { %v1448_v21 = vpop.eup %1447 }
 0xfb9   :  { %1017 = vrot.lane.b32.xlu2 %v1448_v21, %s1495_s30 }
0x100b   :  { %v1056_v22 = vpop.permute.xlu1 %1055 }
0x100c   :  { %v1058_v7 = vmul.f32 %v1056_v22, %v1041_v61 }
0x100e   :  { %1066 = vrot.lane.b32.xlu0 %v1058_v7, %s1496_s4  ;;  %v1220_v7 = vld [vmem:[#allocation2 + $0x6] sm:$0x3] }
0x1013   :  { %v1018_v23 = vpop.permute.xlu2 %1017 }
0x1014   :  { %v1020_v24 = vmul.f32 %v1018_v23, %v1003_v6 }
0x1016   :  { %1060 = vrot.lane.b32.xlu1 %v1020_v24, %s1496_s4 }
0x1080   :  { %v1067_v25 = vpop.permute.xlu0 %1066 }
0x1081   :  { %1070 = vst.msk [vmem:[#allocation3 + $0x2] sm:$0x3] %vm175_vm11, %v1067_v25  ;;  %1328 = vmatmul.msk.f32.vlgmr.msrb.gmra.mxu3 %vm42_vm12, %v1067_v25  ;;  %v1229_v25 = vld [vmem:[#allocation3 + $0x8] sm:$0x3] }
0x1088   :  { %v1061_v18 = vpop.permute.xlu1 %1060  ;;  %v1226_v22 = vld [vmem:[#allocation3 + $0x2] sm:$0x3] }
0x1089   :  { %1064 = vst.msk [vmem:[#allocation2 + $0xc] sm:$0x3] %vm175_vm11, %v1061_v18  ;;  %1327 = vmatmul.msk.f32.vlgmr.msrb.gmra.mxu2 %vm42_vm12, %v1061_v18  ;;  %v1230_v18 = vld [vmem:[#allocation3 + $0xa] sm:$0x3] }
0x1104   :  { %v1123_v28 = vpop.f32.mrf.mxu3 }
0x1105   :  { %v1129_v29 = vadd.f32 %v1127_v27, %v1123_v28  ;;  %v1218_v28 = vld [vmem:[#allocation2 + $0x2] sm:$0x3] }
0x1107   :  { %v1330_v30 = vmul.f32 -1.442695, %v1129_v29 }
0x1109   :  { %1449 = vpow2.f32 %v1330_v30 }
0x110c   :  { %v1096_v32 = vpop.f32.mrf.mxu2 }
0x110d   :  { %v1099_v34 = vadd.f32 %v1326_v31, %v1096_v32  ;;  %v1221_v32 = vld [vmem:[#allocation2 + $0x8] sm:$0x3] }
0x110f   :  { %v1450_v35 = vpop.eup %1449  ;;  %v1329_v36 = vmul.f32 -1.442695, %v1099_v34 }
0x1110   :  { %v1172_v37 = vadd.f32 1.0, %v1450_v35  ;;  %v1231_v35 = vld [vmem:[#allocation3 + $0xc] sm:$0x3] }
0x1111   :  { %1451 = vpow2.f32 %v1329_v36 }
0x1112   :  { %1453 = vrcp.f32 %v1172_v37  ;;  %v1184_v43 = vand.u32 2147483648, %v1172_v37  ;;  %v1182_v45 = vand.u32 2147483647, %v1172_v37  ;;  %vm1178_vm8 = vweird.f32 %v1172_v37 }
0x1114   :  { %v1185_v48 = vor.u32 1.1754944e-38, %v1184_v43  ;;  %vm1183_vm10 = vcmp.eq.f32.partialorder %v1182_v45, 8.507059e+37 }
0x1117   :  { %v1452_v38 = vpop.eup %1451 }
0x1118   :  { %v1454_v39 = vpop.eup %1453  ;;  %v1134_v40 = vadd.f32 1.0, %v1452_v38 }
0x1119   :  { %v1174_v41 = vmul.f32 %v1454_v39, %v1172_v37  ;;  %vm1179_vm7 = vweird.f32 %v1454_v39 }
0x111a   :  { %1455 = vrcp.f32 %v1134_v40  ;;  %vm1180_vm9 = vmor %vm1178_vm8, %vm1179_vm7  ;;  %v1146_v55 = vand.u32 2147483648, %v1134_v40  ;;  %v1144_v57 = vand.u32 2147483647, %v1134_v40  ;;  %vm1140_vm14 = vweird.f32 %v1134_v40 }
0x111b   :  { %v1175_v42 = vsub.f32 1.0, %v1174_v41  ;;  %1457 = vtanh.f32 %v1129_v29 }
0x111c   :  { %1459 = vtanh.f32 %v1099_v34  ;;  %v1147_v59 = vor.u32 1.1754944e-38, %v1146_v55  ;;  %vm1145_vm0 = vcmp.eq.f32.partialorder %v1144_v57, 8.507059e+37 }
0x111d   :  { %v1176_v44 = vmul.f32 %v1454_v39, %v1175_v42 }
0x111f   :  { %v1177_v46 = vadd.f32 %v1454_v39, %v1176_v44  ;;  %v1217_v44 = vld [vmem:[#allocation2] sm:$0x3] }
0x1120   :  { %v1456_v47 = vpop.eup %1455 }
0x1121   :  { %v1181_v49 = vsel %vm1180_vm9, %v1454_v39, %v1177_v46  ;;  %v1136_v50 = vmul.f32 %v1456_v47, %v1134_v40  ;;  %v1458_v51 = vpop.eup %1457  ;;  %vm1141_vm13 = vweird.f32 %v1456_v47  ;;  %v1222_v40 = vld [vmem:[#allocation2 + $0xa] sm:$0x3] }
0x1122   :  { %v1186_v52 = vsel %vm1183_vm10, %v1185_v48, %v1181_v49  ;;  %vm1142_vm15 = vmor %vm1140_vm14, %vm1141_vm13  ;;  %v1460_v61 = vpop.eup %1459 }
0x1123   :  { %v1188_v53 = vsel %vm1594_vm5, %v1458_v51, %v1186_v52  ;;  %v1137_v54 = vsub.f32 1.0, %v1136_v50 }
0x1124   :  { %1191 = vrot.lane.b32.xlu2 %v1188_v53, %s1495_s30  ;;  %v1189_v1 = vmul.f32 %v1188_v53, %v1805_v15 }
0x1125   :  { %v1138_v56 = vmul.f32 %v1456_v47, %v1137_v54 }
0x1127   :  { %v1139_v58 = vadd.f32 %v1456_v47, %v1138_v56 }
0x1129   :  { %v1143_v60 = vsel %vm1142_vm15, %v1456_v47, %v1139_v58  ;;  %v1223_v47 = vld [vmem:[#allocation2 + $0xc] sm:$0x3] }
0x112a   :  { %v1148_v62 = vsel %vm1145_vm0, %v1147_v59, %v1143_v60 }
0x112b   :  { %v1150_v63 = vsel %vm1594_vm5, %v1460_v61, %v1148_v62  ;;  %vm1273_vm5 = vcmask 517120  }
0x112c   :  { %1153 = vrot.lane.b32.xlu0 %v1150_v63, %s1495_s30  ;;  %v1151_v6 = vmul.f32 %v1150_v63, %v1810_v20 }
0x117e   :  { %v1192_v8 = vpop.permute.xlu2 %1191 }
0x117f   :  { %v1194_v9 = vmul.f32 %v1192_v8, %v1188_v53 }
0x1181   :  { %1196 = vrot.lane.b32.xlu1 %v1194_v9, %s1496_s4 }
0x119e   :  { %v1154_v10 = vpop.permute.xlu0 %1153 }
0x119f   :  { %v1156_v0 = vmul.f32 %v1154_v10, %v1150_v63 }
0x11a1   :  { %1158 = vrot.lane.b32.xlu2 %v1156_v0, %s1496_s4 }
0x11f3   :  { %v1197_v4 = vpop.permute.xlu1 %1196 }
0x11f4   :  { %v1199_v11 = vadd.f32 %v1197_v4, %v1189_v1 }
0x11f6   :  { %1461 = vtanh.f32 %v1199_v11 }
0x11fb   :  { %v1159_v12 = vpop.permute.xlu2 %1158 }
0x11fc   :  { %v1462_v33 = vpop.eup %1461  ;;  %v1161_v2 = vadd.f32 %v1159_v12, %v1151_v6 }
0x11fd   :  { %1202 = vrot.lane.b32.xlu0 %v1462_v33, %s1495_s30 }
0x11fe   :  { %1463 = vtanh.f32 %v1161_v2 }
0x1204   :  { %v1464_v13 = vpop.eup %1463 }
0x1205   :  { %1245 = vrot.lane.b32.xlu0 %v1227_v3, %s1496_s4  ;;  %1164 = vrot.lane.b32.xlu1 %v1464_v13, %s1495_s30 }
0x120d   :  { %1247 = vrot.lane.b32.xlu1 %v1228_v14, %s1496_s4 }
0x126f   :  { %v1203_v5 = vpop.permute.xlu0 %1202 }
0x1270   :  { %v1205_v15 = vmul.f32 %v1203_v5, %v1188_v53 }
0x1272   :  { %1213 = vrot.lane.b32.xlu2 %v1205_v15, %s1496_s4 }
0x1277   :  { %v1246_v17 = vpop.permute.xlu0 %1245  ;;  %v1165_v19 = vpop.permute.xlu1 %1164 }
0x1278   :  { %v1267_v20 = vsel %vm42_vm12, %v1219_v16, %v1246_v17  ;;  %v1167_v21 = vmul.f32 %v1165_v19, %v1150_v63 }
0x1279   :  { %1276 = vst.msk [vmem:[%s1893_s3 + $0x4] sm:$0x3] %vm1273_vm5, %v1267_v20 }
0x127a   :  { %1243 = vrot.lane.b32.xlu2 %v1226_v22, %s1496_s4  ;;  %1207 = vrot.lane.b32.xlu0 %v1167_v21, %s1496_s4 }
0x127f   :  { %v1248_v23 = vpop.permute.xlu1 %1247 }
0x1280   :  { %v1268_v24 = vsel %vm42_vm12, %v1220_v7, %v1248_v23 }
0x1281   :  { %1277 = vst.msk [vmem:[%s1893_s3 + $0x6] sm:$0x3] %vm1273_vm5, %v1268_v24 }
0x1282   :  { %1249 = vrot.lane.b32.xlu2 %v1229_v25, %s1496_s4  ;;  %1251 = vrot.lane.b32.xlu0 %v1230_v18, %s1496_s4 }
0x128a   :  { %1255 = vrot.lane.b32.xlu2 %v1232_v26, %s1496_s4 }
0x12cc   :  { %v1214_v27 = vpop.permute.xlu2 %1213 }
0x12cd   :  { %1216 = vst.msk [vmem:[#allocation3] sm:$0x3] %vm175_vm11, %v1214_v27 }
0x12d4   :  { %v1244_v29 = vpop.permute.xlu2 %1243  ;;  %v1225_v30 = vld [vmem:[#allocation3] sm:$0x3] }
0x12d5   :  { %v1266_v31 = vsel %vm42_vm12, %v1218_v28, %v1244_v29  ;;  %1241 = vrot.lane.b32.xlu1 %v1225_v30, %s1496_s4 }
0x12d6   :  { %1275 = vst.msk [vmem:[%s1893_s3 + $0x2] sm:$0x3] %vm1273_vm5, %v1266_v31 }
0x12dc   :  { %v1250_v34 = vpop.permute.xlu2 %1249 }
0x12dd   :  { %v1269_v36 = vsel %vm42_vm12, %v1221_v32, %v1250_v34  ;;  %1253 = vrot.lane.b32.xlu1 %v1231_v35, %s1496_s4 }
0x12de   :  { %1278 = vst.msk [vmem:[%s1893_s3 + $0x8] sm:$0x3] %vm1273_vm5, %v1269_v36 }
0x12e4   :  { %v1256_v38 = vpop.permute.xlu2 %1255 }
0x12ec   :  { %v1208_v37 = vpop.permute.xlu0 %1207 }
0x12ed   :  { %1211 = vst.msk [vmem:[#allocation2 + $0xe] sm:$0x3] %vm175_vm11, %v1208_v37 }
0x12f4   :  { %v1224_v39 = vld [vmem:[#allocation2 + $0xe] sm:$0x3]  ;;  %v1252_v41 = vpop.permute.xlu0 %1251 }
0x12f5   :  { %v1272_v42 = vsel %vm42_vm12, %v1224_v39, %v1256_v38  ;;  %v1270_v43 = vsel %vm42_vm12, %v1222_v40, %v1252_v41 }
0x12f6   :  { %1281 = vst.msk [vmem:[%s1893_s3 + $0xe] sm:$0x3] %vm1273_vm5, %v1272_v42 }
0x12f7   :  { %1279 = vst.msk [vmem:[%s1893_s3 + $0xa] sm:$0x3] %vm1273_vm5, %v1270_v43 }
0x1347   :  { %v1242_v45 = vpop.permute.xlu1 %1241 }
0x1348   :  { %v1265_v46 = vsel %vm42_vm12, %v1217_v44, %v1242_v45 }
0x1349   :  { %1274 = vst.msk [vmem:[%s1893_s3] sm:$0x3] %vm1273_vm5, %v1265_v46 }
0x134f   :  { %v1254_v48 = vpop.permute.xlu1 %1253 }
0x1350   :  { %v1271_v49 = vsel %vm42_vm12, %v1223_v47, %v1254_v48 }
0x1351   :  { %1280 = vst.msk [vmem:[%s1893_s3 + $0xc] sm:$0x3] %vm1273_vm5, %v1271_v49 }
0x1352   :  { %1286 = vsyncpa [#allocation5], 1 }

// kernel: rsan_forward.9
= control target key start
LH: loop header
LB: loop body
LE: loop exit
PB: predicated region body
PF: predicated region fallthrough
CT: control target
= control target key end

     0   :  { %s1160_s0 = inlined_call_operand.vmem [shape: f32[16,64], index: 0, kind: input, shape index: {}]   ;;  %s1161_s1 = inlined_call_operand.vmem [shape: f32[2,32], index: 1, kind: input, shape index: {}]   ;;  %s1162_s2 = inlined_call_operand.vmem [shape: f32[16,16], index: 2, kind: input, shape index: {}]   ;;  %s1163_s3 = inlined_call_operand.vmem [shape: f32[16,2], index: 3, kind: input, shape index: {}]   ;;  %s1164_s4 = inlined_call_operand.vmem [shape: f32[2,16], index: 4, kind: input, shape index: {}]   ;;  %s1165_s5 = inlined_call_operand.vmem [shape: f32[64,32], index: 5, kind: input, shape index: {}]   ;;  %s1166_s6 = inlined_call_operand.vmem [shape: f32[1,32], index: 6, kind: input, shape index: {}]   ;;  %s1167_s7 = inlined_call_operand.vmem [shape: f32[32,32], index: 7, kind: input, shape index: {}]   ;;  %s1168_s8 = inlined_call_operand.vmem [shape: f32[1,32], index: 8, kind: input, shape index: {}]   ;;  %s1169_s9 = inlined_call_operand.vmem [shape: f32[32,16], index: 9, kind: input, shape index: {}]   ;;  %s1170_s10 = inlined_call_operand.vmem [shape: f32[1,16], index: 10, kind: input, shape index: {}]   ;;  %s1171_s11 = inlined_call_operand.vmem [shape: f32[32,32], index: 11, kind: input, shape index: {}]   ;;  %s1172_s12 = inlined_call_operand.vmem [shape: f32[1,32], index: 12, kind: input, shape index: {}]   ;;  %s1173_s13 = inlined_call_operand.vmem [shape: f32[32,50], index: 13, kind: input, shape index: {}]   ;;  %s1174_s14 = inlined_call_operand.vmem [shape: f32[1,50], index: 14, kind: input, shape index: {}]   ;;  %s1175_s15 = inlined_call_operand.vmem [shape: f32[50,50], index: 15, kind: input, shape index: {}]   ;;  %s1176_s16 = inlined_call_operand.vmem [shape: f32[1,50], index: 16, kind: input, shape index: {}]   ;;  %s1177_s17 = inlined_call_operand.vmem [shape: f32[50,32], index: 17, kind: input, shape index: {}]   ;;  %s1178_s18 = inlined_call_operand.vmem [shape: f32[1,32], index: 18, kind: input, shape index: {}]   ;;  %s1179_s19 = inlined_call_operand.vmem [shape: f32[32,32], index: 19, kind: input, shape index: {}]   ;;  %s1180_s20 = inlined_call_operand.vmem [shape: f32[16,16], index: 20, kind: output, shape index: {0}]   ;;  %s1181_s21 = inlined_call_operand.vmem [shape: f32[16,16], index: 21, kind: output, shape index: {1}]   ;;  %s1182_s22 = inlined_call_operand.hbm [shape: f32[2,32], index: 22, kind: output, shape index: {2}]  }
   0x1   :  { %1187 = sst [smem:[#allocation5_spill]] %s1160_s0 }
   0x2   :  { %1188 = sst [smem:[#allocation6_spill]] %s1161_s1 }
   0x3   :  { %1189 = sst [smem:[#allocation7_spill]] %s1162_s2 }
   0x4   :  { %1190 = sst [smem:[#allocation8_spill]] %s1163_s3 }
   0x5   :  { %1191 = sst [smem:[#allocation9_spill]] %s1164_s4 }
   0x6   :  { %1192 = sst [smem:[#allocation10_spill]] %s1165_s5 }
   0x7   :  { %1193 = sst [smem:[#allocation11_spill]] %s1166_s6 }
   0x8   :  { %v158_v0 = vld [vmem:[%s1167_s7 + $0x18] sm:$0xff]  ;;  %v157_v1 = vld [vmem:[%s1167_s7 + $0x10] sm:$0xff]  ;;  %s1194_s23 = sld [smem:[#allocation10_spill]]  ;;  %v156_v3 = vld [vmem:[%s1167_s7 + $0x8] sm:$0xff]  ;;  %vm163_vm0 = vcmask 261120  }
   0x9   :  { %179 = vmatpush.msra.mxu1 %v158_v0  ;;  %v155_v6 = vld [vmem:[%s1167_s7] sm:$0xff]  ;;  %s1195_s29 = sld [smem:[#allocation6_spill]] }
   0xb   :  { %180 = vmatpush.msra.mxu1 %v157_v1 }
   0xd   :  { %181 = vmatpush.msra.mxu1 %v156_v3 }
   0xe   :  { %v82_v2 = vld [vmem:[%s1194_s23 + $0x38] sm:$0xff]  ;;  %v81_v4 = vld [vmem:[%s1194_s23 + $0x30] sm:$0xff]  ;;  %v80_v5 = vld [vmem:[%s1194_s23 + $0x28] sm:$0xff] }
   0xf   :  { %102 = vmatpush.msra.mxu0 %v82_v2  ;;  %v935_v7 = vld [vmem:[%s1195_s29] sm:$0x3]  ;;  %182 = vmatpush.msra.mxu1 %v155_v6  ;;  %v78_v9 = vld [vmem:[%s1194_s23 + $0x18] sm:$0xff] }
  0x10   :  { %v79_v8 = vld [vmem:[%s1194_s23 + $0x20] sm:$0xff] }
  0x11   :  { %103 = vmatpush.msra.mxu0 %v81_v4 }
  0x13   :  { %104 = vmatpush.msra.mxu0 %v80_v5 }
  0x14   :  { %28 = vsyncpa [#allocation3], 0  ;;  %688 = vmatmul.msk.f32.vlgmr.msra.gmra.mxu1 %vm163_vm0, %v935_v7  ;;  %v77_v10 = vld [vmem:[%s1194_s23 + $0x10] sm:$0xff]  ;;  %v76_v11 = vld [vmem:[%s1194_s23 + $0x8] sm:$0xff]  ;;  %s1196_s3 = sld [smem:[#allocation5_spill]]  ;;  %vm87_vm1 = vcmask 523264  }
  0x15   :  { %105 = vmatpush.msra.mxu0 %v79_v8  ;;  %v75_v12 = vld [vmem:[%s1194_s23] sm:$0xff]  ;;  %vm213_vm5 = vcmask 1041408   ;;  %s1197_s0 = sld [smem:[#allocation8_spill]]  ;;  %vm206_vm7 = vcmask 15360   ;;  %v245_v33 = vld [vmem:[%s1169_s9 + $0x18] sm:$0xff]  ;;  %v244_v35 = vld [vmem:[%s1169_s9 + $0x10] sm:$0xff] }
  0x16   :  { %v722_v15 = vld [vmem:[%s1168_s8] ss:$0 sm:$0xff]  ;;  %v333_v34 = vld [vmem:[%s1173_s13 + $0x18] sm:$0xff]  ;;  %268 = vmatpush.msra.mxu3 %v245_v33  ;;  %v332_v36 = vld [vmem:[%s1173_s13 + $0x10] sm:$0xff]  ;;  %s1198_s30 = sld [smem:[#allocation11_spill]]  ;;  %s671_s26 = sshll.u32 %s1182_s22, 4  ;;  %s672_s26 = int_to_ptr.hbm [resolvable:$true] %s671_s26 }
  0x17   :  { %106 = vmatpush.msra.mxu0 %v78_v9  ;;  %350 = vmatpush.msrb.mxu1 %v333_v34  ;;  %v243_v45 = vld [vmem:[%s1169_s9 + $0x8] sm:$0xff]  ;;  %v242_v48 = vld [vmem:[%s1169_s9] sm:$0xff]  ;;  %v367_v53 = vld [vmem:[%s1175_s15 + $0x30] sm:$0x3]  ;;  %s1199_s1 = sld [smem:[#allocation7_spill]] }
  0x18   :  { %269 = vmatpush.msra.mxu3 %v244_v35  ;;  %v331_v46 = vld [vmem:[%s1173_s13 + $0x8] sm:$0xff]  ;;  %v330_v49 = vld [vmem:[%s1173_s13] sm:$0xff]  ;;  %v364_v57 = vld [vmem:[%s1175_s15 + $0x18] sm:$0xff] }
  0x19   :  { %107 = vmatpush.msra.mxu0 %v77_v10  ;;  %351 = vmatpush.msrb.mxu1 %v332_v36  ;;  %v366_v54 = vld [vmem:[%s1175_s15 + $0x28] sm:$0xff]  ;;  %v365_v56 = vld [vmem:[%s1175_s15 + $0x20] sm:$0xff]  ;;  %v363_v59 = vld [vmem:[%s1175_s15 + $0x10] sm:$0xff] }
  0x1a   :  { %v69_v13 = vld [vmem:[%s1196_s3] sm:$0xff]  ;;  %v70_v14 = vld [vmem:[%s1196_s3 + $0x8] sm:$0xff]  ;;  %270 = vmatpush.msra.mxu3 %v243_v45  ;;  %v411_v33 = vld [vmem:[%s1177_s17 + $0x30] sm:$0x3] }
  0x1b   :  { %108 = vmatpush.msra.mxu0 %v76_v11  ;;  %v72_v30 = vld [vmem:[%s1197_s0] sm:$0xff]  ;;  %v73_v32 = vld [vmem:[%s1197_s0 + $0x8] sm:$0xff]  ;;  %352 = vmatpush.msrb.mxu1 %v331_v46 }
  0x1c   :  { %v723_v38 = vld [vmem:[%s1198_s30] ss:$0 sm:$0xff]  ;;  %271 = vmatpush.msra.mxu3 %v242_v48  ;;  %v410_v34 = vld [vmem:[%s1177_s17 + $0x28] sm:$0xff] }
  0x1d   :  { %109 = vmatpush.msra.mxu0 %v75_v12  ;;  %353 = vmatpush.msrb.mxu1 %v330_v49  ;;  %v409_v35 = vld [vmem:[%s1177_s17 + $0x20] sm:$0xff] }
  0x1e   :  { %684 = vmatmul.msk.f32.vlgmr.msra.gmra.mxu0 %vm87_vm1, %v69_v13  ;;  %702 = vmatpush.msk.msrb.mxu3 %vm213_vm5, %v411_v33 }
  0x1f   :  { %699 = vmatpush.msk.msra.mxu1 %vm213_vm5, %v367_v53 }
  0x20   :  { %435 = vmatpush.msrb.mxu3 %v410_v34 }
  0x21   :  { %392 = vmatpush.msra.mxu1 %v366_v54 }
  0x22   :  { %436 = vmatpush.msrb.mxu3 %v409_v35 }
  0x23   :  { %393 = vmatpush.msra.mxu1 %v365_v56 }
  0x25   :  { %394 = vmatpush.msra.mxu1 %v364_v57 }
  0x26   :  { %685 = vmatmul.msk.f32.gmra.mxu0 %vm87_vm1, %v70_v14  ;;  %vm372_vm1 = vcmask 408576  }
  0x27   :  { %395 = vmatpush.msra.mxu1 %v363_v59 }
  0x91   :  { %v184_v16 = vpop.f32.mrf.mxu1 }
  0x92   :  { %v185_v17 = vadd.f32 %v722_v15, %v184_v16 }
  0x94   :  { %v689_v18 = vmul.f32 -1.442695, %v185_v17 }
  0x96   :  { %729 = vpow2.f32 %v689_v18  ;;  %v362_v18 = vld [vmem:[%s1175_s15 + $0x8] sm:$0xff] }
  0x97   :  { %396 = vmatpush.msra.mxu1 %v362_v18 }
  0x9b   :  { %v111_v37 = vpop.f32.mrf.mxu0 }
  0x9c   :  { %v730_v19 = vpop.eup %729  ;;  %v112_v39 = vadd.f32 %v723_v38, %v111_v37 }
  0x9d   :  { %v190_v20 = vadd.f32 1.0, %v730_v19  ;;  %v361_v19 = vld [vmem:[%s1175_s15] sm:$0xff] }
  0x9e   :  { %v686_v40 = vmul.f32 -1.442695, %v112_v39  ;;  %397 = vmatpush.msra.mxu1 %v361_v19 }
  0x9f   :  { %731 = vrcp.f32 %v190_v20  ;;  %v202_v24 = vand.u32 2147483648, %v190_v20  ;;  %v200_v26 = vand.u32 2147483647, %v190_v20  ;;  %vm196_vm3 = vweird.f32 %v190_v20 }
  0xa0   :  { %733 = vpow2.f32 %v686_v40 }
  0xa1   :  { %v203_v28 = vor.u32 1.1754944e-38, %v202_v24  ;;  %vm201_vm6 = vcmp.eq.f32.partialorder %v200_v26, 8.507059e+37  ;;  %v724_v24 = vld [vmem:[%s1174_s14] ss:$0 sm:$0xff] }
  0xa3   :  { %v114_v41 = vpop.f32.mrf.mxu0 }
  0xa4   :  { %v115_v42 = vadd.f32 %v723_v38, %v114_v41  ;;  %v408_v38 = vld [vmem:[%s1177_s17 + $0x18] sm:$0xff]  ;;  %v407_v41 = vld [vmem:[%s1177_s17 + $0x10] sm:$0xff] }
  0xa5   :  { %v732_v21 = vpop.eup %731  ;;  %437 = vmatpush.msrb.mxu3 %v408_v38  ;;  %v511_v38 = vld [vmem:[%s1179_s19 + $0x10] sm:$0xff] }
  0xa6   :  { %v192_v22 = vmul.f32 %v732_v21, %v190_v20  ;;  %vm197_vm2 = vweird.f32 %v732_v21  ;;  %v687_v43 = vmul.f32 -1.442695, %v115_v42  ;;  %v734_v44 = vpop.eup %733  ;;  %v539_v20 = vld [vmem:[%s1171_s11 + $0x18] sm:$0xff] }
  0xa7   :  { %vm198_vm4 = vmor %vm196_vm3, %vm197_vm2  ;;  %v123_v47 = vadd.f32 1.0, %v734_v44  ;;  %438 = vmatpush.msrb.mxu3 %v407_v41 }
  0xa8   :  { %v193_v23 = vsub.f32 1.0, %v192_v22  ;;  %735 = vpow2.f32 %v687_v43  ;;  %v537_v22 = vld [vmem:[%s1171_s11 + $0x8] sm:$0xff] }
  0xa9   :  { %737 = vrcp.f32 %v123_v47  ;;  %vm130_vm8 = vweird.f32 %v123_v47  ;;  %v136_v63 = vand.u32 2147483648, %v123_v47  ;;  %v134_v1 = vand.u32 2147483647, %v123_v47 }
  0xaa   :  { %v194_v25 = vmul.f32 %v732_v21, %v193_v23  ;;  %v536_v23 = vld [vmem:[%s1171_s11] sm:$0xff] }
  0xab   :  { %v137_v3 = vor.u32 1.1754944e-38, %v136_v63  ;;  %vm135_vm11 = vcmp.eq.f32.partialorder %v134_v1, 8.507059e+37 }
  0xac   :  { %v195_v27 = vadd.f32 %v732_v21, %v194_v25 }
  0xae   :  { %v199_v29 = vsel %vm198_vm4, %v732_v21, %v195_v27  ;;  %v736_v50 = vpop.eup %735  ;;  %v538_v21 = vld [vmem:[%s1171_s11 + $0x10] sm:$0xff]  ;;  %v725_v27 = vld [vmem:[%s1170_s10] ss:$0 sm:$0xff] }
  0xaf   :  { %v204_v31 = vsel %vm201_vm6, %v203_v28, %v199_v29  ;;  %v124_v51 = vadd.f32 1.0, %v736_v50  ;;  %v738_v52 = vpop.eup %737 }
  0xb0   :  { %690 = vmatpush.msk.msra.mxu2 %vm213_vm5, %v204_v31  ;;  %v126_v55 = vmul.f32 %v738_v52, %v123_v47  ;;  %vm131_vm9 = vweird.f32 %v738_v52 }
  0xb1   :  { %691 = vmatmul.msk.f32.vlgmr.msra.gmra.mxu2 %vm206_vm7, %v72_v30  ;;  %739 = vrcp.f32 %v124_v51  ;;  %vm132_vm10 = vmor %vm130_vm8, %vm131_vm9  ;;  %vm145_vm12 = vweird.f32 %v124_v51  ;;  %v151_v9 = vand.u32 2147483648, %v124_v51  ;;  %v149_v12 = vand.u32 2147483647, %v124_v51 }
  0xb2   :  { %714 = vmatpush.msk.msrb.mxu2 %vm213_vm5, %v367_v53  ;;  %v127_v58 = vsub.f32 1.0, %v126_v55  ;;  %vm317_vm5 = vcmask 130048  }
  0xb3   :  { %v152_v13 = vor.u32 1.1754944e-38, %v151_v9  ;;  %vm150_vm15 = vcmp.eq.f32.partialorder %v149_v12, 8.507059e+37  ;;  %v726_v12 = vld [vmem:[%s1176_s16] ss:$0 sm:$0xff] }
  0xb4   :  { %715 = vmatpush.msrb.mxu2 %v366_v54  ;;  %v128_v61 = vmul.f32 %v738_v52, %v127_v58  ;;  %v320_v54 = vld [vmem:[%s1199_s1] sm:$0xff] }
  0xb6   :  { %716 = vmatpush.msrb.mxu2 %v365_v56  ;;  %v129_v0 = vadd.f32 %v738_v52, %v128_v61 }
  0xb7   :  { %v740_v60 = vpop.eup %739 }
  0xb8   :  { %717 = vmatpush.msrb.mxu2 %v364_v57  ;;  %v141_v62 = vmul.f32 %v740_v60, %v124_v51  ;;  %v133_v4 = vsel %vm132_vm10, %v738_v52, %v129_v0  ;;  %vm146_vm13 = vweird.f32 %v740_v60 }
  0xb9   :  { %692 = vmatmul.msk.f32.gmra.mxu2 %vm206_vm7, %v73_v32  ;;  %v138_v6 = vsel %vm135_vm11, %v137_v3, %v133_v4  ;;  %vm147_vm14 = vmor %vm145_vm12, %vm146_vm13  ;;  %v321_v3 = vld [vmem:[%s1199_s1 + $0x8] sm:$0xff]  ;;  %s1204_s1 = sld [smem:[#allocation9_spill]] }
  0xba   :  { %718 = vmatpush.msrb.mxu2 %v363_v59  ;;  %v142_v2 = vsub.f32 1.0, %v141_v62 }
  0xbc   :  { %v143_v5 = vmul.f32 %v740_v60, %v142_v2  ;;  %719 = vmatpush.msrb.mxu2 %v362_v18  ;;  %v727_v18 = vld [vmem:[%s1172_s12] ss:$0 sm:$0xff] }
  0xbe   :  { %v144_v11 = vadd.f32 %v740_v60, %v143_v5  ;;  %720 = vmatpush.msrb.mxu2 %v361_v19 }
  0xc0   :  { %v148_v14 = vsel %vm147_vm14, %v740_v60, %v144_v11  ;;  %556 = vmatpush.msra.mxu2 %v539_v20  ;;  %v405_v11 = vld [vmem:[%s1177_s17] sm:$0xff] }
  0xc1   :  { %v153_v15 = vsel %vm150_vm15, %v152_v13, %v148_v14  ;;  %v728_v20 = vld [vmem:[%s1178_s18] ss:$0 sm:$0xff] }
  0xc2   :  { %557 = vmatpush.msra.mxu2 %v538_v21 }
  0xc4   :  { %558 = vmatpush.msra.mxu2 %v537_v22 }
  0xc6   :  { %559 = vmatpush.msra.mxu2 %v536_v23 }
 0x134   :  { %v234_v8 = vpop.f32.mrf.mxu2 }
 0x135   :  { %v240_v10 = vmul.f32 %v234_v8, %v138_v6 }
 0x137   :  { %693 = vmatmul.msk.f32.vlgmr.msra.gmra.mxu3 %vm163_vm0, %v240_v10  ;;  %697 = vmatmul.msk.f32.vlgmr.msrb.gmra.mxu1 %vm163_vm0, %v240_v10 }
 0x13c   :  { %v237_v16 = vpop.f32.mrf.mxu2 }
 0x13d   :  { %v241_v17 = vmul.f32 %v237_v16, %v153_v15 }
 0x13f   :  { %694 = vmatmul.msk.f32.gmra.mxu3 %vm163_vm0, %v241_v17  ;;  %698 = vmatmul.msk.f32.gmra.mxu1 %vm163_vm0, %v241_v17 }
 0x1b4   :  { %v355_v25 = vpop.f32.mrf.mxu1 }
 0x1b5   :  { %v356_v26 = vadd.f32 %v724_v24, %v355_v25 }
 0x1b7   :  { %700 = vmatmul.msk.f32.vlgmr.msra.gmra.mxu1 %vm372_vm1, %v356_v26 }
 0x1ba   :  { %v273_v28 = vpop.f32.mrf.mxu3 }
 0x1bb   :  { %v274_v29 = vadd.f32 %v725_v27, %v273_v28 }
 0x1bc   :  { %v358_v30 = vpop.f32.mrf.mxu1 }
 0x1bd   :  { %v695_v31 = vmul.f32 -1.442695, %v274_v29  ;;  %v359_v32 = vadd.f32 %v724_v24, %v358_v30 }
 0x1bf   :  { %741 = vpow2.f32 %v695_v31  ;;  %701 = vmatmul.msk.f32.vlgmr.msrb.gmra.mxu2 %vm372_vm1, %v359_v32 }
 0x1c2   :  { %v276_v36 = vpop.f32.mrf.mxu3 }
 0x1c3   :  { %v277_v37 = vadd.f32 %v725_v27, %v276_v36 }
 0x1c5   :  { %v742_v39 = vpop.eup %741  ;;  %v696_v40 = vmul.f32 -1.442695, %v277_v37  ;;  %v512_v37 = vld [vmem:[%s1179_s19 + $0x18] sm:$0xff] }
 0x1c6   :  { %v285_v42 = vadd.f32 1.0, %v742_v39  ;;  %528 = vmatpush.msrb.mxu1 %v512_v37  ;;  %v510_v39 = vld [vmem:[%s1179_s19 + $0x8] sm:$0xff] }
 0x1c7   :  { %743 = vpow2.f32 %v696_v40  ;;  %709 = vmatmul.msk.f32.vlgmr.msra.gmra.mxu2 %vm163_vm0, %v240_v10  ;;  %v406_v10 = vld [vmem:[%s1177_s17 + $0x8] sm:$0xff] }
 0x1c8   :  { %745 = vrcp.f32 %v285_v42  ;;  %v298_v48 = vand.u32 2147483648, %v285_v42  ;;  %v296_v50 = vand.u32 2147483647, %v285_v42  ;;  %vm292_vm3 = vweird.f32 %v285_v42  ;;  %439 = vmatpush.msrb.mxu3 %v406_v10  ;;  %529 = vmatpush.msrb.mxu1 %v511_v38 }
 0x1ca   :  { %v299_v53 = vor.u32 1.1754944e-38, %v298_v48  ;;  %vm297_vm6 = vcmp.eq.f32.partialorder %v296_v50, 8.507059e+37  ;;  %440 = vmatpush.msrb.mxu3 %v405_v11  ;;  %530 = vmatpush.msrb.mxu1 %v510_v39 }
 0x1cd   :  { %v744_v43 = vpop.eup %743 }
 0x1ce   :  { %v746_v44 = vpop.eup %745  ;;  %v286_v45 = vadd.f32 1.0, %v744_v43 }
 0x1cf   :  { %v288_v46 = vmul.f32 %v746_v44, %v285_v42  ;;  %710 = vmatmul.msk.f32.gmra.mxu2 %vm163_vm0, %v241_v17  ;;  %vm293_vm2 = vweird.f32 %v746_v44 }
 0x1d0   :  { %747 = vrcp.f32 %v286_v45  ;;  %vm294_vm4 = vmor %vm292_vm3, %vm293_vm2  ;;  %v313_v60 = vand.u32 2147483648, %v286_v45  ;;  %v311_v62 = vand.u32 2147483647, %v286_v45  ;;  %vm307_vm8 = vweird.f32 %v286_v45 }
 0x1d1   :  { %v289_v47 = vsub.f32 1.0, %v288_v46 }
 0x1d2   :  { %v314_v2 = vor.u32 1.1754944e-38, %v313_v60  ;;  %vm312_vm10 = vcmp.eq.f32.partialorder %v311_v62, 8.507059e+37 }
 0x1d3   :  { %v290_v49 = vmul.f32 %v746_v44, %v289_v47 }
 0x1d5   :  { %v291_v51 = vadd.f32 %v746_v44, %v290_v49 }
 0x1d6   :  { %v748_v52 = vpop.eup %747 }
 0x1d7   :  { %v295_v55 = vsel %vm294_vm4, %v746_v44, %v291_v51  ;;  %v303_v56 = vmul.f32 %v748_v52, %v286_v45  ;;  %vm308_vm7 = vweird.f32 %v748_v52 }
 0x1d8   :  { %v300_v57 = vsel %vm297_vm6, %v299_v53, %v295_v55  ;;  %vm309_vm9 = vmor %vm307_vm8, %vm308_vm7 }
 0x1d9   :  { %v304_v58 = vsub.f32 1.0, %v303_v56  ;;  %318 = vst.msk [vmem:[%s1180_s20] sm:$0xff] %vm317_vm5, %v300_v57  ;;  %v322_v59 = vsub.f32 %v320_v54, %v300_v57 }
 0x1db   :  { %v305_v61 = vmul.f32 %v748_v52, %v304_v58  ;;  %v324_v63 = vmax.f32 %v322_v59, 0.0 }
 0x1dd   :  { %v306_v0 = vadd.f32 %v748_v52, %v305_v61  ;;  %v326_v1 = vmin.f32 %v324_v63, 1.0 }
 0x1df   :  { %v310_v4 = vsel %vm309_vm9, %v748_v52, %v306_v0  ;;  %328 = vst.msk [vmem:[%s1181_s21] sm:$0xff] %vm317_vm5, %v326_v1 }
 0x1e0   :  { %v315_v5 = vsel %vm312_vm10, %v314_v2, %v310_v4 }
 0x1e1   :  { %319 = vst.msk [vmem:[%s1180_s20 + $0x8] sm:$0xff] %vm317_vm5, %v315_v5  ;;  %v323_v6 = vsub.f32 %v321_v3, %v315_v5 }
 0x1e3   :  { %v325_v8 = vmax.f32 %v323_v6, 0.0 }
 0x1e5   :  { %v327_v9 = vmin.f32 %v325_v8, 1.0 }
 0x1e7   :  { %329 = vst.msk [vmem:[%s1181_s21 + $0x8] sm:$0xff] %vm317_vm5, %v327_v9 }
 0x234   :  { %v399_v13 = vpop.f32.mrf.mxu1 }
 0x235   :  { %v400_v14 = vadd.f32 %v726_v12, %v399_v13  ;;  %v74_v13 = vld [vmem:[%s1204_s1] sm:$0x3] }
 0x237   :  { %703 = vmatmul.msk.f32.vlgmr.msrb.gmra.mxu3 %vm372_vm1, %v400_v14 }
 0x242   :  { %v402_v15 = vpop.f32.mrf.mxu2 }
 0x243   :  { %v403_v16 = vadd.f32 %v726_v12, %v402_v15 }
 0x245   :  { %704 = vmatmul.msk.f32.gmra.mxu3 %vm372_vm1, %v403_v16 }
 0x24a   :  { %v561_v17 = vpop.f32.mrf.mxu2 }
 0x24b   :  { %v562_v22 = vadd.f32 %v727_v18, %v561_v17 }
 0x24d   :  { %v711_v27 = vmul.f32 -1.442695, %v562_v22  ;;  %v509_v22 = vld [vmem:[%s1179_s19] sm:$0xff]  ;;  %s795_s19 = smov [#allocation2]  }
 0x24e   :  { %531 = vmatpush.msrb.mxu1 %v509_v22  ;;  %s669_s24 = sshll.u32 %s795_s19, 4  ;;  %s670_s24 = int_to_ptr.vmem [resolvable:$true] %s669_s24 }
 0x252   :  { %v564_v19 = vpop.f32.mrf.mxu2 }
 0x253   :  { %v565_v21 = vadd.f32 %v727_v18, %v564_v19 }
 0x255   :  { %v712_v25 = vmul.f32 -1.442695, %v565_v21 }
 0x2ba   :  { %v442_v23 = vpop.f32.mrf.mxu3 }
 0x2bb   :  { %v443_v24 = vadd.f32 %v728_v20, %v442_v23 }
 0x2bd   :  { %v705_v26 = vmul.f32 -1.442695, %v443_v24 }
 0x2bf   :  { %749 = vpow2.f32 %v705_v26 }
 0x2c0   :  { %751 = vpow2.f32 %v712_v25 }
 0x2c1   :  { %753 = vpow2.f32 %v711_v27 }
 0x2c5   :  { %v750_v28 = vpop.eup %749 }
 0x2c6   :  { %v752_v29 = vpop.eup %751  ;;  %v1101_v31 = vadd.f32 1.0, %v750_v28 }
 0x2c7   :  { %v754_v30 = vpop.eup %753  ;;  %v1103_v34 = vadd.f32 1.0, %v752_v29 }
 0x2c8   :  { %v445_v32 = vpop.f32.mrf.mxu3  ;;  %v1105_v35 = vadd.f32 1.0, %v754_v30  ;;  %755 = vrcp.f32 %v1101_v31  ;;  %vm461_vm13 = vweird.f32 %v1101_v31  ;;  %v467_v61 = vand.u32 2147483648, %v1101_v31 }
 0x2c9   :  { %v446_v33 = vadd.f32 %v728_v20, %v445_v32  ;;  %v465_v0 = vand.u32 2147483647, %v1101_v31  ;;  %vm595_vm4 = vweird.f32 %v1103_v34  ;;  %v599_v3 = vand.u32 2147483647, %v1103_v34 }
 0x2ca   :  { %v601_v4 = vand.u32 2147483648, %v1103_v34  ;;  %v468_v10 = vor.u32 1.1754944e-38, %v467_v61  ;;  %v586_v12 = vand.u32 2147483648, %v1105_v35  ;;  %vm580_vm9 = vweird.f32 %v1105_v35 }
 0x2cb   :  { %v706_v36 = vmul.f32 -1.442695, %v446_v33  ;;  %vm466_vm8 = vcmp.eq.f32.partialorder %v465_v0, 8.507059e+37  ;;  %v584_v15 = vand.u32 2147483647, %v1105_v35 }
 0x2cc   :  { %v602_v17 = vor.u32 1.1754944e-38, %v601_v4  ;;  %v587_v20 = vor.u32 1.1754944e-38, %v586_v12 }
 0x2cd   :  { %757 = vpow2.f32 %v706_v36 }
 0x2ce   :  { %759 = vrcp.f32 %v1103_v34  ;;  %v756_v40 = vpop.eup %755 }
 0x2cf   :  { %761 = vrcp.f32 %v1105_v35  ;;  %v457_v45 = vmul.f32 %v756_v40, %v1101_v31  ;;  %vm462_vm11 = vweird.f32 %v756_v40 }
 0x2d0   :  { %vm1124_vm2 = vmor %vm461_vm13, %vm462_vm11  ;;  %vm600_vm11 = vcmp.eq.f32.partialorder %v599_v3, 8.507059e+37  ;;  %vm628_vm13 = vcmask 254976  }
 0x2d1   :  { %v458_v48 = vsub.f32 1.0, %v457_v45 }
 0x2d3   :  { %v758_v41 = vpop.eup %757  ;;  %v459_v53 = vmul.f32 %v756_v40, %v458_v48 }
 0x2d4   :  { %v760_v42 = vpop.eup %759  ;;  %v455_v43 = vadd.f32 1.0, %v758_v41 }
 0x2d5   :  { %v762_v44 = vpop.eup %761  ;;  %v591_v46 = vmul.f32 %v760_v42, %v1103_v34  ;;  %v460_v60 = vadd.f32 %v756_v40, %v459_v53  ;;  %vm596_vm14 = vweird.f32 %v760_v42 }
 0x2d6   :  { %763 = vrcp.f32 %v455_v43  ;;  %v576_v47 = vmul.f32 %v762_v44, %v1105_v35  ;;  %v482_v56 = vand.u32 2147483648, %v455_v43  ;;  %v480_v59 = vand.u32 2147483647, %v455_v43  ;;  %vm1135_vm7 = vmor %vm595_vm4, %vm596_vm14 }
 0x2d7   :  { %v592_v49 = vsub.f32 1.0, %v591_v46  ;;  %vm581_vm15 = vweird.f32 %v762_v44  ;;  %vm476_vm1 = vweird.f32 %v455_v43  ;;  %v464_v6 = vsel %vm1124_vm2, %v756_v40, %v460_v60 }
 0x2d8   :  { %v577_v51 = vsub.f32 1.0, %v576_v47  ;;  %v483_v2 = vor.u32 1.1754944e-38, %v482_v56  ;;  %vm481_vm6 = vcmp.eq.f32.partialorder %v480_v59, 8.507059e+37  ;;  %v469_v16 = vsel %vm466_vm8, %v468_v10, %v464_v6  ;;  %vm582_vm10 = vmor %vm580_vm9, %vm581_vm15 }
 0x2d9   :  { %v593_v55 = vmul.f32 %v760_v42, %v592_v49 }
 0x2da   :  { %v578_v57 = vmul.f32 %v762_v44, %v577_v51 }
 0x2db   :  { %v594_v1 = vadd.f32 %v760_v42, %v593_v55 }
 0x2dc   :  { %v764_v50 = vpop.eup %763  ;;  %v579_v8 = vadd.f32 %v762_v44, %v578_v57 }
 0x2dd   :  { %v472_v52 = vmul.f32 %v764_v50, %v455_v43  ;;  %vm477_vm12 = vweird.f32 %v764_v50  ;;  %v598_v14 = vsel %vm1135_vm7, %v760_v42, %v594_v1 }
 0x2de   :  { %vm478_vm3 = vmor %vm476_vm1, %vm477_vm12  ;;  %v583_v18 = vsel %vm582_vm10, %v762_v44, %v579_v8  ;;  %v603_v19 = vsel %vm600_vm11, %v602_v17, %v598_v14  ;;  %vm585_vm12 = vcmp.eq.f32.partialorder %v584_v15, 8.507059e+37 }
 0x2df   :  { %v473_v54 = vsub.f32 1.0, %v472_v52  ;;  %v588_v21 = vsel %vm585_vm12, %v587_v20, %v583_v18 }
 0x2e1   :  { %v474_v58 = vmul.f32 %v764_v50, %v473_v54 }
 0x2e3   :  { %v475_v62 = vadd.f32 %v764_v50, %v474_v58 }
 0x2e5   :  { %v479_v5 = vsel %vm478_vm3, %v764_v50, %v475_v62 }
 0x2e6   :  { %v484_v9 = vsel %vm481_vm6, %v483_v2, %v479_v5 }
 0x2e7   :  { %503 = vmatpush.msrb.mxu0 %v484_v9 }
 0x2e9   :  { %504 = vmatpush.msrb.mxu0 %v469_v16 }
 0x2ea   :  { %707 = vmatmul.msk.f32.vlgmr.msrb.gmra.mxu0 %vm317_vm5, %v74_v13 }
 0x2eb   :  { %619 = vmatpush.msra.mxu0 %v603_v19 }
 0x2ed   :  { %620 = vmatpush.msra.mxu0 %v588_v21 }
 0x2f2   :  { %713 = vmatmul.msk.f32.vlgmr.msra.gmra.mxu0 %vm317_vm5, %v74_v13 }
 0x367   :  { %v506_v23 = vpop.f32.mrf.mxu0 }
 0x368   :  { %708 = vmatmul.msk.f32.vlgmr.msrb.gmra.mxu1 %vm163_vm0, %v506_v23 }
 0x36f   :  { %v622_v24 = vpop.f32.mrf.mxu0 }
 0x3e5   :  { %v533_v25 = vpop.f32.mrf.mxu1 }
 0x3e6   :  { %v625_v26 = vmul.f32 %v622_v24, %v533_v25 }
 0x3e8   :  { %v626_v27 = vadd.f32 %v625_v26, %v935_v7 }
 0x3ea   :  { %v627_v28 = vmul.f32 %v626_v27, %v626_v27 }
 0x3ec   :  { %v629_v29 = vsel %vm628_vm13, %v627_v28, 0.0 }
 0x3ed   :  { %630 = vadd.xlane.f32.xlu0 %v629_v29 }
 0x460   :  { %v631_v30 = vpop.xlane.xlu0 %630 }
 0x461   :  { %765 = vrsqrt.f32 %v631_v30  ;;  %vm639_vm0 = vcmp.eq.f32.partialorder %v631_v30, inf  ;;  %v642_v38 = vand.u32 2147483648, %v631_v30  ;;  %vm641_vm5 = vcmp.eq.f32.partialorder %v631_v30, 0.0 }
 0x467   :  { %v766_v31 = vpop.eup %765 }
 0x468   :  { %v633_v32 = vmul.f32 %v766_v31, %v631_v30 }
 0x46a   :  { %v634_v33 = vmul.f32 %v766_v31, %v633_v32 }
 0x46c   :  { %v635_v34 = vmul.f32 0.5, %v634_v33 }
 0x46e   :  { %v636_v35 = vsub.f32 1.5, %v635_v34 }
 0x470   :  { %v637_v36 = vmul.f32 %v766_v31, %v636_v35 }
 0x472   :  { %v638_v37 = vmul.f32 %v637_v36, %v631_v30 }
 0x474   :  { %v640_v39 = vsel %vm639_vm0, %v631_v30, %v638_v37 }
 0x475   :  { %v643_v40 = vsel %vm641_vm5, %v642_v38, %v640_v39 }
 0x476   :  { %767 = vrcp.f32 %v643_v40  ;;  %v655_v43 = vand.u32 2147483648, %v643_v40  ;;  %v653_v45 = vand.u32 2147483647, %v643_v40  ;;  %vm649_vm15 = vweird.f32 %v643_v40 }
 0x478   :  { %v656_v47 = vor.u32 1.1754944e-38, %v655_v43  ;;  %vm654_vm2 = vcmp.eq.f32.partialorder %v653_v45, 8.507059e+37 }
 0x47c   :  { %v768_v7 = vpop.eup %767 }
 0x47d   :  { %v645_v41 = vmul.f32 %v768_v7, %v643_v40  ;;  %vm650_vm14 = vweird.f32 %v768_v7 }
 0x47e   :  { %vm651_vm1 = vmor %vm649_vm15, %vm650_vm14 }
 0x47f   :  { %v646_v42 = vsub.f32 1.0, %v645_v41 }
 0x481   :  { %v647_v44 = vmul.f32 %v768_v7, %v646_v42 }
 0x483   :  { %v648_v46 = vadd.f32 %v768_v7, %v647_v44 }
 0x485   :  { %v652_v48 = vsel %vm651_vm1, %v768_v7, %v648_v46 }
 0x486   :  { %v657_v49 = vsel %vm654_vm2, %v656_v47, %v652_v48 }
 0x487   :  { %v658_v50 = vmul.f32 %v657_v49, %v626_v27 }
 0x489   :  { %659 = vst.msk [vmem:[#allocation2] sm:$0x3] %vm628_vm13, %v658_v50 }
 0x48a   :  { %674 = dma.vmem_to_hbm [thread:$0]  %s670_s24, 32, %s672_s26, [#allocation3]  }
 0x48b   :  { %793 = dma.done.wait [#allocation3], 32  }
 0x48c   :  { %794 = vsyncadd [#allocation3], 4294967264 }
 0x48d   :  { %683 = vsyncpa [#allocation3], 1 }

</bundles_post_ra>
